<compile_context>
chip_gen: v7x
topology: tpu7x:2x2x1
jax: 0.10.0
libtpu: 0.0.40
codegen_flags: <defaults>
</compile_context>

<pallas_src>
import functools
import numpy as np
import jax
import jax.numpy as jnp
from jax import lax
from jax.experimental import pallas as pl
from jax.experimental.pallas import tpu as pltpu  # noqa: F401

# ---------------- small, deterministic hyper-parameters -----------------
N_FEATS = 16      # n_feats
DENSE   = 128     # fixed by the module (Linear(n_feats, 128), Linear(128, 128))
HIDDEN  = 32      # LSTM hidden size
NUM_CLS = 8       # num_classes
KSIZE   = 10      # Conv1d kernel size
STRIDE  = 2
PAD     = KSIZE // 2
LN_EPS  = 1e-5    # torch.nn.LayerNorm default eps
BP      = 8       # batch padded to one full sublane group (B <= 8)

KF = KSIZE * N_FEATS            # 160 = im2col contraction width

# Row offsets inside the single packed weight slab (all multiples of 8).
R_WCONV = 0                     # (160,128) im2col conv weight, cols >= 16 zero
R_W1    = R_WCONV + KF          # 160: (16,128)   Linear(F,128)^T
R_W2    = R_W1 + N_FEATS        # 176: (128,128)  Linear(128,128)^T
R_WIH   = R_W2 + DENSE          # 304: (128,128)  LSTM W_ih^T (g-gate cols x2)
R_WHH   = R_WIH + DENSE         # 432: (32,128)   LSTM W_hh^T (g-gate cols x2)
R_WFC   = R_WHH + HIDDEN        # 464: (32,128)   final_fc^T zero-padded to 128 cols
R_P128  = R_WFC + HIDDEN        # 496: 8 rows: b1,g1,be1,b2,g2,be2,b_lstm(x2 g),bfc_pad
R_PS    = R_P128 + 8            # 504: 8 rows: bconv,gn0,bn0,ln2_g,ln2_b,0,0,0
W_ROWS  = R_PS + 8              # 512

_INV_SQRT2 = 0.7071067811865476


def gelu_exact(x):
    # F.gelu default = exact erf formulation
    return 0.5 * x * (1.0 + lax.erf(x * _INV_SQRT2))


def layernorm(x, gamma, beta):
    mu = jnp.mean(x, axis=-1, keepdims=True)
    var = jnp.mean(jnp.square(x - mu), axis=-1, keepdims=True)
    return (x - mu) * lax.rsqrt(var + LN_EPS) * gamma + beta


# ===================== fused kernel: conv + dense + LSTM + head ==============
# act_ref : (t_out*BP + 2*BP, KF)   rows 0..t_out*BP-1 = im2col windows (row = t*BP+b),
#                                   next BP rows = h0 (cols 0:H), last BP rows = c0.
# w_ref   : (W_ROWS, 128)           packed weight slab, layout per R_* constants.
# out_ref : (t_out*BP + BP, 128)    per-step logits slabs + [h_n | c_n | 0] tail slab.
def _fused_kernel(act_ref, w_ref, out_ref, *, t_out):
    H = HIDDEN
    TB = t_out * BP

    xcol = act_ref[0:TB, :]                                  # (TB, 160)
    h_t = act_ref[TB:TB + BP, 0:H]                           # (BP, H)
    c_t = act_ref[TB + BP:TB + 2 * BP, 0:H]                  # (BP, H)

    # ---- Conv1d(F, F, k=10, stride=2, pad=5) as one im2col matmul -----------
    acc = jnp.dot(xcol, w_ref[R_WCONV:R_WCONV + KF, :],
                  preferred_element_type=jnp.float32)[:, 0:N_FEATS]
    acc = acc + w_ref[R_PS + 0:R_PS + 1, 0:N_FEATS]          # conv bias

    # ---- ActDropNormCNN1D: LayerNorm(F) -> GELU (dropout = identity) --------
    y = gelu_exact(layernorm(acc,
                             w_ref[R_PS + 1:R_PS + 2, 0:N_FEATS],
                             w_ref[R_PS + 2:R_PS + 3, 0:N_FEATS]))

    # ---- dense: Linear -> LayerNorm -> GELU (x2) -----------------------------
    h = (jnp.dot(y, w_ref[R_W1:R_W1 + N_FEATS, :], preferred_element_type=jnp.float32)
         + w_ref[R_P128 + 0:R_P128 + 1, :])
    h = gelu_exact(layernorm(h, w_ref[R_P128 + 1:R_P128 + 2, :],
                             w_ref[R_P128 + 2:R_P128 + 3, :]))
    h = (jnp.dot(h, w_ref[R_W2:R_W2 + DENSE, :], preferred_element_type=jnp.float32)
         + w_ref[R_P128 + 3:R_P128 + 4, :])
    h = gelu_exact(layernorm(h, w_ref[R_P128 + 4:R_P128 + 5, :],
                             w_ref[R_P128 + 5:R_P128 + 6, :]))
    # h: (TB, 128), time-major rows (row = t*BP + b), 8 rows per timestep.

    # ---- LSTM input projection hoisted out of the serial loop ----------------
    gates_x = (jnp.dot(h, w_ref[R_WIH:R_WIH + DENSE, :],
                       preferred_element_type=jnp.float32)
               + w_ref[R_P128 + 6:R_P128 + 7, :])            # (TB, 4H); g cols carry 2a

    # hoisted loop invariants
    whh = w_ref[R_WHH:R_WHH + H, :]                          # (H, 4H), g cols x2
    wfc = w_ref[R_WFC:R_WFC + H, :]                          # (H, 128) padded final_fc
    bfc = w_ref[R_P128 + 7:R_P128 + 8, :]                    # (1, 128)
    g_ln2 = w_ref[R_PS + 3:R_PS + 4, 0:H]
    b_ln2 = w_ref[R_PS + 4:R_PS + 5, 0:H]

    # static, fully unrolled recurrent loop; h_t/c_t stay in registers.
    # TODO(synk): could pin whh in MXU weight regs via pltpu.matmul_push_rhs/acc_lhs,
    # but the portable jnp.dot path is kept for robustness.
    for t in range(t_out):
        g = gates_x[t * BP:(t + 1) * BP, :] + jnp.dot(
            h_t, whh, preferred_element_type=jnp.float32)    # (BP, 4H), aligned slab read
        sg = jax.nn.sigmoid(g)                               # ONE EUP pass for all gates
        i_g = sg[:, 0:H]
        f_g = sg[:, H:2 * H]
        g_g = 2.0 * sg[:, 2 * H:3 * H] - 1.0                 # tanh(a) = 2*sigmoid(2a)-1
        o_g = sg[:, 3 * H:4 * H]
        c_t = f_g * c_t + i_g * g_g
        h_t = o_g * jnp.tanh(c_t)

        # fused head: LayerNorm(H) -> GELU -> final_fc, lane-dense aligned store.
        z = gelu_exact(layernorm(h_t, g_ln2, b_ln2))
        out_ref[t * BP:(t + 1) * BP, :] = (
            jnp.dot(z, wfc, preferred_element_type=jnp.float32) + bfc)

    # tail slab: [h_n | c_n | zeros] -> one aligned (8,128) store
    tail = jnp.concatenate(
        [h_t, c_t, jnp.zeros((BP, DENSE - 2 * H), jnp.float32)], axis=1)
    out_ref[TB:TB + BP, :] = tail


# =========================== full forward (wrapper) ==========================
def speech_recognition_forward(x, hidden, P):
    h0, c0 = hidden                                  # (1, B, H) each
    B = x.shape[0]
    T = x.shape[-1]
    assert B <= BP

    # layout prep (tiny, fuses into a few XLA ops): squeeze, pad batch to 8,
    # pad time, time-major stride-2 im2col window matrix with rows t*BP + b,
    # and (h0, c0) appended as two aligned 8-row slabs of the same width.
    xs = x[:, 0]                                              # (B, F, T)
    xs = jnp.pad(xs, ((0, BP - B), (0, 0), (0, 0)))           # (BP, F, T)
    x_pad = jnp.pad(xs, ((0, 0), (0, 0), (PAD, PAD)))         # (BP, F, T_pad)
    t_pad = T + 2 * PAD
    t_out = (t_pad - KSIZE) // STRIDE + 1
    x_tm = jnp.transpose(x_pad, (2, 0, 1))                    # (T_pad, BP, F)
    cols = [x_tm[k:k + STRIDE * (t_out - 1) + 1:STRIDE]       # (t_out, BP, F) per tap
            for k in range(KSIZE)]
    xcol = jnp.concatenate(cols, axis=-1).reshape(t_out * BP, KF)

    h0p = jnp.pad(h0[0], ((0, BP - B), (0, 0)))               # (BP, H)
    c0p = jnp.pad(c0[0], ((0, BP - B), (0, 0)))
    hc = jnp.concatenate([h0p, c0p], axis=0)                  # (2*BP, H)
    hc = jnp.pad(hc, ((0, 0), (0, KF - HIDDEN)))              # (2*BP, KF)
    act = jnp.concatenate([xcol, hc], axis=0)                 # (t_out*BP + 2*BP, KF)

    out = pl.pallas_call(
        functools.partial(_fused_kernel, t_out=t_out),
        out_shape=jax.ShapeDtypeStruct((t_out * BP + BP, DENSE), jnp.float32),
    )(act, P['wslab'])

    logits = out[:t_out * BP, :NUM_CLS].reshape(t_out, BP, NUM_CLS)[:, :B, :]
    hn = out[t_out * BP:t_out * BP + B, 0:HIDDEN][None]
    cn = out[t_out * BP:t_out * BP + B, HIDDEN:2 * HIDDEN][None]
    return logits, (hn, cn)


# ======================= pure-JAX reference (correctness) ====================
def reference_forward(x, hidden, P):
    h0, c0 = hidden
    xs = x[:, 0]
    x_pad = jnp.pad(xs, ((0, 0), (0, 0), (PAD, PAD)))
    t_out = (x_pad.shape[-1] - KSIZE) // STRIDE + 1
    acc = jnp.zeros((xs.shape[0], N_FEATS, t_out), jnp.float32)
    for k in range(KSIZE):
        win = x_pad[:, :, k:k + STRIDE * (t_out - 1) + 1:STRIDE]
        acc = acc + jnp.einsum('oi,bit->bot', P['wconv'][:, :, k], win)
    acc = acc + P['bconv'][None, :, None]
    y = jnp.transpose(acc, (0, 2, 1))
    y = gelu_exact(layernorm(y, P['gn0'], P['bn0']))
    h = jnp.einsum('btf,fd->btd', y, P['w1t']) + P['b1']
    h = gelu_exact(layernorm(h, P['g1'], P['be1']))
    h = jnp.einsum('btd,de->bte', h, P['w2t']) + P['b2']
    h = gelu_exact(layernorm(h, P['g2'], P['be2']))
    x_seq = jnp.transpose(h, (1, 0, 2))

    def step(carry, x_t):
        hh, cc = carry
        gates = x_t @ P['wih_t'] + hh @ P['whh_t'] + P['b_lstm']
        H = HIDDEN
        i_g = jax.nn.sigmoid(gates[:, :H])
        f_g = jax.nn.sigmoid(gates[:, H:2 * H])
        g_g = jnp.tanh(gates[:, 2 * H:3 * H])
        o_g = jax.nn.sigmoid(gates[:, 3 * H:])
        cc = f_g * cc + i_g * g_g
        hh = o_g * jnp.tanh(cc)
        return (hh, cc), hh

    (hn, cn), outs = lax.scan(step, (h0[0], c0[0]), x_seq)
    z = gelu_exact(layernorm(outs, P['ln2_g'], P['ln2_b']))
    logits = jnp.einsum('tbh,hc->tbc', z, P['wfc_t']) + P['bfc']
    return logits, (hn[None], cn[None])


# =============================== parameters ==================================
def init_params(key):
    ks = list(jax.random.split(key, 24))

    def nrm(shape, scale=0.1):
        return jax.random.normal(ks.pop(), shape, jnp.float32) * scale

    P = {}
    P['wconv'] = nrm((N_FEATS, N_FEATS, KSIZE), 0.15)          # Conv1d weight (O,I,K)
    P['bconv'] = nrm((N_FEATS,), 0.05)
    P['gn0'] = 1.0 + nrm((1, N_FEATS), 0.05)                   # ActDropNorm LayerNorm
    P['bn0'] = nrm((1, N_FEATS), 0.05)
    P['w1t'] = nrm((N_FEATS, DENSE), 0.1)                      # Linear(F,128) transposed
    P['b1'] = nrm((1, DENSE), 0.05)
    P['g1'] = 1.0 + nrm((1, DENSE), 0.05)
    P['be1'] = nrm((1, DENSE), 0.05)
    P['w2t'] = nrm((DENSE, DENSE), 0.05)                       # Linear(128,128) transposed
    P['b2'] = nrm((1, DENSE), 0.05)
    P['g2'] = 1.0 + nrm((1, DENSE), 0.05)
    P['be2'] = nrm((1, DENSE), 0.05)
    P['wih_t'] = nrm((DENSE, 4 * HIDDEN), 0.05)                # LSTM W_ih^T
    P['whh_t'] = nrm((HIDDEN, 4 * HIDDEN), 0.05)               # LSTM W_hh^T
    # NOTE: combined bias (b_ih + b_hh); sum the two PyTorch biases when importing weights.
    P['b_lstm'] = nrm((1, 4 * HIDDEN), 0.05)
    P['ln2_g'] = 1.0 + nrm((1, HIDDEN), 0.05)                  # layer_norm2
    P['ln2_b'] = nrm((1, HIDDEN), 0.05)
    P['wfc_t'] = nrm((HIDDEN, NUM_CLS), 0.1)                   # final_fc transposed
    P['bfc'] = nrm((1, NUM_CLS), 0.05)

    # ---- single packed kernel weight slab (computed once) -------------------
    def pad_lanes(a):
        return jnp.pad(a, ((0, 0), (0, DENSE - a.shape[1])))

    # fold tanh(a) = 2*sigmoid(2a)-1 into the packed LSTM params (g-gate cols x2)
    gscale = jnp.ones((1, 4 * HIDDEN), jnp.float32).at[:, 2 * HIDDEN:3 * HIDDEN].set(2.0)
    wih_s = P['wih_t'] * gscale
    whh_s = P['whh_t'] * gscale
    blstm_s = P['b_lstm'] * gscale

    # im2col conv weight: row k*F+i = wconv[o, i, k]  -> (K*F, F), lane-padded
    wconv_col = jnp.transpose(P['wconv'], (2, 1, 0)).reshape(KF, N_FEATS)

    p128 = jnp.concatenate([P['b1'], P['g1'], P['be1'],
                            P['b2'], P['g2'], P['be2'],
                            blstm_s, pad_lanes(P['bfc'])], axis=0)           # (8,128)
    psmall = jnp.concatenate([pad_lanes(P['bconv'].reshape(1, N_FEATS)),
                              pad_lanes(P['gn0']), pad_lanes(P['bn0']),
                              pad_lanes(P['ln2_g']), pad_lanes(P['ln2_b']),
                              jnp.zeros((3, DENSE), jnp.float32)], axis=0)   # (8,128)

    P['wslab'] = jnp.concatenate([
        pad_lanes(wconv_col),      # rows   0:160
        P['w1t'],                  # rows 160:176
        P['w2t'],                  # rows 176:304
        wih_s,                     # rows 304:432
        whh_s,                     # rows 432:464
        pad_lanes(P['wfc_t']),     # rows 464:496
        p128,                      # rows 496:504
        psmall,                    # rows 504:512
    ], axis=0)
    assert P['wslab'].shape == (W_ROWS, DENSE)
    return P


if __name__ == "__main__":
    key = jax.random.PRNGKey(0)
    k_p, k_x = jax.random.split(key)
    P = init_params(k_p)

    B, T = 2, 16
    x = jax.random.normal(k_x, (B, 1, N_FEATS, T), jnp.float32)   # (batch,1,feature,time)
    h0 = jnp.zeros((1, B, HIDDEN), jnp.float32)                   # _init_hidden
    c0 = jnp.zeros((1, B, HIDDEN), jnp.float32)

    fwd = jax.jit(speech_recognition_forward)
    logits, (hn, cn) = fwd(x, (h0, c0), P)
    jax.block_until_ready((logits, hn, cn))

    ref_logits, (ref_hn, ref_cn) = reference_forward(x, (h0, c0), P)
    t_out = T // STRIDE + 1
    assert logits.shape == (t_out, B, NUM_CLS)
    assert hn.shape == (1, B, HIDDEN) and cn.shape == (1, B, HIDDEN)
    ok = (np.allclose(np.asarray(logits), np.asarray(ref_logits), atol=5e-3, rtol=5e-3)
          and np.allclose(np.asarray(hn), np.asarray(ref_hn), atol=5e-3, rtol=5e-3)
          and np.allclose(np.asarray(cn), np.asarray(ref_cn), atol=5e-3, rtol=5e-3))
    if not ok:
        raise SystemExit("numerical mismatch vs JAX reference")
    print("KERNEL_OK")
</pallas_src>

<mosaic_0001>
module attributes {stable_mosaic.version = 11 : i64} {
  func.func @_fused_kernel(%arg0: memref<88x160xf32, #tpu.memory_space<vmem>>, %arg1: memref<512x128xf32, #tpu.memory_space<vmem>>, %arg2: memref<80x128xf32, #tpu.memory_space<vmem>>) attributes {dimension_semantics = [], scalar_prefetch = 0 : i64, scratch_operands = 0 : i64, tpu.core_type = #tpu.core_type<tc>} {
    %c0 = arith.constant 0 : index
    %c0_0 = arith.constant 0 : index
    %0 = vector.load %arg0[%c0, %c0_0] : memref<88x160xf32, #tpu.memory_space<vmem>>, vector<72x160xf32>
    %c72 = arith.constant 72 : index
    %c0_1 = arith.constant 0 : index
    %1 = vector.load %arg0[%c72, %c0_1] : memref<88x160xf32, #tpu.memory_space<vmem>>, vector<8x32xf32>
    %c80 = arith.constant 80 : index
    %c0_2 = arith.constant 0 : index
    %2 = vector.load %arg0[%c80, %c0_2] : memref<88x160xf32, #tpu.memory_space<vmem>>, vector<8x32xf32>
    %c0_3 = arith.constant 0 : index
    %c0_4 = arith.constant 0 : index
    %3 = vector.load %arg1[%c0_3, %c0_4] : memref<512x128xf32, #tpu.memory_space<vmem>>, vector<160x128xf32>
    %cst = arith.constant dense<0.000000e+00> : vector<72x128xf32>
    %4 = tpu.matmul %0, %3, %cst {dimension_numbers = #tpu.dot_dimension_numbers<[1], [0], [0], [1], [0, 0, 1, 1], [], []>} : vector<72x160xf32>, vector<160x128xf32>, vector<72x128xf32> -> vector<72x128xf32>
    %5 = vector.extract_strided_slice %4 {offsets = [0, 0], sizes = [72, 16], strides = [1, 1]} : vector<72x128xf32> to vector<72x16xf32>
    %c504 = arith.constant 504 : index
    %c0_5 = arith.constant 0 : index
    %6 = vector.load %arg1[%c504, %c0_5] : memref<512x128xf32, #tpu.memory_space<vmem>>, vector<1x16xf32>
    %7 = vector.broadcast %6 : vector<1x16xf32> to vector<72x16xf32>
    %8 = arith.addf %5, %7 : vector<72x16xf32>
    %c505 = arith.constant 505 : index
    %c0_6 = arith.constant 0 : index
    %9 = vector.load %arg1[%c505, %c0_6] : memref<512x128xf32, #tpu.memory_space<vmem>>, vector<1x16xf32>
    %c506 = arith.constant 506 : index
    %c0_7 = arith.constant 0 : index
    %10 = vector.load %arg1[%c506, %c0_7] : memref<512x128xf32, #tpu.memory_space<vmem>>, vector<1x16xf32>
    %cst_8 = arith.constant dense<0.000000e+00> : vector<72xf32>
    %11 = vector.multi_reduction <add>, %8, %cst_8 [1] : vector<72x16xf32> to vector<72xf32>
    %12 = vector.shape_cast %11 : vector<72xf32> to vector<72x1xf32>
    %cst_9 = arith.constant 1.600000e+01 : f32
    %13 = vector.broadcast %cst_9 : f32 to vector<72x1xf32>
    %14 = arith.divf %12, %13 : vector<72x1xf32>
    %15 = vector.broadcast %14 : vector<72x1xf32> to vector<72x16xf32>
    %16 = arith.subf %8, %15 : vector<72x16xf32>
    %17 = arith.mulf %16, %16 : vector<72x16xf32>
    %cst_10 = arith.constant dense<0.000000e+00> : vector<72xf32>
    %18 = vector.multi_reduction <add>, %17, %cst_10 [1] : vector<72x16xf32> to vector<72xf32>
    %19 = vector.shape_cast %18 : vector<72xf32> to vector<72x1xf32>
    %cst_11 = arith.constant 1.600000e+01 : f32
    %20 = vector.broadcast %cst_11 : f32 to vector<72x1xf32>
    %21 = arith.divf %19, %20 : vector<72x1xf32>
    %22 = vector.broadcast %14 : vector<72x1xf32> to vector<72x16xf32>
    %23 = arith.subf %8, %22 : vector<72x16xf32>
    %cst_12 = arith.constant 9.99999974E-6 : f32
    %24 = vector.broadcast %cst_12 : f32 to vector<72x1xf32>
    %25 = arith.addf %21, %24 : vector<72x1xf32>
    %26 = math.rsqrt %25 : vector<72x1xf32>
    %27 = vector.broadcast %26 : vector<72x1xf32> to vector<72x16xf32>
    %28 = arith.mulf %23, %27 : vector<72x16xf32>
    %29 = vector.broadcast %9 : vector<1x16xf32> to vector<72x16xf32>
    %30 = arith.mulf %28, %29 : vector<72x16xf32>
    %31 = vector.broadcast %10 : vector<1x16xf32> to vector<72x16xf32>
    %32 = arith.addf %30, %31 : vector<72x16xf32>
    %cst_13 = arith.constant 5.000000e-01 : f32
    %33 = vector.broadcast %cst_13 : f32 to vector<72x16xf32>
    %34 = arith.mulf %33, %32 : vector<72x16xf32>
    %cst_14 = arith.constant 0.707106769 : f32
    %35 = vector.broadcast %cst_14 : f32 to vector<72x16xf32>
    %36 = arith.mulf %32, %35 : vector<72x16xf32>
    %37 = math.erf %36 : vector<72x16xf32>
    %cst_15 = arith.constant 1.000000e+00 : f32
    %38 = vector.broadcast %cst_15 : f32 to vector<72x16xf32>
    %39 = arith.addf %38, %37 : vector<72x16xf32>
    %40 = arith.mulf %34, %39 : vector<72x16xf32>
    %c160 = arith.constant 160 : index
    %c0_16 = arith.constant 0 : index
    %41 = vector.load %arg1[%c160, %c0_16] : memref<512x128xf32, #tpu.memory_space<vmem>>, vector<16x128xf32>
    %cst_17 = arith.constant dense<0.000000e+00> : vector<72x128xf32>
    %42 = tpu.matmul %40, %41, %cst_17 {dimension_numbers = #tpu.dot_dimension_numbers<[1], [0], [0], [1], [0, 0, 1, 1], [], []>} : vector<72x16xf32>, vector<16x128xf32>, vector<72x128xf32> -> vector<72x128xf32>
    %c496 = arith.constant 496 : index
    %c0_18 = arith.constant 0 : index
    %43 = vector.load %arg1[%c496, %c0_18] : memref<512x128xf32, #tpu.memory_space<vmem>>, vector<1x128xf32>
    %44 = vector.broadcast %43 : vector<1x128xf32> to vector<72x128xf32>
    %45 = arith.addf %42, %44 : vector<72x128xf32>
    %c497 = arith.constant 497 : index
    %c0_19 = arith.constant 0 : index
    %46 = vector.load %arg1[%c497, %c0_19] : memref<512x128xf32, #tpu.memory_space<vmem>>, vector<1x128xf32>
    %c498 = arith.constant 498 : index
    %c0_20 = arith.constant 0 : index
    %47 = vector.load %arg1[%c498, %c0_20] : memref<512x128xf32, #tpu.memory_space<vmem>>, vector<1x128xf32>
    %cst_21 = arith.constant dense<0.000000e+00> : vector<72xf32>
    %48 = vector.multi_reduction <add>, %45, %cst_21 [1] : vector<72x128xf32> to vector<72xf32>
    %49 = vector.shape_cast %48 : vector<72xf32> to vector<72x1xf32>
    %cst_22 = arith.constant 1.280000e+02 : f32
    %50 = vector.broadcast %cst_22 : f32 to vector<72x1xf32>
    %51 = arith.divf %49, %50 : vector<72x1xf32>
    %52 = vector.broadcast %51 : vector<72x1xf32> to vector<72x128xf32>
    %53 = arith.subf %45, %52 : vector<72x128xf32>
    %54 = arith.mulf %53, %53 : vector<72x128xf32>
    %cst_23 = arith.constant dense<0.000000e+00> : vector<72xf32>
    %55 = vector.multi_reduction <add>, %54, %cst_23 [1] : vector<72x128xf32> to vector<72xf32>
    %56 = vector.shape_cast %55 : vector<72xf32> to vector<72x1xf32>
    %cst_24 = arith.constant 1.280000e+02 : f32
    %57 = vector.broadcast %cst_24 : f32 to vector<72x1xf32>
    %58 = arith.divf %56, %57 : vector<72x1xf32>
    %59 = vector.broadcast %51 : vector<72x1xf32> to vector<72x128xf32>
    %60 = arith.subf %45, %59 : vector<72x128xf32>
    %cst_25 = arith.constant 9.99999974E-6 : f32
    %61 = vector.broadcast %cst_25 : f32 to vector<72x1xf32>
    %62 = arith.addf %58, %61 : vector<72x1xf32>
    %63 = math.rsqrt %62 : vector<72x1xf32>
    %64 = vector.broadcast %63 : vector<72x1xf32> to vector<72x128xf32>
    %65 = arith.mulf %60, %64 : vector<72x128xf32>
    %66 = vector.broadcast %46 : vector<1x128xf32> to vector<72x128xf32>
    %67 = arith.mulf %65, %66 : vector<72x128xf32>
    %68 = vector.broadcast %47 : vector<1x128xf32> to vector<72x128xf32>
    %69 = arith.addf %67, %68 : vector<72x128xf32>
    %cst_26 = arith.constant 5.000000e-01 : f32
    %70 = vector.broadcast %cst_26 : f32 to vector<72x128xf32>
    %71 = arith.mulf %70, %69 : vector<72x128xf32>
    %cst_27 = arith.constant 0.707106769 : f32
    %72 = vector.broadcast %cst_27 : f32 to vector<72x128xf32>
    %73 = arith.mulf %69, %72 : vector<72x128xf32>
    %74 = math.erf %73 : vector<72x128xf32>
    %cst_28 = arith.constant 1.000000e+00 : f32
    %75 = vector.broadcast %cst_28 : f32 to vector<72x128xf32>
    %76 = arith.addf %75, %74 : vector<72x128xf32>
    %77 = arith.mulf %71, %76 : vector<72x128xf32>
    %c176 = arith.constant 176 : index
    %c0_29 = arith.constant 0 : index
    %78 = vector.load %arg1[%c176, %c0_29] : memref<512x128xf32, #tpu.memory_space<vmem>>, vector<128x128xf32>
    %cst_30 = arith.constant dense<0.000000e+00> : vector<72x128xf32>
    %79 = tpu.matmul %77, %78, %cst_30 {dimension_numbers = #tpu.dot_dimension_numbers<[1], [0], [0], [1], [0, 0, 1, 1], [], []>} : vector<72x128xf32>, vector<128x128xf32>, vector<72x128xf32> -> vector<72x128xf32>
    %c499 = arith.constant 499 : index
    %c0_31 = arith.constant 0 : index
    %80 = vector.load %arg1[%c499, %c0_31] : memref<512x128xf32, #tpu.memory_space<vmem>>, vector<1x128xf32>
    %81 = vector.broadcast %80 : vector<1x128xf32> to vector<72x128xf32>
    %82 = arith.addf %79, %81 : vector<72x128xf32>
    %c500 = arith.constant 500 : index
    %c0_32 = arith.constant 0 : index
    %83 = vector.load %arg1[%c500, %c0_32] : memref<512x128xf32, #tpu.memory_space<vmem>>, vector<1x128xf32>
    %c501 = arith.constant 501 : index
    %c0_33 = arith.constant 0 : index
    %84 = vector.load %arg1[%c501, %c0_33] : memref<512x128xf32, #tpu.memory_space<vmem>>, vector<1x128xf32>
    %cst_34 = arith.constant dense<0.000000e+00> : vector<72xf32>
    %85 = vector.multi_reduction <add>, %82, %cst_34 [1] : vector<72x128xf32> to vector<72xf32>
    %86 = vector.shape_cast %85 : vector<72xf32> to vector<72x1xf32>
    %cst_35 = arith.constant 1.280000e+02 : f32
    %87 = vector.broadcast %cst_35 : f32 to vector<72x1xf32>
    %88 = arith.divf %86, %87 : vector<72x1xf32>
    %89 = vector.broadcast %88 : vector<72x1xf32> to vector<72x128xf32>
    %90 = arith.subf %82, %89 : vector<72x128xf32>
    %91 = arith.mulf %90, %90 : vector<72x128xf32>
    %cst_36 = arith.constant dense<0.000000e+00> : vector<72xf32>
    %92 = vector.multi_reduction <add>, %91, %cst_36 [1] : vector<72x128xf32> to vector<72xf32>
    %93 = vector.shape_cast %92 : vector<72xf32> to vector<72x1xf32>
    %cst_37 = arith.constant 1.280000e+02 : f32
    %94 = vector.broadcast %cst_37 : f32 to vector<72x1xf32>
    %95 = arith.divf %93, %94 : vector<72x1xf32>
    %96 = vector.broadcast %88 : vector<72x1xf32> to vector<72x128xf32>
    %97 = arith.subf %82, %96 : vector<72x128xf32>
    %cst_38 = arith.constant 9.99999974E-6 : f32
    %98 = vector.broadcast %cst_38 : f32 to vector<72x1xf32>
    %99 = arith.addf %95, %98 : vector<72x1xf32>
    %100 = math.rsqrt %99 : vector<72x1xf32>
    %101 = vector.broadcast %100 : vector<72x1xf32> to vector<72x128xf32>
    %102 = arith.mulf %97, %101 : vector<72x128xf32>
    %103 = vector.broadcast %83 : vector<1x128xf32> to vector<72x128xf32>
    %104 = arith.mulf %102, %103 : vector<72x128xf32>
    %105 = vector.broadcast %84 : vector<1x128xf32> to vector<72x128xf32>
    %106 = arith.addf %104, %105 : vector<72x128xf32>
    %cst_39 = arith.constant 5.000000e-01 : f32
    %107 = vector.broadcast %cst_39 : f32 to vector<72x128xf32>
    %108 = arith.mulf %107, %106 : vector<72x128xf32>
    %cst_40 = arith.constant 0.707106769 : f32
    %109 = vector.broadcast %cst_40 : f32 to vector<72x128xf32>
    %110 = arith.mulf %106, %109 : vector<72x128xf32>
    %111 = math.erf %110 : vector<72x128xf32>
    %cst_41 = arith.constant 1.000000e+00 : f32
    %112 = vector.broadcast %cst_41 : f32 to vector<72x128xf32>
    %113 = arith.addf %112, %111 : vector<72x128xf32>
    %114 = arith.mulf %108, %113 : vector<72x128xf32>
    %c304 = arith.constant 304 : index
    %c0_42 = arith.constant 0 : index
    %115 = vector.load %arg1[%c304, %c0_42] : memref<512x128xf32, #tpu.memory_space<vmem>>, vector<128x128xf32>
    %cst_43 = arith.constant dense<0.000000e+00> : vector<72x128xf32>
    %116 = tpu.matmul %114, %115, %cst_43 {dimension_numbers = #tpu.dot_dimension_numbers<[1], [0], [0], [1], [0, 0, 1, 1], [], []>} : vector<72x128xf32>, vector<128x128xf32>, vector<72x128xf32> -> vector<72x128xf32>
    %c502 = arith.constant 502 : index
    %c0_44 = arith.constant 0 : index
    %117 = vector.load %arg1[%c502, %c0_44] : memref<512x128xf32, #tpu.memory_space<vmem>>, vector<1x128xf32>
    %118 = vector.broadcast %117 : vector<1x128xf32> to vector<72x128xf32>
    %119 = arith.addf %116, %118 : vector<72x128xf32>
    %c432 = arith.constant 432 : index
    %c0_45 = arith.constant 0 : index
    %120 = vector.load %arg1[%c432, %c0_45] : memref<512x128xf32, #tpu.memory_space<vmem>>, vector<32x128xf32>
    %c464 = arith.constant 464 : index
    %c0_46 = arith.constant 0 : index
    %121 = vector.load %arg1[%c464, %c0_46] : memref<512x128xf32, #tpu.memory_space<vmem>>, vector<32x128xf32>
    %c503 = arith.constant 503 : index
    %c0_47 = arith.constant 0 : index
    %122 = vector.load %arg1[%c503, %c0_47] : memref<512x128xf32, #tpu.memory_space<vmem>>, vector<1x128xf32>
    %c507 = arith.constant 507 : index
    %c0_48 = arith.constant 0 : index
    %123 = vector.load %arg1[%c507, %c0_48] : memref<512x128xf32, #tpu.memory_space<vmem>>, vector<1x32xf32>
    %c508 = arith.constant 508 : index
    %c0_49 = arith.constant 0 : index
    %124 = vector.load %arg1[%c508, %c0_49] : memref<512x128xf32, #tpu.memory_space<vmem>>, vector<1x32xf32>
    %125 = vector.extract_strided_slice %119 {offsets = [0, 0], sizes = [8, 128], strides = [1, 1]} : vector<72x128xf32> to vector<8x128xf32>
    %cst_50 = arith.constant dense<0.000000e+00> : vector<8x128xf32>
    %126 = tpu.matmul %1, %120, %cst_50 {dimension_numbers = #tpu.dot_dimension_numbers<[1], [0], [0], [1], [0, 0, 1, 1], [], []>} : vector<8x32xf32>, vector<32x128xf32>, vector<8x128xf32> -> vector<8x128xf32>
    %127 = arith.addf %125, %126 : vector<8x128xf32>
    %128 = arith.negf %127 : vector<8x128xf32>
    %129 = math.exp %128 : vector<8x128xf32>
    %cst_51 = arith.constant 1.000000e+00 : f32
    %130 = vector.broadcast %cst_51 : f32 to vector<8x128xf32>
    %131 = arith.addf %130, %129 : vector<8x128xf32>
    %132 = arith.divf %130, %131 : vector<8x128xf32>
    %133 = vector.extract_strided_slice %132 {offsets = [0, 0], sizes = [8, 32], strides = [1, 1]} : vector<8x128xf32> to vector<8x32xf32>
    %134 = vector.extract_strided_slice %132 {offsets = [0, 32], sizes = [8, 32], strides = [1, 1]} : vector<8x128xf32> to vector<8x32xf32>
    %135 = vector.extract_strided_slice %132 {offsets = [0, 64], sizes = [8, 32], strides = [1, 1]} : vector<8x128xf32> to vector<8x32xf32>
    %cst_52 = arith.constant 2.000000e+00 : f32
    %136 = vector.broadcast %cst_52 : f32 to vector<8x32xf32>
    %137 = arith.mulf %136, %135 : vector<8x32xf32>
    %cst_53 = arith.constant 1.000000e+00 : f32
    %138 = vector.broadcast %cst_53 : f32 to vector<8x32xf32>
    %139 = arith.subf %137, %138 : vector<8x32xf32>
    %140 = vector.extract_strided_slice %132 {offsets = [0, 96], sizes = [8, 32], strides = [1, 1]} : vector<8x128xf32> to vector<8x32xf32>
    %141 = arith.mulf %134, %2 : vector<8x32xf32>
    %142 = arith.mulf %133, %139 : vector<8x32xf32>
    %143 = arith.addf %141, %142 : vector<8x32xf32>
    %144 = math.tanh %143 : vector<8x32xf32>
    %145 = arith.mulf %140, %144 : vector<8x32xf32>
    %cst_54 = arith.constant dense<0.000000e+00> : vector<8xf32>
    %146 = vector.multi_reduction <add>, %145, %cst_54 [1] : vector<8x32xf32> to vector<8xf32>
    %147 = vector.shape_cast %146 : vector<8xf32> to vector<8x1xf32>
    %cst_55 = arith.constant 3.200000e+01 : f32
    %148 = vector.broadcast %cst_55 : f32 to vector<8x1xf32>
    %149 = arith.divf %147, %148 : vector<8x1xf32>
    %150 = vector.broadcast %149 : vector<8x1xf32> to vector<8x32xf32>
    %151 = arith.subf %145, %150 : vector<8x32xf32>
    %152 = arith.mulf %151, %151 : vector<8x32xf32>
    %cst_56 = arith.constant dense<0.000000e+00> : vector<8xf32>
    %153 = vector.multi_reduction <add>, %152, %cst_56 [1] : vector<8x32xf32> to vector<8xf32>
    %154 = vector.shape_cast %153 : vector<8xf32> to vector<8x1xf32>
    %cst_57 = arith.constant 3.200000e+01 : f32
    %155 = vector.broadcast %cst_57 : f32 to vector<8x1xf32>
    %156 = arith.divf %154, %155 : vector<8x1xf32>
    %157 = vector.broadcast %149 : vector<8x1xf32> to vector<8x32xf32>
    %158 = arith.subf %145, %157 : vector<8x32xf32>
    %cst_58 = arith.constant 9.99999974E-6 : f32
    %159 = vector.broadcast %cst_58 : f32 to vector<8x1xf32>
    %160 = arith.addf %156, %159 : vector<8x1xf32>
    %161 = math.rsqrt %160 : vector<8x1xf32>
    %162 = vector.broadcast %161 : vector<8x1xf32> to vector<8x32xf32>
    %163 = arith.mulf %158, %162 : vector<8x32xf32>
    %164 = vector.broadcast %123 : vector<1x32xf32> to vector<8x32xf32>
    %165 = arith.mulf %163, %164 : vector<8x32xf32>
    %166 = vector.broadcast %124 : vector<1x32xf32> to vector<8x32xf32>
    %167 = arith.addf %165, %166 : vector<8x32xf32>
    %cst_59 = arith.constant 5.000000e-01 : f32
    %168 = vector.broadcast %cst_59 : f32 to vector<8x32xf32>
    %169 = arith.mulf %168, %167 : vector<8x32xf32>
    %cst_60 = arith.constant 0.707106769 : f32
    %170 = vector.broadcast %cst_60 : f32 to vector<8x32xf32>
    %171 = arith.mulf %167, %170 : vector<8x32xf32>
    %172 = math.erf %171 : vector<8x32xf32>
    %cst_61 = arith.constant 1.000000e+00 : f32
    %173 = vector.broadcast %cst_61 : f32 to vector<8x32xf32>
    %174 = arith.addf %173, %172 : vector<8x32xf32>
    %175 = arith.mulf %169, %174 : vector<8x32xf32>
    %cst_62 = arith.constant dense<0.000000e+00> : vector<8x128xf32>
    %176 = tpu.matmul %175, %121, %cst_62 {dimension_numbers = #tpu.dot_dimension_numbers<[1], [0], [0], [1], [0, 0, 1, 1], [], []>} : vector<8x32xf32>, vector<32x128xf32>, vector<8x128xf32> -> vector<8x128xf32>
    %177 = vector.broadcast %122 : vector<1x128xf32> to vector<8x128xf32>
    %178 = arith.addf %176, %177 : vector<8x128xf32>
    %c0_63 = arith.constant 0 : index
    %c0_64 = arith.constant 0 : index
    %179 = vector.load %arg2[%c0_63, %c0_64] : memref<80x128xf32, #tpu.memory_space<vmem>>, vector<8x128xf32>
    tpu.vector_store %arg2[%c0_63, %c0_64], %178 {strides = array<i32>} : memref<80x128xf32, #tpu.memory_space<vmem>>, vector<8x128xf32>,
    %180 = vector.extract_strided_slice %119 {offsets = [8, 0], sizes = [8, 128], strides = [1, 1]} : vector<72x128xf32> to vector<8x128xf32>
    %cst_65 = arith.constant dense<0.000000e+00> : vector<8x128xf32>
    %181 = tpu.matmul %145, %120, %cst_65 {dimension_numbers = #tpu.dot_dimension_numbers<[1], [0], [0], [1], [0, 0, 1, 1], [], []>} : vector<8x32xf32>, vector<32x128xf32>, vector<8x128xf32> -> vector<8x128xf32>
    %182 = arith.addf %180, %181 : vector<8x128xf32>
    %183 = arith.negf %182 : vector<8x128xf32>
    %184 = math.exp %183 : vector<8x128xf32>
    %cst_66 = arith.constant 1.000000e+00 : f32
    %185 = vector.broadcast %cst_66 : f32 to vector<8x128xf32>
    %186 = arith.addf %185, %184 : vector<8x128xf32>
    %187 = arith.divf %185, %186 : vector<8x128xf32>
    %188 = vector.extract_strided_slice %187 {offsets = [0, 0], sizes = [8, 32], strides = [1, 1]} : vector<8x128xf32> to vector<8x32xf32>
    %189 = vector.extract_strided_slice %187 {offsets = [0, 32], sizes = [8, 32], strides = [1, 1]} : vector<8x128xf32> to vector<8x32xf32>
    %190 = vector.extract_strided_slice %187 {offsets = [0, 64], sizes = [8, 32], strides = [1, 1]} : vector<8x128xf32> to vector<8x32xf32>
    %cst_67 = arith.constant 2.000000e+00 : f32
    %191 = vector.broadcast %cst_67 : f32 to vector<8x32xf32>
    %192 = arith.mulf %191, %190 : vector<8x32xf32>
    %cst_68 = arith.constant 1.000000e+00 : f32
    %193 = vector.broadcast %cst_68 : f32 to vector<8x32xf32>
    %194 = arith.subf %192, %193 : vector<8x32xf32>
    %195 = vector.extract_strided_slice %187 {offsets = [0, 96], sizes = [8, 32], strides = [1, 1]} : vector<8x128xf32> to vector<8x32xf32>
    %196 = arith.mulf %189, %143 : vector<8x32xf32>
    %197 = arith.mulf %188, %194 : vector<8x32xf32>
    %198 = arith.addf %196, %197 : vector<8x32xf32>
    %199 = math.tanh %198 : vector<8x32xf32>
    %200 = arith.mulf %195, %199 : vector<8x32xf32>
    %cst_69 = arith.constant dense<0.000000e+00> : vector<8xf32>
    %201 = vector.multi_reduction <add>, %200, %cst_69 [1] : vector<8x32xf32> to vector<8xf32>
    %202 = vector.shape_cast %201 : vector<8xf32> to vector<8x1xf32>
    %cst_70 = arith.constant 3.200000e+01 : f32
    %203 = vector.broadcast %cst_70 : f32 to vector<8x1xf32>
    %204 = arith.divf %202, %203 : vector<8x1xf32>
    %205 = vector.broadcast %204 : vector<8x1xf32> to vector<8x32xf32>
    %206 = arith.subf %200, %205 : vector<8x32xf32>
    %207 = arith.mulf %206, %206 : vector<8x32xf32>
    %cst_71 = arith.constant dense<0.000000e+00> : vector<8xf32>
    %208 = vector.multi_reduction <add>, %207, %cst_71 [1] : vector<8x32xf32> to vector<8xf32>
    %209 = vector.shape_cast %208 : vector<8xf32> to vector<8x1xf32>
    %cst_72 = arith.constant 3.200000e+01 : f32
    %210 = vector.broadcast %cst_72 : f32 to vector<8x1xf32>
    %211 = arith.divf %209, %210 : vector<8x1xf32>
    %212 = vector.broadcast %204 : vector<8x1xf32> to vector<8x32xf32>
    %213 = arith.subf %200, %212 : vector<8x32xf32>
    %cst_73 = arith.constant 9.99999974E-6 : f32
    %214 = vector.broadcast %cst_73 : f32 to vector<8x1xf32>
    %215 = arith.addf %211, %214 : vector<8x1xf32>
    %216 = math.rsqrt %215 : vector<8x1xf32>
    %217 = vector.broadcast %216 : vector<8x1xf32> to vector<8x32xf32>
    %218 = arith.mulf %213, %217 : vector<8x32xf32>
    %219 = vector.broadcast %123 : vector<1x32xf32> to vector<8x32xf32>
    %220 = arith.mulf %218, %219 : vector<8x32xf32>
    %221 = vector.broadcast %124 : vector<1x32xf32> to vector<8x32xf32>
    %222 = arith.addf %220, %221 : vector<8x32xf32>
    %cst_74 = arith.constant 5.000000e-01 : f32
    %223 = vector.broadcast %cst_74 : f32 to vector<8x32xf32>
    %224 = arith.mulf %223, %222 : vector<8x32xf32>
    %cst_75 = arith.constant 0.707106769 : f32
    %225 = vector.broadcast %cst_75 : f32 to vector<8x32xf32>
    %226 = arith.mulf %222, %225 : vector<8x32xf32>
    %227 = math.erf %226 : vector<8x32xf32>
    %cst_76 = arith.constant 1.000000e+00 : f32
    %228 = vector.broadcast %cst_76 : f32 to vector<8x32xf32>
    %229 = arith.addf %228, %227 : vector<8x32xf32>
    %230 = arith.mulf %224, %229 : vector<8x32xf32>
    %cst_77 = arith.constant dense<0.000000e+00> : vector<8x128xf32>
    %231 = tpu.matmul %230, %121, %cst_77 {dimension_numbers = #tpu.dot_dimension_numbers<[1], [0], [0], [1], [0, 0, 1, 1], [], []>} : vector<8x32xf32>, vector<32x128xf32>, vector<8x128xf32> -> vector<8x128xf32>
    %232 = vector.broadcast %122 : vector<1x128xf32> to vector<8x128xf32>
    %233 = arith.addf %231, %232 : vector<8x128xf32>
    %c8 = arith.constant 8 : index
    %c0_78 = arith.constant 0 : index
    %234 = vector.load %arg2[%c8, %c0_78] : memref<80x128xf32, #tpu.memory_space<vmem>>, vector<8x128xf32>
    tpu.vector_store %arg2[%c8, %c0_78], %233 {strides = array<i32>} : memref<80x128xf32, #tpu.memory_space<vmem>>, vector<8x128xf32>,
    %235 = vector.extract_strided_slice %119 {offsets = [16, 0], sizes = [8, 128], strides = [1, 1]} : vector<72x128xf32> to vector<8x128xf32>
    %cst_79 = arith.constant dense<0.000000e+00> : vector<8x128xf32>
    %236 = tpu.matmul %200, %120, %cst_79 {dimension_numbers = #tpu.dot_dimension_numbers<[1], [0], [0], [1], [0, 0, 1, 1], [], []>} : vector<8x32xf32>, vector<32x128xf32>, vector<8x128xf32> -> vector<8x128xf32>
    %237 = arith.addf %235, %236 : vector<8x128xf32>
    %238 = arith.negf %237 : vector<8x128xf32>
    %239 = math.exp %238 : vector<8x128xf32>
    %cst_80 = arith.constant 1.000000e+00 : f32
    %240 = vector.broadcast %cst_80 : f32 to vector<8x128xf32>
    %241 = arith.addf %240, %239 : vector<8x128xf32>
    %242 = arith.divf %240, %241 : vector<8x128xf32>
    %243 = vector.extract_strided_slice %242 {offsets = [0, 0], sizes = [8, 32], strides = [1, 1]} : vector<8x128xf32> to vector<8x32xf32>
    %244 = vector.extract_strided_slice %242 {offsets = [0, 32], sizes = [8, 32], strides = [1, 1]} : vector<8x128xf32> to vector<8x32xf32>
    %245 = vector.extract_strided_slice %242 {offsets = [0, 64], sizes = [8, 32], strides = [1, 1]} : vector<8x128xf32> to vector<8x32xf32>
    %cst_81 = arith.constant 2.000000e+00 : f32
    %246 = vector.broadcast %cst_81 : f32 to vector<8x32xf32>
    %247 = arith.mulf %246, %245 : vector<8x32xf32>
    %cst_82 = arith.constant 1.000000e+00 : f32
    %248 = vector.broadcast %cst_82 : f32 to vector<8x32xf32>
    %249 = arith.subf %247, %248 : vector<8x32xf32>
    %250 = vector.extract_strided_slice %242 {offsets = [0, 96], sizes = [8, 32], strides = [1, 1]} : vector<8x128xf32> to vector<8x32xf32>
    %251 = arith.mulf %244, %198 : vector<8x32xf32>
    %252 = arith.mulf %243, %249 : vector<8x32xf32>
    %253 = arith.addf %251, %252 : vector<8x32xf32>
    %254 = math.tanh %253 : vector<8x32xf32>
    %255 = arith.mulf %250, %254 : vector<8x32xf32>
    %cst_83 = arith.constant dense<0.000000e+00> : vector<8xf32>
    %256 = vector.multi_reduction <add>, %255, %cst_83 [1] : vector<8x32xf32> to vector<8xf32>
    %257 = vector.shape_cast %256 : vector<8xf32> to vector<8x1xf32>
    %cst_84 = arith.constant 3.200000e+01 : f32
    %258 = vector.broadcast %cst_84 : f32 to vector<8x1xf32>
    %259 = arith.divf %257, %258 : vector<8x1xf32>
    %260 = vector.broadcast %259 : vector<8x1xf32> to vector<8x32xf32>
    %261 = arith.subf %255, %260 : vector<8x32xf32>
    %262 = arith.mulf %261, %261 : vector<8x32xf32>
    %cst_85 = arith.constant dense<0.000000e+00> : vector<8xf32>
    %263 = vector.multi_reduction <add>, %262, %cst_85 [1] : vector<8x32xf32> to vector<8xf32>
    %264 = vector.shape_cast %263 : vector<8xf32> to vector<8x1xf32>
    %cst_86 = arith.constant 3.200000e+01 : f32
    %265 = vector.broadcast %cst_86 : f32 to vector<8x1xf32>
    %266 = arith.divf %264, %265 : vector<8x1xf32>
    %267 = vector.broadcast %259 : vector<8x1xf32> to vector<8x32xf32>
    %268 = arith.subf %255, %267 : vector<8x32xf32>
    %cst_87 = arith.constant 9.99999974E-6 : f32
    %269 = vector.broadcast %cst_87 : f32 to vector<8x1xf32>
    %270 = arith.addf %266, %269 : vector<8x1xf32>
    %271 = math.rsqrt %270 : vector<8x1xf32>
    %272 = vector.broadcast %271 : vector<8x1xf32> to vector<8x32xf32>
    %273 = arith.mulf %268, %272 : vector<8x32xf32>
    %274 = vector.broadcast %123 : vector<1x32xf32> to vector<8x32xf32>
    %275 = arith.mulf %273, %274 : vector<8x32xf32>
    %276 = vector.broadcast %124 : vector<1x32xf32> to vector<8x32xf32>
    %277 = arith.addf %275, %276 : vector<8x32xf32>
    %cst_88 = arith.constant 5.000000e-01 : f32
    %278 = vector.broadcast %cst_88 : f32 to vector<8x32xf32>
    %279 = arith.mulf %278, %277 : vector<8x32xf32>
    %cst_89 = arith.constant 0.707106769 : f32
    %280 = vector.broadcast %cst_89 : f32 to vector<8x32xf32>
    %281 = arith.mulf %277, %280 : vector<8x32xf32>
    %282 = math.erf %281 : vector<8x32xf32>
    %cst_90 = arith.constant 1.000000e+00 : f32
    %283 = vector.broadcast %cst_90 : f32 to vector<8x32xf32>
    %284 = arith.addf %283, %282 : vector<8x32xf32>
    %285 = arith.mulf %279, %284 : vector<8x32xf32>
    %cst_91 = arith.constant dense<0.000000e+00> : vector<8x128xf32>
    %286 = tpu.matmul %285, %121, %cst_91 {dimension_numbers = #tpu.dot_dimension_numbers<[1], [0], [0], [1], [0, 0, 1, 1], [], []>} : vector<8x32xf32>, vector<32x128xf32>, vector<8x128xf32> -> vector<8x128xf32>
    %287 = vector.broadcast %122 : vector<1x128xf32> to vector<8x128xf32>
    %288 = arith.addf %286, %287 : vector<8x128xf32>
    %c16 = arith.constant 16 : index
    %c0_92 = arith.constant 0 : index
    %289 = vector.load %arg2[%c16, %c0_92] : memref<80x128xf32, #tpu.memory_space<vmem>>, vector<8x128xf32>
    tpu.vector_store %arg2[%c16, %c0_92], %288 {strides = array<i32>} : memref<80x128xf32, #tpu.memory_space<vmem>>, vector<8x128xf32>,
    %290 = vector.extract_strided_slice %119 {offsets = [24, 0], sizes = [8, 128], strides = [1, 1]} : vector<72x128xf32> to vector<8x128xf32>
    %cst_93 = arith.constant dense<0.000000e+00> : vector<8x128xf32>
    %291 = tpu.matmul %255, %120, %cst_93 {dimension_numbers = #tpu.dot_dimension_numbers<[1], [0], [0], [1], [0, 0, 1, 1], [], []>} : vector<8x32xf32>, vector<32x128xf32>, vector<8x128xf32> -> vector<8x128xf32>
    %292 = arith.addf %290, %291 : vector<8x128xf32>
    %293 = arith.negf %292 : vector<8x128xf32>
    %294 = math.exp %293 : vector<8x128xf32>
    %cst_94 = arith.constant 1.000000e+00 : f32
    %295 = vector.broadcast %cst_94 : f32 to vector<8x128xf32>
    %296 = arith.addf %295, %294 : vector<8x128xf32>
    %297 = arith.divf %295, %296 : vector<8x128xf32>
    %298 = vector.extract_strided_slice %297 {offsets = [0, 0], sizes = [8, 32], strides = [1, 1]} : vector<8x128xf32> to vector<8x32xf32>
    %299 = vector.extract_strided_slice %297 {offsets = [0, 32], sizes = [8, 32], strides = [1, 1]} : vector<8x128xf32> to vector<8x32xf32>
    %300 = vector.extract_strided_slice %297 {offsets = [0, 64], sizes = [8, 32], strides = [1, 1]} : vector<8x128xf32> to vector<8x32xf32>
    %cst_95 = arith.constant 2.000000e+00 : f32
    %301 = vector.broadcast %cst_95 : f32 to vector<8x32xf32>
    %302 = arith.mulf %301, %300 : vector<8x32xf32>
    %cst_96 = arith.constant 1.000000e+00 : f32
    %303 = vector.broadcast %cst_96 : f32 to vector<8x32xf32>
    %304 = arith.subf %302, %303 : vector<8x32xf32>
    %305 = vector.extract_strided_slice %297 {offsets = [0, 96], sizes = [8, 32], strides = [1, 1]} : vector<8x128xf32> to vector<8x32xf32>
    %306 = arith.mulf %299, %253 : vector<8x32xf32>
    %307 = arith.mulf %298, %304 : vector<8x32xf32>
    %308 = arith.addf %306, %307 : vector<8x32xf32>
    %309 = math.tanh %308 : vector<8x32xf32>
    %310 = arith.mulf %305, %309 : vector<8x32xf32>
    %cst_97 = arith.constant dense<0.000000e+00> : vector<8xf32>
    %311 = vector.multi_reduction <add>, %310, %cst_97 [1] : vector<8x32xf32> to vector<8xf32>
    %312 = vector.shape_cast %311 : vector<8xf32> to vector<8x1xf32>
    %cst_98 = arith.constant 3.200000e+01 : f32
    %313 = vector.broadcast %cst_98 : f32 to vector<8x1xf32>
    %314 = arith.divf %312, %313 : vector<8x1xf32>
    %315 = vector.broadcast %314 : vector<8x1xf32> to vector<8x32xf32>
    %316 = arith.subf %310, %315 : vector<8x32xf32>
    %317 = arith.mulf %316, %316 : vector<8x32xf32>
    %cst_99 = arith.constant dense<0.000000e+00> : vector<8xf32>
    %318 = vector.multi_reduction <add>, %317, %cst_99 [1] : vector<8x32xf32> to vector<8xf32>
    %319 = vector.shape_cast %318 : vector<8xf32> to vector<8x1xf32>
    %cst_100 = arith.constant 3.200000e+01 : f32
    %320 = vector.broadcast %cst_100 : f32 to vector<8x1xf32>
    %321 = arith.divf %319, %320 : vector<8x1xf32>
    %322 = vector.broadcast %314 : vector<8x1xf32> to vector<8x32xf32>
    %323 = arith.subf %310, %322 : vector<8x32xf32>
    %cst_101 = arith.constant 9.99999974E-6 : f32
    %324 = vector.broadcast %cst_101 : f32 to vector<8x1xf32>
    %325 = arith.addf %321, %324 : vector<8x1xf32>
    %326 = math.rsqrt %325 : vector<8x1xf32>
    %327 = vector.broadcast %326 : vector<8x1xf32> to vector<8x32xf32>
    %328 = arith.mulf %323, %327 : vector<8x32xf32>
    %329 = vector.broadcast %123 : vector<1x32xf32> to vector<8x32xf32>
    %330 = arith.mulf %328, %329 : vector<8x32xf32>
    %331 = vector.broadcast %124 : vector<1x32xf32> to vector<8x32xf32>
    %332 = arith.addf %330, %331 : vector<8x32xf32>
    %cst_102 = arith.constant 5.000000e-01 : f32
    %333 = vector.broadcast %cst_102 : f32 to vector<8x32xf32>
    %334 = arith.mulf %333, %332 : vector<8x32xf32>
    %cst_103 = arith.constant 0.707106769 : f32
    %335 = vector.broadcast %cst_103 : f32 to vector<8x32xf32>
    %336 = arith.mulf %332, %335 : vector<8x32xf32>
    %337 = math.erf %336 : vector<8x32xf32>
    %cst_104 = arith.constant 1.000000e+00 : f32
    %338 = vector.broadcast %cst_104 : f32 to vector<8x32xf32>
    %339 = arith.addf %338, %337 : vector<8x32xf32>
    %340 = arith.mulf %334, %339 : vector<8x32xf32>
    %cst_105 = arith.constant dense<0.000000e+00> : vector<8x128xf32>
    %341 = tpu.matmul %340, %121, %cst_105 {dimension_numbers = #tpu.dot_dimension_numbers<[1], [0], [0], [1], [0, 0, 1, 1], [], []>} : vector<8x32xf32>, vector<32x128xf32>, vector<8x128xf32> -> vector<8x128xf32>
    %342 = vector.broadcast %122 : vector<1x128xf32> to vector<8x128xf32>
    %343 = arith.addf %341, %342 : vector<8x128xf32>
    %c24 = arith.constant 24 : index
    %c0_106 = arith.constant 0 : index
    %344 = vector.load %arg2[%c24, %c0_106] : memref<80x128xf32, #tpu.memory_space<vmem>>, vector<8x128xf32>
    tpu.vector_store %arg2[%c24, %c0_106], %343 {strides = array<i32>} : memref<80x128xf32, #tpu.memory_space<vmem>>, vector<8x128xf32>,
    %345 = vector.extract_strided_slice %119 {offsets = [32, 0], sizes = [8, 128], strides = [1, 1]} : vector<72x128xf32> to vector<8x128xf32>
    %cst_107 = arith.constant dense<0.000000e+00> : vector<8x128xf32>
    %346 = tpu.matmul %310, %120, %cst_107 {dimension_numbers = #tpu.dot_dimension_numbers<[1], [0], [0], [1], [0, 0, 1, 1], [], []>} : vector<8x32xf32>, vector<32x128xf32>, vector<8x128xf32> -> vector<8x128xf32>
    %347 = arith.addf %345, %346 : vector<8x128xf32>
    %348 = arith.negf %347 : vector<8x128xf32>
    %349 = math.exp %348 : vector<8x128xf32>
    %cst_108 = arith.constant 1.000000e+00 : f32
    %350 = vector.broadcast %cst_108 : f32 to vector<8x128xf32>
    %351 = arith.addf %350, %349 : vector<8x128xf32>
    %352 = arith.divf %350, %351 : vector<8x128xf32>
    %353 = vector.extract_strided_slice %352 {offsets = [0, 0], sizes = [8, 32], strides = [1, 1]} : vector<8x128xf32> to vector<8x32xf32>
    %354 = vector.extract_strided_slice %352 {offsets = [0, 32], sizes = [8, 32], strides = [1, 1]} : vector<8x128xf32> to vector<8x32xf32>
    %355 = vector.extract_strided_slice %352 {offsets = [0, 64], sizes = [8, 32], strides = [1, 1]} : vector<8x128xf32> to vector<8x32xf32>
    %cst_109 = arith.constant 2.000000e+00 : f32
    %356 = vector.broadcast %cst_109 : f32 to vector<8x32xf32>
    %357 = arith.mulf %356, %355 : vector<8x32xf32>
    %cst_110 = arith.constant 1.000000e+00 : f32
    %358 = vector.broadcast %cst_110 : f32 to vector<8x32xf32>
    %359 = arith.subf %357, %358 : vector<8x32xf32>
    %360 = vector.extract_strided_slice %352 {offsets = [0, 96], sizes = [8, 32], strides = [1, 1]} : vector<8x128xf32> to vector<8x32xf32>
    %361 = arith.mulf %354, %308 : vector<8x32xf32>
    %362 = arith.mulf %353, %359 : vector<8x32xf32>
    %363 = arith.addf %361, %362 : vector<8x32xf32>
    %364 = math.tanh %363 : vector<8x32xf32>
    %365 = arith.mulf %360, %364 : vector<8x32xf32>
    %cst_111 = arith.constant dense<0.000000e+00> : vector<8xf32>
    %366 = vector.multi_reduction <add>, %365, %cst_111 [1] : vector<8x32xf32> to vector<8xf32>
    %367 = vector.shape_cast %366 : vector<8xf32> to vector<8x1xf32>
    %cst_112 = arith.constant 3.200000e+01 : f32
    %368 = vector.broadcast %cst_112 : f32 to vector<8x1xf32>
    %369 = arith.divf %367, %368 : vector<8x1xf32>
    %370 = vector.broadcast %369 : vector<8x1xf32> to vector<8x32xf32>
    %371 = arith.subf %365, %370 : vector<8x32xf32>
    %372 = arith.mulf %371, %371 : vector<8x32xf32>
    %cst_113 = arith.constant dense<0.000000e+00> : vector<8xf32>
    %373 = vector.multi_reduction <add>, %372, %cst_113 [1] : vector<8x32xf32> to vector<8xf32>
    %374 = vector.shape_cast %373 : vector<8xf32> to vector<8x1xf32>
    %cst_114 = arith.constant 3.200000e+01 : f32
    %375 = vector.broadcast %cst_114 : f32 to vector<8x1xf32>
    %376 = arith.divf %374, %375 : vector<8x1xf32>
    %377 = vector.broadcast %369 : vector<8x1xf32> to vector<8x32xf32>
    %378 = arith.subf %365, %377 : vector<8x32xf32>
    %cst_115 = arith.constant 9.99999974E-6 : f32
    %379 = vector.broadcast %cst_115 : f32 to vector<8x1xf32>
    %380 = arith.addf %376, %379 : vector<8x1xf32>
    %381 = math.rsqrt %380 : vector<8x1xf32>
    %382 = vector.broadcast %381 : vector<8x1xf32> to vector<8x32xf32>
    %383 = arith.mulf %378, %382 : vector<8x32xf32>
    %384 = vector.broadcast %123 : vector<1x32xf32> to vector<8x32xf32>
    %385 = arith.mulf %383, %384 : vector<8x32xf32>
    %386 = vector.broadcast %124 : vector<1x32xf32> to vector<8x32xf32>
    %387 = arith.addf %385, %386 : vector<8x32xf32>
    %cst_116 = arith.constant 5.000000e-01 : f32
    %388 = vector.broadcast %cst_116 : f32 to vector<8x32xf32>
    %389 = arith.mulf %388, %387 : vector<8x32xf32>
    %cst_117 = arith.constant 0.707106769 : f32
    %390 = vector.broadcast %cst_117 : f32 to vector<8x32xf32>
    %391 = arith.mulf %387, %390 : vector<8x32xf32>
    %392 = math.erf %391 : vector<8x32xf32>
    %cst_118 = arith.constant 1.000000e+00 : f32
    %393 = vector.broadcast %cst_118 : f32 to vector<8x32xf32>
    %394 = arith.addf %393, %392 : vector<8x32xf32>
    %395 = arith.mulf %389, %394 : vector<8x32xf32>
    %cst_119 = arith.constant dense<0.000000e+00> : vector<8x128xf32>
    %396 = tpu.matmul %395, %121, %cst_119 {dimension_numbers = #tpu.dot_dimension_numbers<[1], [0], [0], [1], [0, 0, 1, 1], [], []>} : vector<8x32xf32>, vector<32x128xf32>, vector<8x128xf32> -> vector<8x128xf32>
    %397 = vector.broadcast %122 : vector<1x128xf32> to vector<8x128xf32>
    %398 = arith.addf %396, %397 : vector<8x128xf32>
    %c32 = arith.constant 32 : index
    %c0_120 = arith.constant 0 : index
    %399 = vector.load %arg2[%c32, %c0_120] : memref<80x128xf32, #tpu.memory_space<vmem>>, vector<8x128xf32>
    tpu.vector_store %arg2[%c32, %c0_120], %398 {strides = array<i32>} : memref<80x128xf32, #tpu.memory_space<vmem>>, vector<8x128xf32>,
    %400 = vector.extract_strided_slice %119 {offsets = [40, 0], sizes = [8, 128], strides = [1, 1]} : vector<72x128xf32> to vector<8x128xf32>
    %cst_121 = arith.constant dense<0.000000e+00> : vector<8x128xf32>
    %401 = tpu.matmul %365, %120, %cst_121 {dimension_numbers = #tpu.dot_dimension_numbers<[1], [0], [0], [1], [0, 0, 1, 1], [], []>} : vector<8x32xf32>, vector<32x128xf32>, vector<8x128xf32> -> vector<8x128xf32>
    %402 = arith.addf %400, %401 : vector<8x128xf32>
    %403 = arith.negf %402 : vector<8x128xf32>
    %404 = math.exp %403 : vector<8x128xf32>
    %cst_122 = arith.constant 1.000000e+00 : f32
    %405 = vector.broadcast %cst_122 : f32 to vector<8x128xf32>
    %406 = arith.addf %405, %404 : vector<8x128xf32>
    %407 = arith.divf %405, %406 : vector<8x128xf32>
    %408 = vector.extract_strided_slice %407 {offsets = [0, 0], sizes = [8, 32], strides = [1, 1]} : vector<8x128xf32> to vector<8x32xf32>
    %409 = vector.extract_strided_slice %407 {offsets = [0, 32], sizes = [8, 32], strides = [1, 1]} : vector<8x128xf32> to vector<8x32xf32>
    %410 = vector.extract_strided_slice %407 {offsets = [0, 64], sizes = [8, 32], strides = [1, 1]} : vector<8x128xf32> to vector<8x32xf32>
    %cst_123 = arith.constant 2.000000e+00 : f32
    %411 = vector.broadcast %cst_123 : f32 to vector<8x32xf32>
    %412 = arith.mulf %411, %410 : vector<8x32xf32>
    %cst_124 = arith.constant 1.000000e+00 : f32
    %413 = vector.broadcast %cst_124 : f32 to vector<8x32xf32>
    %414 = arith.subf %412, %413 : vector<8x32xf32>
    %415 = vector.extract_strided_slice %407 {offsets = [0, 96], sizes = [8, 32], strides = [1, 1]} : vector<8x128xf32> to vector<8x32xf32>
    %416 = arith.mulf %409, %363 : vector<8x32xf32>
    %417 = arith.mulf %408, %414 : vector<8x32xf32>
    %418 = arith.addf %416, %417 : vector<8x32xf32>
    %419 = math.tanh %418 : vector<8x32xf32>
    %420 = arith.mulf %415, %419 : vector<8x32xf32>
    %cst_125 = arith.constant dense<0.000000e+00> : vector<8xf32>
    %421 = vector.multi_reduction <add>, %420, %cst_125 [1] : vector<8x32xf32> to vector<8xf32>
    %422 = vector.shape_cast %421 : vector<8xf32> to vector<8x1xf32>
    %cst_126 = arith.constant 3.200000e+01 : f32
    %423 = vector.broadcast %cst_126 : f32 to vector<8x1xf32>
    %424 = arith.divf %422, %423 : vector<8x1xf32>
    %425 = vector.broadcast %424 : vector<8x1xf32> to vector<8x32xf32>
    %426 = arith.subf %420, %425 : vector<8x32xf32>
    %427 = arith.mulf %426, %426 : vector<8x32xf32>
    %cst_127 = arith.constant dense<0.000000e+00> : vector<8xf32>
    %428 = vector.multi_reduction <add>, %427, %cst_127 [1] : vector<8x32xf32> to vector<8xf32>
    %429 = vector.shape_cast %428 : vector<8xf32> to vector<8x1xf32>
    %cst_128 = arith.constant 3.200000e+01 : f32
    %430 = vector.broadcast %cst_128 : f32 to vector<8x1xf32>
    %431 = arith.divf %429, %430 : vector<8x1xf32>
    %432 = vector.broadcast %424 : vector<8x1xf32> to vector<8x32xf32>
    %433 = arith.subf %420, %432 : vector<8x32xf32>
    %cst_129 = arith.constant 9.99999974E-6 : f32
    %434 = vector.broadcast %cst_129 : f32 to vector<8x1xf32>
    %435 = arith.addf %431, %434 : vector<8x1xf32>
    %436 = math.rsqrt %435 : vector<8x1xf32>
    %437 = vector.broadcast %436 : vector<8x1xf32> to vector<8x32xf32>
    %438 = arith.mulf %433, %437 : vector<8x32xf32>
    %439 = vector.broadcast %123 : vector<1x32xf32> to vector<8x32xf32>
    %440 = arith.mulf %438, %439 : vector<8x32xf32>
    %441 = vector.broadcast %124 : vector<1x32xf32> to vector<8x32xf32>
    %442 = arith.addf %440, %441 : vector<8x32xf32>
    %cst_130 = arith.constant 5.000000e-01 : f32
    %443 = vector.broadcast %cst_130 : f32 to vector<8x32xf32>
    %444 = arith.mulf %443, %442 : vector<8x32xf32>
    %cst_131 = arith.constant 0.707106769 : f32
    %445 = vector.broadcast %cst_131 : f32 to vector<8x32xf32>
    %446 = arith.mulf %442, %445 : vector<8x32xf32>
    %447 = math.erf %446 : vector<8x32xf32>
    %cst_132 = arith.constant 1.000000e+00 : f32
    %448 = vector.broadcast %cst_132 : f32 to vector<8x32xf32>
    %449 = arith.addf %448, %447 : vector<8x32xf32>
    %450 = arith.mulf %444, %449 : vector<8x32xf32>
    %cst_133 = arith.constant dense<0.000000e+00> : vector<8x128xf32>
    %451 = tpu.matmul %450, %121, %cst_133 {dimension_numbers = #tpu.dot_dimension_numbers<[1], [0], [0], [1], [0, 0, 1, 1], [], []>} : vector<8x32xf32>, vector<32x128xf32>, vector<8x128xf32> -> vector<8x128xf32>
    %452 = vector.broadcast %122 : vector<1x128xf32> to vector<8x128xf32>
    %453 = arith.addf %451, %452 : vector<8x128xf32>
    %c40 = arith.constant 40 : index
    %c0_134 = arith.constant 0 : index
    %454 = vector.load %arg2[%c40, %c0_134] : memref<80x128xf32, #tpu.memory_space<vmem>>, vector<8x128xf32>
    tpu.vector_store %arg2[%c40, %c0_134], %453 {strides = array<i32>} : memref<80x128xf32, #tpu.memory_space<vmem>>, vector<8x128xf32>,
    %455 = vector.extract_strided_slice %119 {offsets = [48, 0], sizes = [8, 128], strides = [1, 1]} : vector<72x128xf32> to vector<8x128xf32>
    %cst_135 = arith.constant dense<0.000000e+00> : vector<8x128xf32>
    %456 = tpu.matmul %420, %120, %cst_135 {dimension_numbers = #tpu.dot_dimension_numbers<[1], [0], [0], [1], [0, 0, 1, 1], [], []>} : vector<8x32xf32>, vector<32x128xf32>, vector<8x128xf32> -> vector<8x128xf32>
    %457 = arith.addf %455, %456 : vector<8x128xf32>
    %458 = arith.negf %457 : vector<8x128xf32>
    %459 = math.exp %458 : vector<8x128xf32>
    %cst_136 = arith.constant 1.000000e+00 : f32
    %460 = vector.broadcast %cst_136 : f32 to vector<8x128xf32>
    %461 = arith.addf %460, %459 : vector<8x128xf32>
    %462 = arith.divf %460, %461 : vector<8x128xf32>
    %463 = vector.extract_strided_slice %462 {offsets = [0, 0], sizes = [8, 32], strides = [1, 1]} : vector<8x128xf32> to vector<8x32xf32>
    %464 = vector.extract_strided_slice %462 {offsets = [0, 32], sizes = [8, 32], strides = [1, 1]} : vector<8x128xf32> to vector<8x32xf32>
    %465 = vector.extract_strided_slice %462 {offsets = [0, 64], sizes = [8, 32], strides = [1, 1]} : vector<8x128xf32> to vector<8x32xf32>
    %cst_137 = arith.constant 2.000000e+00 : f32
    %466 = vector.broadcast %cst_137 : f32 to vector<8x32xf32>
    %467 = arith.mulf %466, %465 : vector<8x32xf32>
    %cst_138 = arith.constant 1.000000e+00 : f32
    %468 = vector.broadcast %cst_138 : f32 to vector<8x32xf32>
    %469 = arith.subf %467, %468 : vector<8x32xf32>
    %470 = vector.extract_strided_slice %462 {offsets = [0, 96], sizes = [8, 32], strides = [1, 1]} : vector<8x128xf32> to vector<8x32xf32>
    %471 = arith.mulf %464, %418 : vector<8x32xf32>
    %472 = arith.mulf %463, %469 : vector<8x32xf32>
    %473 = arith.addf %471, %472 : vector<8x32xf32>
    %474 = math.tanh %473 : vector<8x32xf32>
    %475 = arith.mulf %470, %474 : vector<8x32xf32>
    %cst_139 = arith.constant dense<0.000000e+00> : vector<8xf32>
    %476 = vector.multi_reduction <add>, %475, %cst_139 [1] : vector<8x32xf32> to vector<8xf32>
    %477 = vector.shape_cast %476 : vector<8xf32> to vector<8x1xf32>
    %cst_140 = arith.constant 3.200000e+01 : f32
    %478 = vector.broadcast %cst_140 : f32 to vector<8x1xf32>
    %479 = arith.divf %477, %478 : vector<8x1xf32>
    %480 = vector.broadcast %479 : vector<8x1xf32> to vector<8x32xf32>
    %481 = arith.subf %475, %480 : vector<8x32xf32>
    %482 = arith.mulf %481, %481 : vector<8x32xf32>
    %cst_141 = arith.constant dense<0.000000e+00> : vector<8xf32>
    %483 = vector.multi_reduction <add>, %482, %cst_141 [1] : vector<8x32xf32> to vector<8xf32>
    %484 = vector.shape_cast %483 : vector<8xf32> to vector<8x1xf32>
    %cst_142 = arith.constant 3.200000e+01 : f32
    %485 = vector.broadcast %cst_142 : f32 to vector<8x1xf32>
    %486 = arith.divf %484, %485 : vector<8x1xf32>
    %487 = vector.broadcast %479 : vector<8x1xf32> to vector<8x32xf32>
    %488 = arith.subf %475, %487 : vector<8x32xf32>
    %cst_143 = arith.constant 9.99999974E-6 : f32
    %489 = vector.broadcast %cst_143 : f32 to vector<8x1xf32>
    %490 = arith.addf %486, %489 : vector<8x1xf32>
    %491 = math.rsqrt %490 : vector<8x1xf32>
    %492 = vector.broadcast %491 : vector<8x1xf32> to vector<8x32xf32>
    %493 = arith.mulf %488, %492 : vector<8x32xf32>
    %494 = vector.broadcast %123 : vector<1x32xf32> to vector<8x32xf32>
    %495 = arith.mulf %493, %494 : vector<8x32xf32>
    %496 = vector.broadcast %124 : vector<1x32xf32> to vector<8x32xf32>
    %497 = arith.addf %495, %496 : vector<8x32xf32>
    %cst_144 = arith.constant 5.000000e-01 : f32
    %498 = vector.broadcast %cst_144 : f32 to vector<8x32xf32>
    %499 = arith.mulf %498, %497 : vector<8x32xf32>
    %cst_145 = arith.constant 0.707106769 : f32
    %500 = vector.broadcast %cst_145 : f32 to vector<8x32xf32>
    %501 = arith.mulf %497, %500 : vector<8x32xf32>
    %502 = math.erf %501 : vector<8x32xf32>
    %cst_146 = arith.constant 1.000000e+00 : f32
    %503 = vector.broadcast %cst_146 : f32 to vector<8x32xf32>
    %504 = arith.addf %503, %502 : vector<8x32xf32>
    %505 = arith.mulf %499, %504 : vector<8x32xf32>
    %cst_147 = arith.constant dense<0.000000e+00> : vector<8x128xf32>
    %506 = tpu.matmul %505, %121, %cst_147 {dimension_numbers = #tpu.dot_dimension_numbers<[1], [0], [0], [1], [0, 0, 1, 1], [], []>} : vector<8x32xf32>, vector<32x128xf32>, vector<8x128xf32> -> vector<8x128xf32>
    %507 = vector.broadcast %122 : vector<1x128xf32> to vector<8x128xf32>
    %508 = arith.addf %506, %507 : vector<8x128xf32>
    %c48 = arith.constant 48 : index
    %c0_148 = arith.constant 0 : index
    %509 = vector.load %arg2[%c48, %c0_148] : memref<80x128xf32, #tpu.memory_space<vmem>>, vector<8x128xf32>
    tpu.vector_store %arg2[%c48, %c0_148], %508 {strides = array<i32>} : memref<80x128xf32, #tpu.memory_space<vmem>>, vector<8x128xf32>,
    %510 = vector.extract_strided_slice %119 {offsets = [56, 0], sizes = [8, 128], strides = [1, 1]} : vector<72x128xf32> to vector<8x128xf32>
    %cst_149 = arith.constant dense<0.000000e+00> : vector<8x128xf32>
    %511 = tpu.matmul %475, %120, %cst_149 {dimension_numbers = #tpu.dot_dimension_numbers<[1], [0], [0], [1], [0, 0, 1, 1], [], []>} : vector<8x32xf32>, vector<32x128xf32>, vector<8x128xf32> -> vector<8x128xf32>
    %512 = arith.addf %510, %511 : vector<8x128xf32>
    %513 = arith.negf %512 : vector<8x128xf32>
    %514 = math.exp %513 : vector<8x128xf32>
    %cst_150 = arith.constant 1.000000e+00 : f32
    %515 = vector.broadcast %cst_150 : f32 to vector<8x128xf32>
    %516 = arith.addf %515, %514 : vector<8x128xf32>
    %517 = arith.divf %515, %516 : vector<8x128xf32>
    %518 = vector.extract_strided_slice %517 {offsets = [0, 0], sizes = [8, 32], strides = [1, 1]} : vector<8x128xf32> to vector<8x32xf32>
    %519 = vector.extract_strided_slice %517 {offsets = [0, 32], sizes = [8, 32], strides = [1, 1]} : vector<8x128xf32> to vector<8x32xf32>
    %520 = vector.extract_strided_slice %517 {offsets = [0, 64], sizes = [8, 32], strides = [1, 1]} : vector<8x128xf32> to vector<8x32xf32>
    %cst_151 = arith.constant 2.000000e+00 : f32
    %521 = vector.broadcast %cst_151 : f32 to vector<8x32xf32>
    %522 = arith.mulf %521, %520 : vector<8x32xf32>
    %cst_152 = arith.constant 1.000000e+00 : f32
    %523 = vector.broadcast %cst_152 : f32 to vector<8x32xf32>
    %524 = arith.subf %522, %523 : vector<8x32xf32>
    %525 = vector.extract_strided_slice %517 {offsets = [0, 96], sizes = [8, 32], strides = [1, 1]} : vector<8x128xf32> to vector<8x32xf32>
    %526 = arith.mulf %519, %473 : vector<8x32xf32>
    %527 = arith.mulf %518, %524 : vector<8x32xf32>
    %528 = arith.addf %526, %527 : vector<8x32xf32>
    %529 = math.tanh %528 : vector<8x32xf32>
    %530 = arith.mulf %525, %529 : vector<8x32xf32>
    %cst_153 = arith.constant dense<0.000000e+00> : vector<8xf32>
    %531 = vector.multi_reduction <add>, %530, %cst_153 [1] : vector<8x32xf32> to vector<8xf32>
    %532 = vector.shape_cast %531 : vector<8xf32> to vector<8x1xf32>
    %cst_154 = arith.constant 3.200000e+01 : f32
    %533 = vector.broadcast %cst_154 : f32 to vector<8x1xf32>
    %534 = arith.divf %532, %533 : vector<8x1xf32>
    %535 = vector.broadcast %534 : vector<8x1xf32> to vector<8x32xf32>
    %536 = arith.subf %530, %535 : vector<8x32xf32>
    %537 = arith.mulf %536, %536 : vector<8x32xf32>
    %cst_155 = arith.constant dense<0.000000e+00> : vector<8xf32>
    %538 = vector.multi_reduction <add>, %537, %cst_155 [1] : vector<8x32xf32> to vector<8xf32>
    %539 = vector.shape_cast %538 : vector<8xf32> to vector<8x1xf32>
    %cst_156 = arith.constant 3.200000e+01 : f32
    %540 = vector.broadcast %cst_156 : f32 to vector<8x1xf32>
    %541 = arith.divf %539, %540 : vector<8x1xf32>
    %542 = vector.broadcast %534 : vector<8x1xf32> to vector<8x32xf32>
    %543 = arith.subf %530, %542 : vector<8x32xf32>
    %cst_157 = arith.constant 9.99999974E-6 : f32
    %544 = vector.broadcast %cst_157 : f32 to vector<8x1xf32>
    %545 = arith.addf %541, %544 : vector<8x1xf32>
    %546 = math.rsqrt %545 : vector<8x1xf32>
    %547 = vector.broadcast %546 : vector<8x1xf32> to vector<8x32xf32>
    %548 = arith.mulf %543, %547 : vector<8x32xf32>
    %549 = vector.broadcast %123 : vector<1x32xf32> to vector<8x32xf32>
    %550 = arith.mulf %548, %549 : vector<8x32xf32>
    %551 = vector.broadcast %124 : vector<1x32xf32> to vector<8x32xf32>
    %552 = arith.addf %550, %551 : vector<8x32xf32>
    %cst_158 = arith.constant 5.000000e-01 : f32
    %553 = vector.broadcast %cst_158 : f32 to vector<8x32xf32>
    %554 = arith.mulf %553, %552 : vector<8x32xf32>
    %cst_159 = arith.constant 0.707106769 : f32
    %555 = vector.broadcast %cst_159 : f32 to vector<8x32xf32>
    %556 = arith.mulf %552, %555 : vector<8x32xf32>
    %557 = math.erf %556 : vector<8x32xf32>
    %cst_160 = arith.constant 1.000000e+00 : f32
    %558 = vector.broadcast %cst_160 : f32 to vector<8x32xf32>
    %559 = arith.addf %558, %557 : vector<8x32xf32>
    %560 = arith.mulf %554, %559 : vector<8x32xf32>
    %cst_161 = arith.constant dense<0.000000e+00> : vector<8x128xf32>
    %561 = tpu.matmul %560, %121, %cst_161 {dimension_numbers = #tpu.dot_dimension_numbers<[1], [0], [0], [1], [0, 0, 1, 1], [], []>} : vector<8x32xf32>, vector<32x128xf32>, vector<8x128xf32> -> vector<8x128xf32>
    %562 = vector.broadcast %122 : vector<1x128xf32> to vector<8x128xf32>
    %563 = arith.addf %561, %562 : vector<8x128xf32>
    %c56 = arith.constant 56 : index
    %c0_162 = arith.constant 0 : index
    %564 = vector.load %arg2[%c56, %c0_162] : memref<80x128xf32, #tpu.memory_space<vmem>>, vector<8x128xf32>
    tpu.vector_store %arg2[%c56, %c0_162], %563 {strides = array<i32>} : memref<80x128xf32, #tpu.memory_space<vmem>>, vector<8x128xf32>,
    %565 = vector.extract_strided_slice %119 {offsets = [64, 0], sizes = [8, 128], strides = [1, 1]} : vector<72x128xf32> to vector<8x128xf32>
    %cst_163 = arith.constant dense<0.000000e+00> : vector<8x128xf32>
    %566 = tpu.matmul %530, %120, %cst_163 {dimension_numbers = #tpu.dot_dimension_numbers<[1], [0], [0], [1], [0, 0, 1, 1], [], []>} : vector<8x32xf32>, vector<32x128xf32>, vector<8x128xf32> -> vector<8x128xf32>
    %567 = arith.addf %565, %566 : vector<8x128xf32>
    %568 = arith.negf %567 : vector<8x128xf32>
    %569 = math.exp %568 : vector<8x128xf32>
    %cst_164 = arith.constant 1.000000e+00 : f32
    %570 = vector.broadcast %cst_164 : f32 to vector<8x128xf32>
    %571 = arith.addf %570, %569 : vector<8x128xf32>
    %572 = arith.divf %570, %571 : vector<8x128xf32>
    %573 = vector.extract_strided_slice %572 {offsets = [0, 0], sizes = [8, 32], strides = [1, 1]} : vector<8x128xf32> to vector<8x32xf32>
    %574 = vector.extract_strided_slice %572 {offsets = [0, 32], sizes = [8, 32], strides = [1, 1]} : vector<8x128xf32> to vector<8x32xf32>
    %575 = vector.extract_strided_slice %572 {offsets = [0, 64], sizes = [8, 32], strides = [1, 1]} : vector<8x128xf32> to vector<8x32xf32>
    %cst_165 = arith.constant 2.000000e+00 : f32
    %576 = vector.broadcast %cst_165 : f32 to vector<8x32xf32>
    %577 = arith.mulf %576, %575 : vector<8x32xf32>
    %cst_166 = arith.constant 1.000000e+00 : f32
    %578 = vector.broadcast %cst_166 : f32 to vector<8x32xf32>
    %579 = arith.subf %577, %578 : vector<8x32xf32>
    %580 = vector.extract_strided_slice %572 {offsets = [0, 96], sizes = [8, 32], strides = [1, 1]} : vector<8x128xf32> to vector<8x32xf32>
    %581 = arith.mulf %574, %528 : vector<8x32xf32>
    %582 = arith.mulf %573, %579 : vector<8x32xf32>
    %583 = arith.addf %581, %582 : vector<8x32xf32>
    %584 = math.tanh %583 : vector<8x32xf32>
    %585 = arith.mulf %580, %584 : vector<8x32xf32>
    %cst_167 = arith.constant dense<0.000000e+00> : vector<8xf32>
    %586 = vector.multi_reduction <add>, %585, %cst_167 [1] : vector<8x32xf32> to vector<8xf32>
    %587 = vector.shape_cast %586 : vector<8xf32> to vector<8x1xf32>
    %cst_168 = arith.constant 3.200000e+01 : f32
    %588 = vector.broadcast %cst_168 : f32 to vector<8x1xf32>
    %589 = arith.divf %587, %588 : vector<8x1xf32>
    %590 = vector.broadcast %589 : vector<8x1xf32> to vector<8x32xf32>
    %591 = arith.subf %585, %590 : vector<8x32xf32>
    %592 = arith.mulf %591, %591 : vector<8x32xf32>
    %cst_169 = arith.constant dense<0.000000e+00> : vector<8xf32>
    %593 = vector.multi_reduction <add>, %592, %cst_169 [1] : vector<8x32xf32> to vector<8xf32>
    %594 = vector.shape_cast %593 : vector<8xf32> to vector<8x1xf32>
    %cst_170 = arith.constant 3.200000e+01 : f32
    %595 = vector.broadcast %cst_170 : f32 to vector<8x1xf32>
    %596 = arith.divf %594, %595 : vector<8x1xf32>
    %597 = vector.broadcast %589 : vector<8x1xf32> to vector<8x32xf32>
    %598 = arith.subf %585, %597 : vector<8x32xf32>
    %cst_171 = arith.constant 9.99999974E-6 : f32
    %599 = vector.broadcast %cst_171 : f32 to vector<8x1xf32>
    %600 = arith.addf %596, %599 : vector<8x1xf32>
    %601 = math.rsqrt %600 : vector<8x1xf32>
    %602 = vector.broadcast %601 : vector<8x1xf32> to vector<8x32xf32>
    %603 = arith.mulf %598, %602 : vector<8x32xf32>
    %604 = vector.broadcast %123 : vector<1x32xf32> to vector<8x32xf32>
    %605 = arith.mulf %603, %604 : vector<8x32xf32>
    %606 = vector.broadcast %124 : vector<1x32xf32> to vector<8x32xf32>
    %607 = arith.addf %605, %606 : vector<8x32xf32>
    %cst_172 = arith.constant 5.000000e-01 : f32
    %608 = vector.broadcast %cst_172 : f32 to vector<8x32xf32>
    %609 = arith.mulf %608, %607 : vector<8x32xf32>
    %cst_173 = arith.constant 0.707106769 : f32
    %610 = vector.broadcast %cst_173 : f32 to vector<8x32xf32>
    %611 = arith.mulf %607, %610 : vector<8x32xf32>
    %612 = math.erf %611 : vector<8x32xf32>
    %cst_174 = arith.constant 1.000000e+00 : f32
    %613 = vector.broadcast %cst_174 : f32 to vector<8x32xf32>
    %614 = arith.addf %613, %612 : vector<8x32xf32>
    %615 = arith.mulf %609, %614 : vector<8x32xf32>
    %cst_175 = arith.constant dense<0.000000e+00> : vector<8x128xf32>
    %616 = tpu.matmul %615, %121, %cst_175 {dimension_numbers = #tpu.dot_dimension_numbers<[1], [0], [0], [1], [0, 0, 1, 1], [], []>} : vector<8x32xf32>, vector<32x128xf32>, vector<8x128xf32> -> vector<8x128xf32>
    %617 = vector.broadcast %122 : vector<1x128xf32> to vector<8x128xf32>
    %618 = arith.addf %616, %617 : vector<8x128xf32>
    %c64 = arith.constant 64 : index
    %c0_176 = arith.constant 0 : index
    %619 = vector.load %arg2[%c64, %c0_176] : memref<80x128xf32, #tpu.memory_space<vmem>>, vector<8x128xf32>
    tpu.vector_store %arg2[%c64, %c0_176], %618 {strides = array<i32>} : memref<80x128xf32, #tpu.memory_space<vmem>>, vector<8x128xf32>,
    %cst_177 = arith.constant 0.000000e+00 : f32
    %620 = vector.broadcast %cst_177 : f32 to vector<8x64xf32>
    %621 = tpu.concatenate %585, %583, %620 in 1 : vector<8x32xf32>, vector<8x32xf32>, vector<8x64xf32> -> vector<8x128xf32>
    %c72_178 = arith.constant 72 : index
    %c0_179 = arith.constant 0 : index
    %622 = vector.load %arg2[%c72_178, %c0_179] : memref<80x128xf32, #tpu.memory_space<vmem>>, vector<8x128xf32>
    tpu.vector_store %arg2[%c72_178, %c0_179], %621 {strides = array<i32>} : memref<80x128xf32, #tpu.memory_space<vmem>>, vector<8x128xf32>,
    return
  }
}

</mosaic_0001>

<bundles_post_ra>
// kernel: speech_recognition_forward.1
= control target key start
LH: loop header
LB: loop body
LE: loop exit
PB: predicated region body
PF: predicated region fallthrough
CT: control target
= control target key end

     0   :  { %v4010_v0 = vmov 0.0|0.0   ;;  %vm51_vm0 = vcmask 261120   ;;  %vm205_vm1 = vcmask 130048   ;;  %vm4011_vm2 = vmmov 0   ;;  %s4013_s29 = smov 32   ;;  %s4015_s3 = smov 96   ;;  %s5060_s1 = inlined_call_operand.vmem [shape: f32[512,128], index: 1, kind: input, shape index: {}]   ;;  %s5061_s0 = inlined_call_operand.vmem [shape: f32[88,160], index: 0, kind: input, shape index: {}]   ;;  %s5062_s2 = inlined_call_operand.vmem [shape: f32[80,128], index: 2, kind: output, shape index: {}]  }
   0x1   :  { %3574 = vmatprep.subr.bf16.mxu0 %v4010_v0  ;;  %v31_v1 = vld [vmem:[%s5060_s1] sm:$0xff]  ;;  %v32_v2 = vld [vmem:[%s5060_s1 + $0x8] sm:$0xff]  ;;  %v33_v3 = vld [vmem:[%s5060_s1 + $0x10] sm:$0xff]  ;;  %3604 = vmatprep.subr.bf16.mxu1 %v4010_v0  ;;  %vm3002_vm3 = vcmask 523264  }
   0x2   :  { %v3575_v4 = vpack.c.bf16 %v32_v2, %v31_v1  ;;  %v34_v5 = vld [vmem:[%s5060_s1 + $0x18] sm:$0xff]  ;;  %v35_v7 = vld [vmem:[%s5060_s1 + $0x20] sm:$0xff]  ;;  %v36_v8 = vld [vmem:[%s5060_s1 + $0x28] sm:$0xff] }
   0x3   :  { %v3578_v6 = vpack.c.bf16 %v34_v5, %v33_v3  ;;  %v12_v9 = vld [vmem:[%s5061_s0 + $0x8] sm:$0xff]  ;;  %v3581_v10 = vpack.c.bf16 %v36_v8, %v35_v7  ;;  %v37_v11 = vld [vmem:[%s5060_s1 + $0x30] sm:$0xff]  ;;  %v38_v12 = vld [vmem:[%s5060_s1 + $0x38] sm:$0xff] }
   0x4   :  { %3576 = vmatpush1.bf16.msra.mxu0 %v3575_v4  ;;  %3009 = vmatprep.mubr.msk.f32.mxu0 %vm51_vm0, %v12_v9  ;;  %v3584_v13 = vpack.c.bf16 %v38_v12, %v37_v11  ;;  %v39_v14 = vld [vmem:[%s5060_s1 + $0x40] sm:$0xff]  ;;  %v40_v15 = vld [vmem:[%s5060_s1 + $0x48] sm:$0xff]  ;;  %v41_v17 = vld [vmem:[%s5060_s1 + $0x50] sm:$0xff] }
   0x5   :  { %3577 = vmatprep.subr.bf16.mxu0 %v4010_v0  ;;  %v3587_v16 = vpack.c.bf16 %v40_v15, %v39_v14  ;;  %v42_v18 = vld [vmem:[%s5060_s1 + $0x58] sm:$0xff]  ;;  %v43_v20 = vld [vmem:[%s5060_s1 + $0x60] sm:$0xff]  ;;  %v44_v21 = vld [vmem:[%s5060_s1 + $0x68] sm:$0xff] }
   0x6   :  { %v3590_v19 = vpack.c.bf16 %v42_v18, %v41_v17  ;;  %v3593_v22 = vpack.c.bf16 %v44_v21, %v43_v20  ;;  %v45_v23 = vld [vmem:[%s5060_s1 + $0x70] sm:$0xff]  ;;  %v46_v24 = vld [vmem:[%s5060_s1 + $0x78] sm:$0xff]  ;;  %v47_v26 = vld [vmem:[%s5060_s1 + $0x80] sm:$0xff] }
   0x7   :  { %v3596_v25 = vpack.c.bf16 %v46_v24, %v45_v23  ;;  %v48_v27 = vld [vmem:[%s5060_s1 + $0x88] sm:$0xff]  ;;  %v49_v29 = vld [vmem:[%s5060_s1 + $0x90] sm:$0xff]  ;;  %v50_v30 = vld [vmem:[%s5060_s1 + $0x98] sm:$0xff] }
   0x8   :  { %3579 = vmatpush1.bf16.msra.mxu0 %v3578_v6  ;;  %v3599_v28 = vpack.c.bf16 %v48_v27, %v47_v26  ;;  %v3602_v31 = vpack.c.bf16 %v50_v30, %v49_v29  ;;  %v11_v32 = vld [vmem:[%s5061_s0] sm:$0xff]  ;;  %v14_v33 = vld [vmem:[%s5061_s0 + $0x18] sm:$0xff]  ;;  %v13_v34 = vld [vmem:[%s5061_s0 + $0x10] sm:$0xff] }
   0x9   :  { %3580 = vmatprep.subr.bf16.mxu0 %v4010_v0  ;;  %v16_v35 = vld [vmem:[%s5061_s0 + $0x28] sm:$0xff]  ;;  %v15_v36 = vld [vmem:[%s5061_s0 + $0x20] sm:$0xff]  ;;  %v18_v37 = vld [vmem:[%s5061_s0 + $0x38] sm:$0xff] }
   0xa   :  { %v17_v38 = vld [vmem:[%s5061_s0 + $0x30] sm:$0xff]  ;;  %v20_v39 = vld [vmem:[%s5061_s0 + $0x48] sm:$0xff]  ;;  %v19_v40 = vld [vmem:[%s5061_s0 + $0x40] sm:$0xff] }
   0xb   :  { %v4141_v41 = vld [vmem:[%s5060_s1 + $0x1f8] ss:$0 sm:$0xff]  ;;  %v21_v63 = vld [vmem:[%s5061_s0 + $0x50] sm:$0xff]  ;;  %v24_v1 = vld [vmem:[%s5061_s0 + $0x68] sm:$0xff] }
   0xc   :  { %3582 = vmatpush1.bf16.msra.mxu0 %v3581_v10  ;;  %v22_v62 = vld [vmem:[%s5061_s0 + $0x58] sm:$0xff]  ;;  %v23_v2 = vld [vmem:[%s5061_s0 + $0x60] sm:$0xff]  ;;  %v25_v4 = vld [vmem:[%s5061_s0 + $0x70] sm:$0xff] }
   0xd   :  { %3583 = vmatprep.subr.bf16.mxu0 %v4010_v0  ;;  %v26_v3 = vld [vmem:[%s5061_s0 + $0x78] sm:$0xff]  ;;  %v28_v5 = vld [vmem:[%s5061_s0 + $0x88] sm:$0xff]  ;;  %v27_v6 = vld [vmem:[%s5061_s0 + $0x80] sm:$0xff] }
  0x10   :  { %3585 = vmatpush1.bf16.msra.mxu0 %v3584_v13 }
  0x11   :  { %3586 = vmatprep.subr.bf16.mxu0 %v4010_v0 }
  0x14   :  { %3588 = vmatpush1.bf16.msra.mxu0 %v3587_v16 }
  0x15   :  { %3589 = vmatprep.subr.bf16.mxu0 %v4010_v0 }
  0x18   :  { %3591 = vmatpush1.bf16.msra.mxu0 %v3590_v19 }
  0x19   :  { %3592 = vmatprep.subr.bf16.mxu0 %v4010_v0 }
  0x1c   :  { %3594 = vmatpush1.bf16.msra.mxu0 %v3593_v22 }
  0x1d   :  { %3595 = vmatprep.subr.bf16.mxu0 %v4010_v0 }
  0x20   :  { %3597 = vmatpush1.bf16.msra.mxu0 %v3596_v25 }
  0x21   :  { %3598 = vmatprep.subr.bf16.mxu0 %v4010_v0 }
  0x24   :  { %3600 = vmatpush1.bf16.msra.mxu0 %v3599_v28 }
  0x25   :  { %3601 = vmatprep.subr.bf16.mxu0 %v4010_v0 }
  0x28   :  { %3603 = vmatpush1.bf16.msra.mxu0 %v3602_v31 }
  0x29   :  { %3631 = vmatprep.subr.bf16.mxu0 %v4010_v0 }
  0x2b   :  { %144 = vmatmul.mubr.f32.vlgmr.msra.gmra.mrb[0].mxu0 %v11_v32  ;;  %v395_v32 = vld [vmem:[%s5060_s1 + $0xa0] sm:$0xff] }
  0x2c   :  { %3010 = vmatprep.mubr.msk.f32.mxu0 %vm51_vm0, %v14_v33  ;;  %v396_v33 = vld [vmem:[%s5060_s1 + $0xa8] sm:$0xff] }
  0x2f   :  { %149 = vmatmul.mubr.f32.gmra.mrb[2].mxu0 %v13_v34  ;;  %v3605_v34 = vpack.c.bf16 %v396_v33, %v395_v32 }
  0x30   :  { %3011 = vmatprep.mubr.msk.f32.mxu0 %vm51_vm0, %v16_v35  ;;  %v4012_v35 = vmov 0.0  }
  0x31   :  { %3231 = vmatprep.mubr.msk.f32.mxu1 %vm4011_vm2, %v4012_v35  ;;  %3606 = vmatpush3.bf16.msra.mxu1 %v3605_v34 }
  0x32   :  { %3607 = vmatprep.subr.bf16.mxu1 %v4010_v0 }
  0x33   :  { %154 = vmatmul.mubr.f32.gmra.mrb[4].mxu0 %v15_v36 }
  0x34   :  { %3012 = vmatprep.mubr.msk.f32.mxu0 %vm51_vm0, %v18_v37 }
  0x37   :  { %159 = vmatmul.mubr.f32.gmra.mrb[6].mxu0 %v17_v38 }
  0x38   :  { %3013 = vmatprep.mubr.msk.f32.mxu0 %vm51_vm0, %v20_v39 }
  0x3b   :  { %164 = vmatmul.mubr.f32.gmra.mrb[8].mxu0 %v19_v40 }
  0x3c   :  { %3014 = vmatprep.mubr.msk.f32.mxu0 %vm51_vm0, %v22_v62 }
  0x3f   :  { %169 = vmatmul.mubr.f32.gmra.mrb[10].mxu0 %v21_v63 }
  0x40   :  { %3015 = vmatprep.mubr.msk.f32.mxu0 %vm51_vm0, %v24_v1 }
  0x43   :  { %174 = vmatmul.mubr.f32.gmra.mrb[12].mxu0 %v23_v2  ;;  %v4240_v2 = vld [vmem:[%s5060_s1 + $0x1f9] ss:$0 sm:$0xff] }
  0x44   :  { %3016 = vmatprep.mubr.msk.f32.mxu0 %vm51_vm0, %v26_v3 }
  0x47   :  { %179 = vmatmul.mubr.f32.gmra.mrb[14].mxu0 %v25_v4 }
  0x48   :  { %3017 = vmatprep.mubr.msk.f32.mxu0 %vm51_vm0, %v28_v5 }
  0x4b   :  { %184 = vmatmul.mubr.f32.gmra.mrb[16].mxu0 %v27_v6  ;;  %v4246_v6 = vld [vmem:[%s5060_s1 + $0x1fa] ss:$0 sm:$0xff] }
  0x4c   :  { %3349 = vmatprep.mubr.msk.f32.mxu0 %vm4011_vm2, %v4012_v35 }
  0xfe   :  { %v145_v42 = vpop.f32.mrb[0].mxu0 }
  0xff   :  { %v194_v43 = vadd.f32 %v4141_v41, %v145_v42  ;;  %v147_v44 = vpop.f32.mrb[1].mxu0 }
 0x101   :  { %v206_v45 = vsel %vm205_vm1, %v194_v43, 0.0 }
 0x102   :  { %207 = vadd.xlane.f32.xlu0 %v206_v45  ;;  %v150_v46 = vpop.f32.mrb[2].mxu0 }
 0x103   :  { %v195_v47 = vadd.f32 %v4141_v41, %v150_v46  ;;  %v152_v48 = vpop.f32.mrb[3].mxu0 }
 0x105   :  { %v209_v49 = vsel %vm205_vm1, %v195_v47, 0.0 }
 0x106   :  { %210 = vadd.xlane.f32.xlu0 %v209_v49  ;;  %v155_v50 = vpop.f32.mrb[4].mxu0 }
 0x107   :  { %v196_v51 = vadd.f32 %v4141_v41, %v155_v50  ;;  %v157_v52 = vpop.f32.mrb[5].mxu0 }
 0x109   :  { %v212_v53 = vsel %vm205_vm1, %v196_v51, 0.0 }
 0x10a   :  { %213 = vadd.xlane.f32.xlu1 %v212_v53  ;;  %v160_v54 = vpop.f32.mrb[6].mxu0 }
 0x10b   :  { %v197_v55 = vadd.f32 %v4141_v41, %v160_v54  ;;  %v162_v56 = vpop.f32.mrb[7].mxu0 }
 0x10d   :  { %v215_v57 = vsel %vm205_vm1, %v197_v55, 0.0 }
 0x10e   :  { %216 = vadd.xlane.f32.xlu1 %v215_v57  ;;  %v165_v58 = vpop.f32.mrb[8].mxu0 }
 0x10f   :  { %v198_v59 = vadd.f32 %v4141_v41, %v165_v58  ;;  %v167_v60 = vpop.f32.mrb[9].mxu0 }
 0x111   :  { %v218_v61 = vsel %vm205_vm1, %v198_v59, 0.0 }
 0x112   :  { %219 = vadd.xlane.f32.xlu0 %v218_v61  ;;  %v170_v36 = vpop.f32.mrb[10].mxu0 }
 0x113   :  { %v4218_v37 = vadd.f32 %v4141_v41, %v170_v36  ;;  %v172_v38 = vpop.f32.mrb[11].mxu0 }
 0x115   :  { %v221_v39 = vsel %vm205_vm1, %v4218_v37, 0.0 }
 0x116   :  { %v175_v40 = vpop.f32.mrb[12].mxu0 }
 0x117   :  { %v4223_v42 = vadd.f32 %v4141_v41, %v175_v40 }
 0x119   :  { %v224_v44 = vsel %vm205_vm1, %v4223_v42, 0.0 }
 0x18f   :  { %v208_v7 = vpop.xlane.xlu0 %207 }
 0x190   :  { %v234_v8 = vmul.f32 0.0625, %v208_v7 }
 0x192   :  { %v4181_v9 = vsub.f32 %v194_v43, %v234_v8  ;;  %v177_v43 = vpop.f32.mrb[13].mxu0 }
 0x193   :  { %v211_v10 = vpop.xlane.xlu0 %210  ;;  %v180_v45 = vpop.f32.mrb[14].mxu0 }
 0x194   :  { %v235_v11 = vmul.f32 0.0625, %v211_v10  ;;  %v252_v12 = vmul.f32 %v4181_v9, %v4181_v9  ;;  %v4228_v46 = vadd.f32 %v4141_v41, %v180_v45 }
 0x196   :  { %v4185_v13 = vsub.f32 %v195_v47, %v235_v11  ;;  %v261_v14 = vsel %vm205_vm1, %v252_v12, 0.0  ;;  %v182_v47 = vpop.f32.mrb[15].mxu0  ;;  %v227_v48 = vsel %vm205_vm1, %v4228_v46, 0.0 }
 0x197   :  { %v214_v15 = vpop.xlane.xlu1 %213  ;;  %262 = vadd.xlane.f32.xlu1 %v261_v14  ;;  %v185_v49 = vpop.f32.mrb[16].mxu0 }
 0x198   :  { %v236_v16 = vmul.f32 0.0625, %v214_v15  ;;  %v253_v17 = vmul.f32 %v4185_v13, %v4185_v13  ;;  %v4233_v50 = vadd.f32 %v4141_v41, %v185_v49 }
 0x19a   :  { %v4190_v18 = vsub.f32 %v196_v51, %v236_v16  ;;  %v264_v19 = vsel %vm205_vm1, %v253_v17, 0.0  ;;  %v187_v51 = vpop.f32.mrb[17].mxu0  ;;  %v230_v52 = vsel %vm205_vm1, %v4233_v50, 0.0 }
 0x19b   :  { %v217_v20 = vpop.xlane.xlu1 %216  ;;  %265 = vadd.xlane.f32.xlu0 %v264_v19 }
 0x19c   :  { %v237_v21 = vmul.f32 0.0625, %v217_v20  ;;  %v254_v22 = vmul.f32 %v4190_v18, %v4190_v18 }
 0x19e   :  { %v4195_v23 = vsub.f32 %v197_v55, %v237_v21  ;;  %v267_v24 = vsel %vm205_vm1, %v254_v22, 0.0 }
 0x19f   :  { %268 = vadd.xlane.f32.xlu1 %v267_v24  ;;  %v220_v25 = vpop.xlane.xlu0 %219 }
 0x1a0   :  { %v238_v26 = vmul.f32 0.0625, %v220_v25  ;;  %v255_v27 = vmul.f32 %v4195_v23, %v4195_v23 }
 0x1a2   :  { %v4200_v28 = vsub.f32 %v198_v59, %v238_v26  ;;  %v270_v29 = vsel %vm205_vm1, %v255_v27, 0.0 }
 0x1a3   :  { %271 = vadd.xlane.f32.xlu0 %v270_v29 }
 0x1a4   :  { %v256_v30 = vmul.f32 %v4200_v28, %v4200_v28 }
 0x1a6   :  { %v273_v31 = vsel %vm205_vm1, %v256_v30, 0.0 }
 0x1a7   :  { %274 = vadd.xlane.f32.xlu1 %v273_v31  ;;  %222 = vadd.xlane.f32.xlu0 %v221_v39 }
 0x1ab   :  { %225 = vadd.xlane.f32.xlu1 %v224_v44  ;;  %228 = vadd.xlane.f32.xlu0 %v227_v48 }
 0x1af   :  { %231 = vadd.xlane.f32.xlu1 %v230_v52 }
 0x224   :  { %v263_v53 = vpop.xlane.xlu1 %262 }
 0x225   :  { %v288_v54 = vmul.f32 0.0625, %v263_v53 }
 0x227   :  { %v297_v55 = vadd.f32 1e-05, %v288_v54 }
 0x228   :  { %v266_v56 = vpop.xlane.xlu0 %265 }
 0x229   :  { %3808 = vrsqrt.f32 %v297_v55  ;;  %v289_v57 = vmul.f32 0.0625, %v266_v56 }
 0x22b   :  { %v298_v58 = vadd.f32 1e-05, %v289_v57  ;;  %v3021_v57 = vld [vmem:[%s5060_s1 + $0x1f0] ss:$0 sm:$0xff] }
 0x22c   :  { %v269_v59 = vpop.xlane.xlu1 %268 }
 0x22d   :  { %3810 = vrsqrt.f32 %v298_v58  ;;  %v290_v60 = vmul.f32 0.0625, %v269_v59 }
 0x22f   :  { %v299_v61 = vadd.f32 1e-05, %v290_v60 }
 0x230   :  { %v272_v62 = vpop.xlane.xlu0 %271 }
 0x231   :  { %3812 = vrsqrt.f32 %v299_v61  ;;  %v291_v41 = vmul.f32 0.0625, %v272_v62 }
 0x233   :  { %v3809_v63 = vpop.eup %3808  ;;  %v300_v1 = vadd.f32 1e-05, %v291_v41 }
 0x234   :  { %v315_v3 = vmul.f32 %v3809_v63, %v4181_v9  ;;  %v275_v4 = vpop.xlane.xlu1 %274  ;;  %v223_v61 = vpop.xlane.xlu0 %222 }
 0x235   :  { %3814 = vrsqrt.f32 %v300_v1  ;;  %v292_v5 = vmul.f32 0.0625, %v275_v4  ;;  %v239_v1 = vmul.f32 0.0625, %v223_v61 }
 0x236   :  { %v328_v7 = vmul.f32 %v4240_v2, %v315_v3 }
 0x237   :  { %v3811_v8 = vpop.eup %3810  ;;  %v301_v10 = vadd.f32 1e-05, %v292_v5 }
 0x238   :  { %v316_v11 = vmul.f32 %v3811_v8, %v4185_v13  ;;  %v341_v12 = vadd.f32 %v4246_v6, %v328_v7  ;;  %v226_v3 = vpop.xlane.xlu1 %225  ;;  %v229_v4 = vpop.xlane.xlu0 %228 }
 0x239   :  { %3816 = vrsqrt.f32 %v301_v10  ;;  %v4281_v10 = vsub.f32 %v4218_v37, %v239_v1  ;;  %v713_v1 = vld [vmem:[%s5060_s1 + $0xb8] sm:$0xff] }
 0x23a   :  { %v359_v14 = vmul.f32 0.70710677, %v341_v12  ;;  %v329_v9 = vmul.f32 %v4240_v2, %v316_v11  ;;  %v350_v32 = vmul.f32 0.5, %v341_v12  ;;  %v240_v11 = vmul.f32 0.0625, %v226_v3 }
 0x23b   :  { %v3813_v15 = vpop.eup %3812  ;;  %v241_v12 = vmul.f32 0.0625, %v229_v4 }
 0x23c   :  { %v317_v16 = vmul.f32 %v3813_v15, %v4190_v18  ;;  %3818 = verf.f32 %v359_v14  ;;  %v342_v17 = vadd.f32 %v4246_v6, %v329_v9  ;;  %v232_v14 = vpop.xlane.xlu1 %231 }
 0x23e   :  { %v360_v19 = vmul.f32 0.70710677, %v342_v17  ;;  %v330_v20 = vmul.f32 %v4240_v2, %v317_v16  ;;  %v351_v39 = vmul.f32 0.5, %v342_v17  ;;  %v4284_v17 = vsub.f32 %v4223_v42, %v240_v11 }
 0x23f   :  { %v3815_v21 = vpop.eup %3814 }
 0x240   :  { %v318_v22 = vmul.f32 %v3815_v21, %v4195_v23  ;;  %3820 = verf.f32 %v360_v19  ;;  %v343_v13 = vadd.f32 %v4246_v6, %v330_v20  ;;  %v4287_v19 = vsub.f32 %v4228_v46, %v241_v12 }
 0x241   :  { %v242_v20 = vmul.f32 0.0625, %v232_v14  ;;  %v257_v21 = vmul.f32 %v4281_v10, %v4281_v10  ;;  %v258_v42 = vmul.f32 %v4284_v17, %v4284_v17 }
 0x242   :  { %v361_v24 = vmul.f32 0.70710677, %v343_v13  ;;  %v331_v25 = vmul.f32 %v4240_v2, %v318_v22  ;;  %v352_v44 = vmul.f32 0.5, %v343_v13  ;;  %v259_v46 = vmul.f32 %v4287_v19, %v4287_v19 }
 0x243   :  { %v3817_v26 = vpop.eup %3816 }
 0x244   :  { %v319_v27 = vmul.f32 %v3817_v26, %v4200_v28  ;;  %3822 = verf.f32 %v361_v24  ;;  %v344_v18 = vadd.f32 %v4246_v6, %v331_v25  ;;  %v4292_v24 = vsub.f32 %v4233_v50, %v242_v20 }
 0x245   :  { %v276_v25 = vsel %vm205_vm1, %v257_v21, 0.0  ;;  %v279_v26 = vsel %vm205_vm1, %v258_v42, 0.0  ;;  %v718_v42 = vld [vmem:[%s5060_s1 + $0xe0] sm:$0xff] }
 0x246   :  { %v3819_v29 = vpop.eup %3818  ;;  %v362_v30 = vmul.f32 0.70710677, %v344_v18  ;;  %v332_v31 = vmul.f32 %v4240_v2, %v319_v27  ;;  %v353_v49 = vmul.f32 0.5, %v344_v18  ;;  %v282_v27 = vsel %vm205_vm1, %v259_v46, 0.0  ;;  %v719_v46 = vld [vmem:[%s5060_s1 + $0xe8] sm:$0xff] }
 0x247   :  { %v377_v33 = vadd.f32 1.0, %v3819_v29  ;;  %v260_v18 = vmul.f32 %v4292_v24, %v4292_v24 }
 0x248   :  { %3824 = verf.f32 %v362_v30  ;;  %v345_v23 = vadd.f32 %v4246_v6, %v332_v31 }
 0x249   :  { %v386_v34 = vmul.f32 %v377_v33, %v350_v32  ;;  %v285_v50 = vsel %vm205_vm1, %v260_v18, 0.0 }
 0x24a   :  { %v3821_v36 = vpop.eup %3820  ;;  %v363_v38 = vmul.f32 0.70710677, %v345_v23  ;;  %v354_v54 = vmul.f32 0.5, %v345_v23 }
 0x24b   :  { %3232 = vmatmul.mubr.msk.f32.vlgmr.msra.gmra.mrb[0].mxu1 %vm205_vm1, %v386_v34  ;;  %v378_v40 = vadd.f32 1.0, %v3821_v36 }
 0x24c   :  { %3234 = vmatprep.mubr.msk.f32.mxu1 %vm4011_vm2, %v4012_v35  ;;  %3826 = verf.f32 %v363_v38 }
 0x24d   :  { %v387_v28 = vmul.f32 %v378_v40, %v351_v39 }
 0x24e   :  { %v3823_v43 = vpop.eup %3822 }
 0x24f   :  { %3235 = vmatmul.mubr.msk.f32.gmra.mrb[2].mxu1 %vm205_vm1, %v387_v28  ;;  %v379_v45 = vadd.f32 1.0, %v3823_v43 }
 0x250   :  { %3237 = vmatprep.mubr.msk.f32.mxu1 %vm4011_vm2, %v4012_v35 }
 0x251   :  { %v388_v47 = vmul.f32 %v379_v45, %v352_v44 }
 0x252   :  { %v3825_v48 = vpop.eup %3824 }
 0x253   :  { %3238 = vmatmul.mubr.msk.f32.gmra.mrb[4].mxu1 %vm205_vm1, %v388_v47  ;;  %v380_v51 = vadd.f32 1.0, %v3825_v48 }
 0x254   :  { %3240 = vmatprep.mubr.msk.f32.mxu1 %vm4011_vm2, %v4012_v35 }
 0x255   :  { %v389_v52 = vmul.f32 %v380_v51, %v353_v49 }
 0x256   :  { %v3827_v53 = vpop.eup %3826 }
 0x257   :  { %3241 = vmatmul.mubr.msk.f32.gmra.mrb[6].mxu1 %vm205_vm1, %v389_v52  ;;  %v381_v55 = vadd.f32 1.0, %v3827_v53 }
 0x258   :  { %3243 = vmatprep.mubr.msk.f32.mxu1 %vm4011_vm2, %v4012_v35 }
 0x259   :  { %v390_v56 = vmul.f32 %v381_v55, %v354_v54 }
 0x25b   :  { %3244 = vmatmul.mubr.msk.f32.gmra.mrb[8].mxu1 %vm205_vm1, %v390_v56 }
 0x25c   :  { %3246 = vmatprep.mubr.msk.f32.mxu1 %vm4011_vm2, %v4012_v35 }
 0x31e   :  { %v495_v58 = vpop.f32.mrb[0].mxu1 }
 0x31f   :  { %v496_v59 = vadd.f32 %v3021_v57, %v495_v58  ;;  %v3233_v60 = vpop.f32.mrb[1].mxu1 }
 0x321   :  { %541 = vadd.xlane.f32.xlu0 %v496_v59 }
 0x322   :  { %v500_v62 = vpop.f32.mrb[2].mxu1 }
 0x323   :  { %v501_v41 = vadd.f32 %v3021_v57, %v500_v62  ;;  %v3236_v63 = vpop.f32.mrb[3].mxu1 }
 0x324   :  { %v712_v63 = vld [vmem:[%s5060_s1 + $0xb0] sm:$0xff] }
 0x325   :  { %543 = vadd.xlane.f32.xlu1 %v501_v41  ;;  %v3608_v4 = vpack.c.bf16 %v713_v1, %v712_v63 }
 0x326   :  { %v505_v5 = vpop.f32.mrb[4].mxu1 }
 0x327   :  { %v506_v7 = vadd.f32 %v3021_v57, %v505_v5  ;;  %v3239_v8 = vpop.f32.mrb[5].mxu1  ;;  %3609 = vmatpush3.bf16.msra.mxu1 %v3608_v4  ;;  %v714_v5 = vld [vmem:[%s5060_s1 + $0xc0] sm:$0xff] }
 0x328   :  { %3610 = vmatprep.subr.bf16.mxu1 %v4010_v0 }
 0x329   :  { %545 = vadd.xlane.f32.xlu0 %v506_v7 }
 0x32a   :  { %v510_v9 = vpop.f32.mrb[6].mxu1 }
 0x32b   :  { %v511_v15 = vadd.f32 %v3021_v57, %v510_v9  ;;  %v3242_v16 = vpop.f32.mrb[7].mxu1  ;;  %v716_v9 = vld [vmem:[%s5060_s1 + $0xd0] sm:$0xff] }
 0x32d   :  { %547 = vadd.xlane.f32.xlu1 %v511_v15 }
 0x32e   :  { %v515_v37 = vpop.f32.mrb[8].mxu1 }
 0x32f   :  { %v516_v22 = vadd.f32 %v3021_v57, %v515_v37  ;;  %v3245_v13 = vpop.f32.mrb[9].mxu1 }
 0x331   :  { %549 = vadd.xlane.f32.xlu0 %v516_v22  ;;  %277 = vadd.xlane.f32.xlu1 %v276_v25 }
 0x335   :  { %280 = vadd.xlane.f32.xlu0 %v279_v26  ;;  %283 = vadd.xlane.f32.xlu1 %v282_v27  ;;  %v3617_v27 = vpack.c.bf16 %v719_v46, %v718_v42  ;;  %v4413_v46 = vld [vmem:[%s5060_s1 + $0x1f2] ss:$0 sm:$0xff] }
 0x339   :  { %286 = vadd.xlane.f32.xlu0 %v285_v50 }
 0x3ae   :  { %v542_v29 = vpop.xlane.xlu0 %541 }
 0x3af   :  { %v560_v30 = vmul.f32 0.0078125, %v542_v29  ;;  %v720_v29 = vld [vmem:[%s5060_s1 + $0xf0] sm:$0xff] }
 0x3b1   :  { %v4304_v31 = vsub.f32 %v496_v59, %v560_v30  ;;  %v721_v30 = vld [vmem:[%s5060_s1 + $0xf8] sm:$0xff] }
 0x3b2   :  { %v544_v32 = vpop.xlane.xlu1 %543 }
 0x3b3   :  { %v561_v33 = vmul.f32 0.0078125, %v544_v32  ;;  %v578_v23 = vmul.f32 %v4304_v31, %v4304_v31 }
 0x3b5   :  { %587 = vadd.xlane.f32.xlu1 %v578_v23  ;;  %v4308_v34 = vsub.f32 %v501_v41, %v561_v33  ;;  %v722_v23 = vld [vmem:[%s5060_s1 + $0x100] sm:$0xff] }
 0x3b6   :  { %v546_v36 = vpop.xlane.xlu0 %545 }
 0x3b7   :  { %v562_v38 = vmul.f32 0.0078125, %v546_v36  ;;  %v579_v39 = vmul.f32 %v4308_v34, %v4308_v34  ;;  %v723_v36 = vld [vmem:[%s5060_s1 + $0x108] sm:$0xff] }
 0x3b9   :  { %589 = vadd.xlane.f32.xlu0 %v579_v39  ;;  %v4312_v40 = vsub.f32 %v506_v7, %v562_v38  ;;  %v715_v7 = vld [vmem:[%s5060_s1 + $0xc8] sm:$0xff] }
 0x3ba   :  { %v548_v28 = vpop.xlane.xlu1 %547  ;;  %v3611_v11 = vpack.c.bf16 %v715_v7, %v714_v5 }
 0x3bb   :  { %v563_v43 = vmul.f32 0.0078125, %v548_v28  ;;  %v580_v44 = vmul.f32 %v4312_v40, %v4312_v40  ;;  %v3623_v28 = vpack.c.bf16 %v723_v36, %v722_v23 }
 0x3bc   :  { %3612 = vmatpush3.bf16.msra.mxu1 %v3611_v11 }
 0x3bd   :  { %591 = vadd.xlane.f32.xlu1 %v580_v44  ;;  %v4316_v45 = vsub.f32 %v511_v15, %v563_v43  ;;  %3613 = vmatprep.subr.bf16.mxu1 %v4010_v0  ;;  %v717_v15 = vld [vmem:[%s5060_s1 + $0xd8] sm:$0xff] }
 0x3be   :  { %v550_v47 = vpop.xlane.xlu0 %549  ;;  %v278_v48 = vpop.xlane.xlu1 %277  ;;  %v3614_v20 = vpack.c.bf16 %v717_v15, %v716_v9  ;;  %v725_v44 = vld [vmem:[%s5060_s1 + $0x118] sm:$0xff] }
 0x3bf   :  { %v564_v49 = vmul.f32 0.0078125, %v550_v47  ;;  %v293_v51 = vmul.f32 0.0625, %v278_v48  ;;  %v581_v52 = vmul.f32 %v4316_v45, %v4316_v45 }
 0x3c0   :  { %3615 = vmatpush3.bf16.msra.mxu1 %v3614_v20 }
 0x3c1   :  { %v302_v53 = vadd.f32 1e-05, %v293_v51  ;;  %593 = vadd.xlane.f32.xlu0 %v581_v52  ;;  %v4320_v54 = vsub.f32 %v516_v22, %v564_v49  ;;  %3616 = vmatprep.subr.bf16.mxu1 %v4010_v0  ;;  %v727_v49 = vld [vmem:[%s5060_s1 + $0x128] sm:$0xff] }
 0x3c2   :  { %v281_v55 = vpop.xlane.xlu0 %280  ;;  %v284_v56 = vpop.xlane.xlu1 %283 }
 0x3c3   :  { %3828 = vrsqrt.f32 %v302_v53  ;;  %v294_v57 = vmul.f32 0.0625, %v281_v55  ;;  %v295_v58 = vmul.f32 0.0625, %v284_v56  ;;  %v582_v59 = vmul.f32 %v4320_v54, %v4320_v54 }
 0x3c4   :  { %3618 = vmatpush3.bf16.msra.mxu1 %v3617_v27 }
 0x3c5   :  { %v303_v60 = vadd.f32 1e-05, %v294_v57  ;;  %v304_v61 = vadd.f32 1e-05, %v295_v58  ;;  %595 = vadd.xlane.f32.xlu1 %v582_v59  ;;  %3619 = vmatprep.subr.bf16.mxu1 %v4010_v0 }
 0x3c6   :  { %v287_v62 = vpop.xlane.xlu0 %286 }
 0x3c7   :  { %3830 = vrsqrt.f32 %v303_v60  ;;  %v296_v41 = vmul.f32 0.0625, %v287_v62 }
 0x3c8   :  { %3832 = vrsqrt.f32 %v304_v61 }
 0x3c9   :  { %v305_v3 = vadd.f32 1e-05, %v296_v41 }
 0x3cb   :  { %3834 = vrsqrt.f32 %v305_v3 }
 0x3cd   :  { %v3829_v8 = vpop.eup %3828 }
 0x3ce   :  { %v320_v12 = vmul.f32 %v3829_v8, %v4281_v10 }
 0x3d0   :  { %v333_v14 = vmul.f32 %v4240_v2, %v320_v12 }
 0x3d1   :  { %v3831_v16 = vpop.eup %3830 }
 0x3d2   :  { %v3833_v21 = vpop.eup %3832  ;;  %v321_v37 = vmul.f32 %v3831_v16, %v4284_v17  ;;  %v346_v10 = vadd.f32 %v4246_v6, %v333_v14 }
 0x3d3   :  { %v322_v22 = vmul.f32 %v3833_v21, %v4287_v19 }
 0x3d4   :  { %v364_v13 = vmul.f32 0.70710677, %v346_v10  ;;  %v334_v25 = vmul.f32 %v4240_v2, %v321_v37  ;;  %v355_v51 = vmul.f32 0.5, %v346_v10  ;;  %v4407_v10 = vld [vmem:[%s5060_s1 + $0x1f1] ss:$0 sm:$0xff] }
 0x3d5   :  { %v3835_v26 = vpop.eup %3834  ;;  %v335_v17 = vmul.f32 %v4240_v2, %v322_v22 }
 0x3d6   :  { %v323_v19 = vmul.f32 %v3835_v26, %v4292_v24  ;;  %3836 = verf.f32 %v364_v13  ;;  %v347_v18 = vadd.f32 %v4246_v6, %v334_v25  ;;  %v3620_v24 = vpack.c.bf16 %v721_v30, %v720_v29 }
 0x3d7   :  { %v348_v50 = vadd.f32 %v4246_v6, %v335_v17 }
 0x3d8   :  { %v365_v32 = vmul.f32 0.70710677, %v347_v18  ;;  %v336_v33 = vmul.f32 %v4240_v2, %v323_v19  ;;  %3621 = vmatpush3.bf16.msra.mxu1 %v3620_v24  ;;  %v724_v2 = vld [vmem:[%s5060_s1 + $0x110] sm:$0xff]  ;;  %v356_v58 = vmul.f32 0.5, %v347_v18 }
 0x3d9   :  { %v366_v38 = vmul.f32 0.70710677, %v348_v50  ;;  %3622 = vmatprep.subr.bf16.mxu1 %v4010_v0  ;;  %v3626_v47 = vpack.c.bf16 %v725_v44, %v724_v2  ;;  %v357_v41 = vmul.f32 0.5, %v348_v50 }
 0x3da   :  { %3838 = verf.f32 %v365_v32  ;;  %v349_v39 = vadd.f32 %v4246_v6, %v336_v33  ;;  %v726_v6 = vld [vmem:[%s5060_s1 + $0x120] sm:$0xff] }
 0x3db   :  { %3840 = verf.f32 %v366_v38  ;;  %v3629_v55 = vpack.c.bf16 %v727_v49, %v726_v6 }
 0x3dc   :  { %v367_v43 = vmul.f32 0.70710677, %v349_v39  ;;  %3624 = vmatpush3.bf16.msra.mxu1 %v3623_v28  ;;  %v358_v3 = vmul.f32 0.5, %v349_v39 }
 0x3dd   :  { %3625 = vmatprep.subr.bf16.mxu1 %v4010_v0 }
 0x3de   :  { %3842 = verf.f32 %v367_v43 }
 0x3e0   :  { %v3837_v48 = vpop.eup %3836  ;;  %3627 = vmatpush3.bf16.msra.mxu1 %v3626_v47 }
 0x3e1   :  { %v382_v52 = vadd.f32 1.0, %v3837_v48  ;;  %3628 = vmatprep.subr.bf16.mxu1 %v4010_v0 }
 0x3e3   :  { %v391_v53 = vmul.f32 %v382_v52, %v355_v51 }
 0x3e4   :  { %v3839_v56 = vpop.eup %3838  ;;  %3630 = vmatpush3.bf16.msra.mxu1 %v3629_v55 }
 0x3e5   :  { %v3841_v57 = vpop.eup %3840  ;;  %3247 = vmatmul.mubr.msk.f32.gmra.mrb[10].mxu1 %vm205_vm1, %v391_v53  ;;  %v383_v59 = vadd.f32 1.0, %v3839_v56  ;;  %3763 = vmatprep.subr.bf16.mxu1 %v4010_v0 }
 0x3e6   :  { %3249 = vmatprep.mubr.msk.f32.mxu1 %vm4011_vm2, %v4012_v35  ;;  %v384_v61 = vadd.f32 1.0, %v3841_v57 }
 0x3e7   :  { %v392_v60 = vmul.f32 %v383_v59, %v356_v58 }
 0x3e8   :  { %v3843_v62 = vpop.eup %3842  ;;  %v393_v63 = vmul.f32 %v384_v61, %v357_v41 }
 0x3e9   :  { %3250 = vmatmul.mubr.msk.f32.gmra.mrb[12].mxu1 %vm205_vm1, %v392_v60  ;;  %v385_v1 = vadd.f32 1.0, %v3843_v62 }
 0x3ea   :  { %3252 = vmatprep.mubr.msk.f32.mxu1 %vm4011_vm2, %v4012_v35 }
 0x3eb   :  { %v394_v4 = vmul.f32 %v385_v1, %v358_v3 }
 0x3ed   :  { %3253 = vmatmul.mubr.msk.f32.gmra.mrb[14].mxu1 %vm205_vm1, %v393_v63 }
 0x3ee   :  { %3255 = vmatprep.mubr.msk.f32.mxu1 %vm4011_vm2, %v4012_v35 }
 0x3f1   :  { %3256 = vmatmul.mubr.msk.f32.gmra.mrb[16].mxu1 %vm205_vm1, %v394_v4 }
 0x3f2   :  { %3290 = vmatprep.mubr.msk.f32.mxu1 %vm4011_vm2, %v4012_v35 }
 0x442   :  { %v588_v5 = vpop.xlane.xlu1 %587 }
 0x443   :  { %v605_v7 = vmul.f32 0.0078125, %v588_v5 }
 0x445   :  { %v614_v8 = vadd.f32 1e-05, %v605_v7 }
 0x446   :  { %v590_v11 = vpop.xlane.xlu0 %589 }
 0x447   :  { %3844 = vrsqrt.f32 %v614_v8  ;;  %v606_v12 = vmul.f32 0.0078125, %v590_v11 }
 0x449   :  { %v615_v14 = vadd.f32 1e-05, %v606_v12 }
 0x44a   :  { %v592_v9 = vpop.xlane.xlu1 %591 }
 0x44b   :  { %3846 = vrsqrt.f32 %v615_v14  ;;  %v607_v15 = vmul.f32 0.0078125, %v592_v9 }
 0x44d   :  { %v616_v16 = vadd.f32 1e-05, %v607_v15 }
 0x44e   :  { %v594_v20 = vpop.xlane.xlu0 %593 }
 0x44f   :  { %3848 = vrsqrt.f32 %v616_v16  ;;  %v608_v21 = vmul.f32 0.0078125, %v594_v20  ;;  %v4450_v16 = vld [vmem:[%s5060_s1 + $0x1f3] ss:$0 sm:$0xff] }
 0x451   :  { %v3845_v37 = vpop.eup %3844  ;;  %v617_v22 = vadd.f32 1e-05, %v608_v21 }
 0x452   :  { %v632_v13 = vmul.f32 %v3845_v37, %v4304_v31  ;;  %v596_v25 = vpop.xlane.xlu1 %595 }
 0x453   :  { %3850 = vrsqrt.f32 %v617_v22  ;;  %v609_v42 = vmul.f32 0.0078125, %v596_v25 }
 0x454   :  { %v645_v26 = vmul.f32 %v4407_v10, %v632_v13 }
 0x455   :  { %v3847_v17 = vpop.eup %3846  ;;  %v618_v27 = vadd.f32 1e-05, %v609_v42 }
 0x456   :  { %v658_v19 = vadd.f32 %v4413_v46, %v645_v26  ;;  %v633_v18 = vmul.f32 %v3847_v17, %v4308_v34 }
 0x457   :  { %3852 = vrsqrt.f32 %v618_v27 }
 0x458   :  { %v676_v50 = vmul.f32 0.70710677, %v658_v19  ;;  %v646_v31 = vmul.f32 %v4407_v10, %v633_v18  ;;  %v667_v48 = vmul.f32 0.5, %v658_v19 }
 0x459   :  { %v3849_v29 = vpop.eup %3848 }
 0x45a   :  { %3854 = verf.f32 %v676_v50  ;;  %v659_v30 = vadd.f32 %v4413_v46, %v646_v31  ;;  %v634_v32 = vmul.f32 %v3849_v29, %v4312_v40 }
 0x45c   :  { %v677_v33 = vmul.f32 0.70710677, %v659_v30  ;;  %v647_v24 = vmul.f32 %v4407_v10, %v634_v32  ;;  %v668_v53 = vmul.f32 0.5, %v659_v30 }
 0x45d   :  { %v3851_v23 = vpop.eup %3850 }
 0x45e   :  { %3856 = verf.f32 %v677_v33  ;;  %v660_v36 = vadd.f32 %v4413_v46, %v647_v24  ;;  %v635_v38 = vmul.f32 %v3851_v23, %v4316_v45 }
 0x460   :  { %v678_v34 = vmul.f32 0.70710677, %v660_v36  ;;  %v648_v39 = vmul.f32 %v4407_v10, %v635_v38  ;;  %v669_v57 = vmul.f32 0.5, %v660_v36 }
 0x461   :  { %v3853_v28 = vpop.eup %3852 }
 0x462   :  { %3858 = verf.f32 %v678_v34  ;;  %v661_v43 = vadd.f32 %v4413_v46, %v648_v39  ;;  %v636_v2 = vmul.f32 %v3853_v28, %v4320_v54 }
 0x464   :  { %v3855_v44 = vpop.eup %3854  ;;  %v679_v40 = vmul.f32 0.70710677, %v661_v43  ;;  %v649_v47 = vmul.f32 %v4407_v10, %v636_v2  ;;  %v670_v61 = vmul.f32 0.5, %v661_v43 }
 0x465   :  { %v694_v6 = vadd.f32 1.0, %v3855_v44 }
 0x466   :  { %3860 = verf.f32 %v679_v40  ;;  %v662_v49 = vadd.f32 %v4413_v46, %v649_v47 }
 0x467   :  { %v703_v51 = vmul.f32 %v694_v6, %v667_v48 }
 0x468   :  { %v3857_v45 = vpop.eup %3856  ;;  %v680_v52 = vmul.f32 0.70710677, %v662_v49  ;;  %v671_v1 = vmul.f32 0.5, %v662_v49 }
 0x469   :  { %3291 = vmatmul.mubr.f32.vlgmr.msra.gmra.mrb[18].mxu1 %v703_v51  ;;  %v695_v55 = vadd.f32 1.0, %v3857_v45 }
 0x46a   :  { %3293 = vmatprep.mubr.msk.f32.mxu1 %vm4011_vm2, %v4012_v35  ;;  %3862 = verf.f32 %v680_v52  ;;  %v1015_v52 = vld [vmem:[%s5060_s1 + $0x130] sm:$0xff] }
 0x46b   :  { %v704_v54 = vmul.f32 %v695_v55, %v668_v53  ;;  %v1016_v53 = vld [vmem:[%s5060_s1 + $0x138] sm:$0xff] }
 0x46c   :  { %v3859_v56 = vpop.eup %3858  ;;  %v3632_v55 = vpack.c.bf16 %v1016_v53, %v1015_v52 }
 0x46d   :  { %3294 = vmatmul.mubr.f32.gmra.mrb[20].mxu1 %v704_v54  ;;  %v696_v58 = vadd.f32 1.0, %v3859_v56  ;;  %v1017_v54 = vld [vmem:[%s5060_s1 + $0x140] sm:$0xff]  ;;  %v1018_v56 = vld [vmem:[%s5060_s1 + $0x148] sm:$0xff] }
 0x46e   :  { %3296 = vmatprep.mubr.msk.f32.mxu1 %vm4011_vm2, %v4012_v35  ;;  %3633 = vmatpush3.bf16.msra.mxu0 %v3632_v55 }
 0x46f   :  { %v705_v59 = vmul.f32 %v696_v58, %v669_v57  ;;  %3771 = vmatpush3.bf16.msra.mxu1 %v3632_v55  ;;  %3634 = vmatprep.subr.bf16.mxu0 %v4010_v0  ;;  %v3635_v57 = vpack.c.bf16 %v1018_v56, %v1017_v54  ;;  %v1019_v58 = vld [vmem:[%s5060_s1 + $0x150] sm:$0xff] }
 0x470   :  { %v3861_v60 = vpop.eup %3860  ;;  %3764 = vmatprep.subr.bf16.mxu1 %v4010_v0 }
 0x471   :  { %3297 = vmatmul.mubr.f32.gmra.mrb[22].mxu1 %v705_v59  ;;  %v697_v62 = vadd.f32 1.0, %v3861_v60  ;;  %v1020_v59 = vld [vmem:[%s5060_s1 + $0x158] sm:$0xff] }
 0x472   :  { %3299 = vmatprep.mubr.msk.f32.mxu1 %vm4011_vm2, %v4012_v35  ;;  %3636 = vmatpush3.bf16.msra.mxu0 %v3635_v57  ;;  %v3638_v60 = vpack.c.bf16 %v1020_v59, %v1019_v58 }
 0x473   :  { %v706_v41 = vmul.f32 %v697_v62, %v670_v61  ;;  %3772 = vmatpush3.bf16.msra.mxu1 %v3635_v57  ;;  %3637 = vmatprep.subr.bf16.mxu0 %v4010_v0  ;;  %v1021_v61 = vld [vmem:[%s5060_s1 + $0x160] sm:$0xff]  ;;  %v1022_v62 = vld [vmem:[%s5060_s1 + $0x168] sm:$0xff] }
 0x474   :  { %v3863_v63 = vpop.eup %3862  ;;  %3765 = vmatprep.subr.bf16.mxu1 %v4010_v0 }
 0x475   :  { %3300 = vmatmul.mubr.f32.gmra.mrb[24].mxu1 %v706_v41  ;;  %v698_v3 = vadd.f32 1.0, %v3863_v63  ;;  %v3641_v41 = vpack.c.bf16 %v1022_v62, %v1021_v61  ;;  %v1023_v63 = vld [vmem:[%s5060_s1 + $0x170] sm:$0xff] }
 0x476   :  { %3302 = vmatprep.mubr.msk.f32.mxu1 %vm4011_vm2, %v4012_v35  ;;  %3639 = vmatpush3.bf16.msra.mxu0 %v3638_v60 }
 0x477   :  { %v707_v4 = vmul.f32 %v698_v3, %v671_v1  ;;  %3773 = vmatpush3.bf16.msra.mxu1 %v3638_v60  ;;  %3640 = vmatprep.subr.bf16.mxu0 %v4010_v0  ;;  %v1024_v1 = vld [vmem:[%s5060_s1 + $0x178] sm:$0xff] }
 0x478   :  { %3766 = vmatprep.subr.bf16.mxu1 %v4010_v0  ;;  %v3644_v3 = vpack.c.bf16 %v1024_v1, %v1023_v63 }
 0x479   :  { %3303 = vmatmul.mubr.f32.gmra.mrb[26].mxu1 %v707_v4  ;;  %v1025_v4 = vld [vmem:[%s5060_s1 + $0x180] sm:$0xff] }
 0x47a   :  { %3305 = vmatprep.mubr.msk.f32.mxu1 %vm4011_vm2, %v4012_v35  ;;  %3642 = vmatpush3.bf16.msra.mxu0 %v3641_v41 }
 0x47b   :  { %3774 = vmatpush3.bf16.msra.mxu1 %v3641_v41  ;;  %3643 = vmatprep.subr.bf16.mxu0 %v4010_v0  ;;  %v1147_v41 = vld [vmem:[%s5060_s1 + $0x1b8] sm:$0xff] }
 0x47c   :  { %3767 = vmatprep.subr.bf16.mxu1 %v4010_v0 }
 0x47e   :  { %3645 = vmatpush3.bf16.msra.mxu0 %v3644_v3 }
 0x47f   :  { %3775 = vmatpush3.bf16.msra.mxu1 %v3644_v3  ;;  %3646 = vmatprep.subr.bf16.mxu0 %v4010_v0 }
 0x480   :  { %3768 = vmatprep.subr.bf16.mxu1 %v4010_v0 }
 0x4b8   :  { %v4439_v5 = vpop.f32.mrb[10].mxu1 }
 0x4b9   :  { %v3248_v7 = vpop.f32.mrb[11].mxu1 }
 0x4ba   :  { %v1026_v7 = vld [vmem:[%s5060_s1 + $0x188] sm:$0xff] }
 0x4bc   :  { %v4441_v8 = vpop.f32.mrb[12].mxu1 }
 0x4bd   :  { %v3251_v11 = vpop.f32.mrb[13].mxu1 }
 0x4be   :  { %v3647_v11 = vpack.c.bf16 %v1026_v7, %v1025_v4 }
 0x4c0   :  { %v4443_v12 = vpop.f32.mrb[14].mxu1  ;;  %3648 = vmatpush3.bf16.msra.mxu0 %v3647_v11  ;;  %3776 = vmatpush3.bf16.msra.mxu1 %v3647_v11 }
 0x4c1   :  { %v3254_v14 = vpop.f32.mrb[15].mxu1  ;;  %3649 = vmatprep.subr.bf16.mxu0 %v4010_v0  ;;  %3769 = vmatprep.subr.bf16.mxu1 %v4010_v0 }
 0x4c2   :  { %v1027_v14 = vld [vmem:[%s5060_s1 + $0x190] sm:$0xff] }
 0x4c4   :  { %v4445_v9 = vpop.f32.mrb[16].mxu1 }
 0x4c5   :  { %v3257_v15 = vpop.f32.mrb[17].mxu1 }
 0x4c6   :  { %v1028_v15 = vld [vmem:[%s5060_s1 + $0x198] sm:$0xff] }
 0x53c   :  { %v799_v20 = vpop.f32.mrb[18].mxu1 }
 0x53d   :  { %v800_v21 = vadd.f32 %v4450_v16, %v799_v20  ;;  %v3292_v37 = vpop.f32.mrb[19].mxu1  ;;  %v3650_v20 = vpack.c.bf16 %v1028_v15, %v1027_v14  ;;  %v1148_v14 = vld [vmem:[%s5060_s1 + $0x1c0] sm:$0xff]  ;;  %v1149_v15 = vld [vmem:[%s5060_s1 + $0x1c8] sm:$0xff] }
 0x53e   :  { %v1030_v37 = vld [vmem:[%s5060_s1 + $0x1a8] sm:$0xff] }
 0x53f   :  { %845 = vadd.xlane.f32.xlu0 %v800_v21  ;;  %3651 = vmatpush3.bf16.msra.mxu0 %v3650_v20 }
 0x540   :  { %v804_v22 = vpop.f32.mrb[20].mxu1  ;;  %3777 = vmatpush3.bf16.msra.mxu1 %v3650_v20  ;;  %3652 = vmatprep.subr.bf16.mxu0 %v4010_v0 }
 0x541   :  { %v805_v13 = vadd.f32 %v4450_v16, %v804_v22  ;;  %v3295_v25 = vpop.f32.mrb[21].mxu1  ;;  %3770 = vmatprep.subr.bf16.mxu1 %v4010_v0 }
 0x543   :  { %847 = vadd.xlane.f32.xlu1 %v805_v13 }
 0x544   :  { %v809_v42 = vpop.f32.mrb[22].mxu1 }
 0x545   :  { %v810_v26 = vadd.f32 %v4450_v16, %v809_v42  ;;  %v3298_v17 = vpop.f32.mrb[23].mxu1 }
 0x547   :  { %849 = vadd.xlane.f32.xlu0 %v810_v26 }
 0x548   :  { %v814_v27 = vpop.f32.mrb[24].mxu1 }
 0x549   :  { %v815_v19 = vadd.f32 %v4450_v16, %v814_v27  ;;  %v3301_v18 = vpop.f32.mrb[25].mxu1 }
 0x54b   :  { %851 = vadd.xlane.f32.xlu1 %v815_v19 }
 0x54c   :  { %v819_v50 = vpop.f32.mrb[26].mxu1 }
 0x54d   :  { %v820_v31 = vadd.f32 %v4450_v16, %v819_v50  ;;  %v3304_v29 = vpop.f32.mrb[27].mxu1 }
 0x54f   :  { %853 = vadd.xlane.f32.xlu0 %v820_v31 }
 0x5cc   :  { %v846_v30 = vpop.xlane.xlu0 %845 }
 0x5cd   :  { %v863_v32 = vmul.f32 0.0078125, %v846_v30 }
 0x5cf   :  { %v4457_v33 = vsub.f32 %v800_v21, %v863_v32  ;;  %v1029_v21 = vld [vmem:[%s5060_s1 + $0x1a0] sm:$0xff] }
 0x5d0   :  { %v848_v24 = vpop.xlane.xlu1 %847  ;;  %v3653_v22 = vpack.c.bf16 %v1030_v37, %v1029_v21 }
 0x5d1   :  { %v864_v23 = vmul.f32 0.0078125, %v848_v24  ;;  %v881_v36 = vmul.f32 %v4457_v33, %v4457_v33  ;;  %v4548_v24 = vld [vmem:[%s5060_s1 + $0x1f4] ss:$0 sm:$0xff] }
 0x5d2   :  { %3654 = vmatpush3.bf16.msra.mxu0 %v3653_v22  ;;  %3778 = vmatpush3.bf16.msra.mxu1 %v3653_v22 }
 0x5d3   :  { %890 = vadd.xlane.f32.xlu1 %v881_v36  ;;  %v4461_v38 = vsub.f32 %v805_v13, %v864_v23  ;;  %3655 = vmatprep.subr.bf16.mxu0 %v4010_v0  ;;  %v30_v13 = vld [vmem:[%s5061_s0 + $0xa0] sm:$0xff] }
 0x5d4   :  { %v850_v34 = vpop.xlane.xlu0 %849  ;;  %3661 = vmatprep.subr.bf16.mxu1 %v4010_v0 }
 0x5d5   :  { %v865_v39 = vmul.f32 0.0078125, %v850_v34  ;;  %v882_v28 = vmul.f32 %v4461_v38, %v4461_v38 }
 0x5d7   :  { %v4465_v43 = vsub.f32 %v810_v26, %v865_v39  ;;  %892 = vadd.xlane.f32.xlu0 %v882_v28  ;;  %v4554_v28 = vld [vmem:[%s5060_s1 + $0x1f5] ss:$0 sm:$0xff] }
 0x5d8   :  { %v852_v2 = vpop.xlane.xlu1 %851 }
 0x5d9   :  { %v866_v44 = vmul.f32 0.0078125, %v852_v2  ;;  %v883_v40 = vmul.f32 %v4465_v43, %v4465_v43 }
 0x5db   :  { %894 = vadd.xlane.f32.xlu1 %v883_v40  ;;  %v4469_v47 = vsub.f32 %v815_v19, %v866_v44 }
 0x5dc   :  { %v854_v48 = vpop.xlane.xlu0 %853 }
 0x5dd   :  { %v867_v6 = vmul.f32 0.0078125, %v854_v48  ;;  %v884_v49 = vmul.f32 %v4469_v47, %v4469_v47 }
 0x5df   :  { %v4473_v51 = vsub.f32 %v820_v31, %v867_v6  ;;  %896 = vadd.xlane.f32.xlu0 %v884_v49 }
 0x5e1   :  { %v885_v45 = vmul.f32 %v4473_v51, %v4473_v51 }
 0x5e3   :  { %898 = vadd.xlane.f32.xlu1 %v885_v45 }
 0x5f4   :  { %1240 = vrot.lane.b32.xlu1 %v30_v13, %s4013_s29  ;;  %v4587_v13 = vpack.c.bf16 %v1149_v15, %v1148_v14 }
 0x660   :  { %v891_v25 = vpop.xlane.xlu1 %890 }
 0x661   :  { %v908_v42 = vmul.f32 0.0078125, %v891_v25 }
 0x663   :  { %v917_v26 = vadd.f32 1e-05, %v908_v42 }
 0x664   :  { %v893_v17 = vpop.xlane.xlu0 %892 }
 0x665   :  { %3864 = vrsqrt.f32 %v917_v26  ;;  %v909_v27 = vmul.f32 0.0078125, %v893_v17 }
 0x667   :  { %v918_v19 = vadd.f32 1e-05, %v909_v27 }
 0x668   :  { %v895_v18 = vpop.xlane.xlu1 %894 }
 0x669   :  { %3866 = vrsqrt.f32 %v918_v19  ;;  %v910_v50 = vmul.f32 0.0078125, %v895_v18 }
 0x66b   :  { %v919_v31 = vadd.f32 1e-05, %v910_v50 }
 0x66c   :  { %v897_v29 = vpop.xlane.xlu0 %896 }
 0x66d   :  { %3868 = vrsqrt.f32 %v919_v31  ;;  %v911_v30 = vmul.f32 0.0078125, %v897_v29 }
 0x66f   :  { %v3865_v32 = vpop.eup %3864  ;;  %v920_v23 = vadd.f32 1e-05, %v911_v30 }
 0x670   :  { %v935_v36 = vmul.f32 %v3865_v32, %v4457_v33  ;;  %v899_v34 = vpop.xlane.xlu1 %898 }
 0x671   :  { %3870 = vrsqrt.f32 %v920_v23  ;;  %v912_v39 = vmul.f32 0.0078125, %v899_v34  ;;  %v4613_v34 = vld [vmem:[%s5060_s1 + $0x1f6] ss:$0 sm:$0xff] }
 0x672   :  { %v948_v2 = vmul.f32 %v4548_v24, %v935_v36  ;;  %v29_v36 = vld [vmem:[%s5061_s0 + $0x90] sm:$0xff]  ;;  %s4014_s0 = smov 64  }
 0x673   :  { %v3867_v44 = vpop.eup %3866  ;;  %v921_v40 = vadd.f32 1e-05, %v912_v39 }
 0x674   :  { %v961_v48 = vadd.f32 %v4554_v28, %v948_v2  ;;  %v936_v6 = vmul.f32 %v3867_v44, %v4461_v38 }
 0x675   :  { %3872 = vrsqrt.f32 %v921_v40 }
 0x676   :  { %v979_v49 = vmul.f32 0.70710677, %v961_v48  ;;  %v949_v33 = vmul.f32 %v4548_v24, %v936_v6  ;;  %v970_v3 = vmul.f32 0.5, %v961_v48 }
 0x677   :  { %v3869_v45 = vpop.eup %3868 }
 0x678   :  { %3874 = verf.f32 %v979_v49  ;;  %v962_v52 = vadd.f32 %v4554_v28, %v949_v33  ;;  %v937_v53 = vmul.f32 %v3869_v45, %v4465_v43  ;;  %v1146_v43 = vld [vmem:[%s5060_s1 + $0x1b0] sm:$0xff] }
 0x679   :  { %v4575_v7 = vpack.c.bf16 %v1147_v41, %v1146_v43 }
 0x67a   :  { %v980_v55 = vmul.f32 0.70710677, %v962_v52  ;;  %v950_v54 = vmul.f32 %v4548_v24, %v937_v53  ;;  %v971_v37 = vmul.f32 0.5, %v962_v52 }
 0x67b   :  { %v3871_v56 = vpop.eup %3870 }
 0x67c   :  { %3876 = verf.f32 %v980_v55  ;;  %v963_v57 = vadd.f32 %v4554_v28, %v950_v54  ;;  %v938_v58 = vmul.f32 %v3871_v56, %v4469_v47  ;;  %v1241_v55 = vpop.permute.xlu1 %1240 }
 0x67e   :  { %v981_v38 = vmul.f32 0.70710677, %v963_v57  ;;  %v951_v59 = vmul.f32 %v4548_v24, %v938_v58  ;;  %v972_v26 = vmul.f32 0.5, %v963_v57 }
 0x67f   :  { %v3873_v60 = vpop.eup %3872 }
 0x680   :  { %3878 = verf.f32 %v981_v38  ;;  %v964_v61 = vadd.f32 %v4554_v28, %v951_v59  ;;  %v939_v62 = vmul.f32 %v3873_v60, %v4473_v51 }
 0x682   :  { %v3875_v63 = vpop.eup %3874  ;;  %v982_v1 = vmul.f32 0.70710677, %v964_v61  ;;  %v952_v47 = vmul.f32 %v4548_v24, %v939_v62  ;;  %v973_v18 = vmul.f32 0.5, %v964_v61 }
 0x683   :  { %v997_v4 = vadd.f32 1.0, %v3875_v63 }
 0x684   :  { %3880 = verf.f32 %v982_v1  ;;  %v965_v11 = vadd.f32 %v4554_v28, %v952_v47 }
 0x685   :  { %v1006_v51 = vmul.f32 %v997_v4, %v970_v3 }
 0x686   :  { %v3877_v20 = vpop.eup %3876  ;;  %v983_v21 = vmul.f32 0.70710677, %v965_v11  ;;  %v974_v30 = vmul.f32 0.5, %v965_v11 }
 0x687   :  { %3350 = vmatmul.mubr.f32.vlgmr.msra.gmra.mrb[18].mxu0 %v1006_v51  ;;  %v998_v22 = vadd.f32 1.0, %v3877_v20 }
 0x688   :  { %3657 = vmatpush3.bf16.msra.mxu0 %v4575_v7  ;;  %3352 = vmatprep.mubr.msk.f32.mxu0 %vm4011_vm2, %v4012_v35  ;;  %3882 = verf.f32 %v983_v21 }
 0x689   :  { %v1007_v25 = vmul.f32 %v998_v22, %v971_v37  ;;  %3658 = vmatprep.subr.bf16.mxu0 %v4010_v0 }
 0x68a   :  { %v3879_v42 = vpop.eup %3878 }
 0x68b   :  { %3353 = vmatmul.mubr.f32.gmra.mrb[20].mxu0 %v1007_v25  ;;  %v999_v17 = vadd.f32 1.0, %v3879_v42 }
 0x68c   :  { %3355 = vmatprep.mubr.msk.f32.mxu0 %vm4011_vm2, %v4012_v35  ;;  %3660 = vmatpush3.bf16.msra.mxu0 %v4587_v13 }
 0x68d   :  { %v1008_v27 = vmul.f32 %v999_v17, %v972_v26  ;;  %3667 = vmatprep.subr.bf16.mxu0 %v4010_v0 }
 0x68e   :  { %v3881_v19 = vpop.eup %3880 }
 0x68f   :  { %3356 = vmatmul.mubr.f32.gmra.mrb[22].mxu0 %v1008_v27  ;;  %v1000_v50 = vadd.f32 1.0, %v3881_v19 }
 0x690   :  { %3358 = vmatprep.mubr.msk.f32.mxu0 %vm4011_vm2, %v4012_v35 }
 0x691   :  { %v1009_v31 = vmul.f32 %v1000_v50, %v973_v18 }
 0x692   :  { %v3883_v29 = vpop.eup %3882 }
 0x693   :  { %3359 = vmatmul.mubr.f32.gmra.mrb[24].mxu0 %v1009_v31  ;;  %v1001_v32 = vadd.f32 1.0, %v3883_v29 }
 0x694   :  { %3361 = vmatprep.mubr.msk.f32.mxu0 %vm4011_vm2, %v4012_v35 }
 0x695   :  { %v1010_v23 = vmul.f32 %v1001_v32, %v974_v30 }
 0x697   :  { %3362 = vmatmul.mubr.f32.gmra.mrb[26].mxu0 %v1010_v23 }
 0x698   :  { %3384 = vmatprep.mubr.msk.f32.mxu0 %vm4011_vm2, %v4012_v35 }
 0x69b   :  { %3385 = vmatmul.mubr.msk.f32.vlgmr.msra.gmra.mrb[18].mxu0 %vm51_vm0, %v29_v36 }
 0x69c   :  { %3669 = vmatpush3.bf16.msra.mxu0 %v4575_v7  ;;  %3406 = vmatprep.mubr.msk.f32.mxu0 %vm4011_vm2, %v4012_v35 }
 0x69d   :  { %3670 = vmatprep.subr.bf16.mxu0 %v4010_v0 }
 0x6a0   :  { %3672 = vmatpush3.bf16.msra.mxu0 %v4587_v13 }
 0x6a1   :  { %3679 = vmatprep.subr.bf16.mxu0 %v4010_v0 }
 0x76e   :  { %v1226_v39 = vpop.f32.mrb[18].mxu0 }
 0x76f   :  { %v3779_v2 = vadd.f32 %v4613_v34, %v1226_v39  ;;  %v3386_v44 = vpop.f32.mrb[19].mxu0 }
 0x771   :  { %v3038_v40 = vmul.f32 -1.442695, %v3779_v2 }
 0x773   :  { %3884 = vpow2.f32 %v3038_v40 }
 0x77d   :  { %v3885_v48 = vpop.eup %3884 }
 0x77e   :  { %v1234_v6 = vadd.f32 1.0, %v3885_v48 }
 0x780   :  { %3886 = vrcp.f32 %v1234_v6 }
 0x78a   :  { %v3887_v49 = vpop.eup %3886 }
 0x78b   :  { %v1237_v33 = vmul.f32 2.0, %v3887_v49  ;;  %v1243_v54 = vmul.f32 %v3887_v49, %v1241_v55 }
 0x78d   :  { %v3039_v45 = vadd.f32 -1.0, %v1237_v33 }
 0x78f   :  { %1245 = vrot.lane.b32.xlu0 %v3039_v45, %s4014_s0 }
 0x801   :  { %v1246_v52 = vpop.permute.xlu0 %1245 }
 0x802   :  { %v1248_v53 = vmul.f32 %v3887_v49, %v1246_v52 }
 0x804   :  { %1250 = vrot.lane.b32.xlu1 %v1248_v53, %s4013_s29 }
 0x876   :  { %v1251_v56 = vpop.permute.xlu1 %1250 }
 0x877   :  { %v1253_v57 = vadd.f32 %v1251_v56, %v1243_v54 }
 0x879   :  { %3888 = vtanh.f32 %v1253_v57 }
 0x883   :  { %v3889_v58 = vpop.eup %3888 }
 0x884   :  { %1256 = vrot.lane.b32.xlu1 %v3889_v58, %s4014_s0 }
 0x8f6   :  { %v1257_v38 = vpop.permute.xlu1 %1256 }
 0x8f7   :  { %v4619_v59 = vmul.f32 %v3887_v49, %v1257_v38  ;;  %v4006_v38 = vld [vmem:[%s5060_s1 + $0x1f0] ss:$0 sm:$0xff] }
 0x8f9   :  { %1261 = vrot.lane.b32.xlu0 %v4619_v59, %s4013_s29 }
 0x96b   :  { %v4623_v60 = vpop.permute.xlu0 %1261 }
 0x96c   :  { %3407 = vmatmul.mubr.msk.f32.vlgmr.msra.gmra.mrb[20].mxu0 %vm51_vm0, %v4623_v60 }
 0x96d   :  { %3681 = vmatpush3.bf16.msra.mxu0 %v4575_v7  ;;  %3428 = vmatprep.mubr.msk.f32.mxu0 %vm4011_vm2, %v4012_v35 }
 0x96e   :  { %3682 = vmatprep.subr.bf16.mxu0 %v4010_v0 }
 0x971   :  { %3684 = vmatpush3.bf16.msra.mxu0 %v4587_v13 }
 0x972   :  { %3691 = vmatprep.subr.bf16.mxu0 %v4010_v0 }
 0xa3f   :  { %v1453_v61 = vpop.f32.mrb[20].mxu0 }
 0xa40   :  { %v3780_v62 = vadd.f32 %v4613_v34, %v1453_v61  ;;  %v3408_v43 = vpop.f32.mrb[21].mxu0  ;;  %v521_v61 = vadd.f32 %v4006_v38, %v4439_v5 }
 0xa42   :  { %v3045_v41 = vmul.f32 -1.442695, %v3780_v62 }
 0xa44   :  { %3890 = vpow2.f32 %v3045_v41 }
 0xa4e   :  { %v3891_v63 = vpop.eup %3890 }
 0xa4f   :  { %v1461_v1 = vadd.f32 1.0, %v3891_v63 }
 0xa51   :  { %3892 = vrcp.f32 %v1461_v1 }
 0xa5b   :  { %v3893_v47 = vpop.eup %3892 }
 0xa5c   :  { %v1464_v3 = vmul.f32 2.0, %v3893_v47  ;;  %v1466_v14 = vmul.f32 %v3893_v47, %v1253_v57 }
 0xa5e   :  { %v3046_v4 = vadd.f32 -1.0, %v1464_v3 }
 0xa60   :  { %1468 = vrot.lane.b32.xlu1 %v3046_v4, %s4014_s0 }
 0xad2   :  { %v1469_v11 = vpop.permute.xlu1 %1468 }
 0xad3   :  { %v1471_v51 = vmul.f32 %v3893_v47, %v1469_v11 }
 0xad5   :  { %1473 = vrot.lane.b32.xlu0 %v1471_v51, %s4013_s29  ;;  %v526_v51 = vadd.f32 %v4006_v38, %v4441_v8 }
 0xb47   :  { %v1474_v15 = vpop.permute.xlu0 %1473 }
 0xb48   :  { %v1476_v20 = vadd.f32 %v1474_v15, %v1466_v14  ;;  %v531_v14 = vadd.f32 %v4006_v38, %v4443_v12  ;;  %v536_v15 = vadd.f32 %v4006_v38, %v4445_v9 }
 0xb4a   :  { %3894 = vtanh.f32 %v1476_v20 }
 0xb54   :  { %v3895_v21 = vpop.eup %3894 }
 0xb55   :  { %1479 = vrot.lane.b32.xlu1 %v3895_v21, %s4014_s0 }
 0xbc7   :  { %v1480_v37 = vpop.permute.xlu1 %1479 }
 0xbc8   :  { %v4637_v22 = vmul.f32 %v3893_v47, %v1480_v37 }
 0xbca   :  { %1484 = vrot.lane.b32.xlu0 %v4637_v22, %s4013_s29 }
 0xc3c   :  { %v4641_v25 = vpop.permute.xlu0 %1484 }
 0xc3d   :  { %3429 = vmatmul.mubr.msk.f32.vlgmr.msra.gmra.mrb[22].mxu0 %vm51_vm0, %v4641_v25 }
 0xc3e   :  { %3693 = vmatpush3.bf16.msra.mxu0 %v4575_v7  ;;  %3450 = vmatprep.mubr.msk.f32.mxu0 %vm4011_vm2, %v4012_v35 }
 0xc3f   :  { %3694 = vmatprep.subr.bf16.mxu0 %v4010_v0 }
 0xc42   :  { %3696 = vmatpush3.bf16.msra.mxu0 %v4587_v13 }
 0xc43   :  { %3703 = vmatprep.subr.bf16.mxu0 %v4010_v0 }
 0xd10   :  { %v1655_v42 = vpop.f32.mrb[22].mxu0 }
 0xd11   :  { %v3781_v26 = vadd.f32 %v4613_v34, %v1655_v42  ;;  %v3430_v17 = vpop.f32.mrb[23].mxu0 }
 0xd13   :  { %v3049_v27 = vmul.f32 -1.442695, %v3781_v26 }
 0xd15   :  { %3896 = vpow2.f32 %v3049_v27 }
 0xd1f   :  { %v3897_v19 = vpop.eup %3896 }
 0xd20   :  { %v1663_v18 = vadd.f32 1.0, %v3897_v19 }
 0xd22   :  { %3898 = vrcp.f32 %v1663_v18 }
 0xd2c   :  { %v3899_v50 = vpop.eup %3898 }
 0xd2d   :  { %v1666_v31 = vmul.f32 2.0, %v3899_v50  ;;  %v1668_v23 = vmul.f32 %v3899_v50, %v1476_v20 }
 0xd2f   :  { %v3050_v29 = vadd.f32 -1.0, %v1666_v31 }
 0xd31   :  { %1670 = vrot.lane.b32.xlu1 %v3050_v29, %s4014_s0 }
 0xda3   :  { %v1671_v30 = vpop.permute.xlu1 %1670 }
 0xda4   :  { %v1673_v32 = vmul.f32 %v3899_v50, %v1671_v30 }
 0xda6   :  { %1675 = vrot.lane.b32.xlu0 %v1673_v32, %s4013_s29 }
 0xe18   :  { %v1676_v36 = vpop.permute.xlu0 %1675 }
 0xe19   :  { %v1678_v39 = vadd.f32 %v1676_v36, %v1668_v23 }
 0xe1b   :  { %3900 = vtanh.f32 %v1678_v39 }
 0xe25   :  { %v3901_v2 = vpop.eup %3900 }
 0xe26   :  { %1681 = vrot.lane.b32.xlu1 %v3901_v2, %s4014_s0 }
 0xe98   :  { %v1682_v44 = vpop.permute.xlu1 %1681 }
 0xe99   :  { %v4655_v40 = vmul.f32 %v3899_v50, %v1682_v44 }
 0xe9b   :  { %1686 = vrot.lane.b32.xlu0 %v4655_v40, %s4013_s29 }
 0xf0d   :  { %v4659_v48 = vpop.permute.xlu0 %1686 }
 0xf0e   :  { %3451 = vmatmul.mubr.msk.f32.vlgmr.msra.gmra.mrb[24].mxu0 %vm51_vm0, %v4659_v48 }
 0xf0f   :  { %3705 = vmatpush3.bf16.msra.mxu0 %v4575_v7  ;;  %3472 = vmatprep.mubr.msk.f32.mxu0 %vm4011_vm2, %v4012_v35 }
 0xf10   :  { %3706 = vmatprep.subr.bf16.mxu0 %v4010_v0 }
 0xf13   :  { %3708 = vmatpush3.bf16.msra.mxu0 %v4587_v13 }
 0xf14   :  { %3715 = vmatprep.subr.bf16.mxu0 %v4010_v0 }
 0xfe1   :  { %v1857_v6 = vpop.f32.mrb[24].mxu0 }
 0xfe2   :  { %v3782_v49 = vadd.f32 %v4613_v34, %v1857_v6  ;;  %v3452_v33 = vpop.f32.mrb[25].mxu0 }
 0xfe4   :  { %v3053_v45 = vmul.f32 -1.442695, %v3782_v49 }
 0xfe6   :  { %3902 = vpow2.f32 %v3053_v45 }
 0xff0   :  { %v3903_v52 = vpop.eup %3902 }
 0xff1   :  { %v1865_v53 = vadd.f32 1.0, %v3903_v52 }
 0xff3   :  { %3904 = vrcp.f32 %v1865_v53 }
 0xffd   :  { %v3905_v55 = vpop.eup %3904 }
 0xffe   :  { %v1868_v54 = vmul.f32 2.0, %v3905_v55  ;;  %v1870_v62 = vmul.f32 %v3905_v55, %v1678_v39 }
0x1000   :  { %v3054_v56 = vadd.f32 -1.0, %v1868_v54 }
0x1002   :  { %1872 = vrot.lane.b32.xlu1 %v3054_v56, %s4014_s0 }
0x1074   :  { %v1873_v57 = vpop.permute.xlu1 %1872 }
0x1075   :  { %v1875_v58 = vmul.f32 %v3905_v55, %v1873_v57 }
0x1077   :  { %1877 = vrot.lane.b32.xlu0 %v1875_v58, %s4013_s29 }
0x1096   :  { %551 = vadd.xlane.f32.xlu0 %v521_v61 }
0x10e9   :  { %v1878_v43 = vpop.permute.xlu0 %1877 }
0x10ea   :  { %v4676_v41 = vadd.f32 %v1878_v43, %v1870_v62 }
0x10ec   :  { %3906 = vtanh.f32 %v4676_v41 }
0x10f6   :  { %v3907_v63 = vpop.eup %3906 }
0x10f7   :  { %1883 = vrot.lane.b32.xlu1 %v3907_v63, %s4014_s0 }
0x1123   :  { %v552_v3 = vpop.xlane.xlu0 %551 }
0x1124   :  { %v565_v4 = vmul.f32 0.0078125, %v552_v3 }
0x1126   :  { %v574_v11 = vsub.f32 %v521_v61, %v565_v4 }
0x1128   :  { %v583_v5 = vmul.f32 %v574_v11, %v574_v11 }
0x1169   :  { %v1884_v1 = vpop.permute.xlu1 %1883 }
0x116a   :  { %v4680_v47 = vmul.f32 %v3905_v55, %v1884_v1 }
0x116c   :  { %1888 = vrot.lane.b32.xlu1 %v4680_v47, %s4013_s29 }
0x1190   :  { %597 = vadd.xlane.f32.xlu1 %v583_v5 }
0x1194   :  { %553 = vadd.xlane.f32.xlu1 %v526_v51 }
0x1198   :  { %555 = vadd.xlane.f32.xlu1 %v531_v14 }
0x119c   :  { %557 = vadd.xlane.f32.xlu1 %v536_v15 }
0x11de   :  { %v4687_v20 = vpop.permute.xlu1 %1888 }
0x11df   :  { %3473 = vmatmul.mubr.msk.f32.vlgmr.msra.gmra.mrb[26].mxu0 %vm51_vm0, %v4687_v20 }
0x11e0   :  { %3717 = vmatpush3.bf16.msra.mxu0 %v4575_v7  ;;  %3494 = vmatprep.mubr.msk.f32.mxu0 %vm4011_vm2, %v4012_v35 }
0x11e1   :  { %3718 = vmatprep.subr.bf16.mxu0 %v4010_v0 }
0x11e4   :  { %3720 = vmatpush3.bf16.msra.mxu0 %v4587_v13 }
0x11e5   :  { %3727 = vmatprep.subr.bf16.mxu0 %v4010_v0 }
0x121d   :  { %v598_v8 = vpop.xlane.xlu1 %597 }
0x121e   :  { %v610_v12 = vmul.f32 0.0078125, %v598_v8 }
0x1220   :  { %v619_v9 = vadd.f32 1e-05, %v610_v12 }
0x1221   :  { %v554_v6 = vpop.xlane.xlu1 %553 }
0x1222   :  { %3908 = vrsqrt.f32 %v619_v9  ;;  %v566_v58 = vmul.f32 0.0078125, %v554_v6 }
0x1224   :  { %v575_v61 = vsub.f32 %v526_v51, %v566_v58 }
0x1225   :  { %v556_v49 = vpop.xlane.xlu1 %555 }
0x1226   :  { %v567_v33 = vmul.f32 0.0078125, %v556_v49  ;;  %v584_v63 = vmul.f32 %v575_v61, %v575_v61 }
0x1228   :  { %v576_v52 = vsub.f32 %v531_v14, %v567_v33 }
0x1229   :  { %v558_v38 = vpop.xlane.xlu1 %557 }
0x122a   :  { %v585_v54 = vmul.f32 %v576_v52, %v576_v52  ;;  %v568_v62 = vmul.f32 0.0078125, %v558_v38 }
0x122c   :  { %v3909_v21 = vpop.eup %3908  ;;  %v577_v43 = vsub.f32 %v536_v15, %v568_v62 }
0x122d   :  { %v637_v37 = vmul.f32 %v3909_v21, %v574_v11 }
0x122e   :  { %v586_v1 = vmul.f32 %v577_v43, %v577_v43 }
0x122f   :  { %v650_v42 = vmul.f32 %v4407_v10, %v637_v37 }
0x1231   :  { %v663_v26 = vadd.f32 %v4413_v46, %v650_v42 }
0x1233   :  { %v681_v17 = vmul.f32 0.70710677, %v663_v26  ;;  %v672_v19 = vmul.f32 0.5, %v663_v26 }
0x1235   :  { %3910 = verf.f32 %v681_v17 }
0x123f   :  { %v3911_v27 = vpop.eup %3910 }
0x1240   :  { %v699_v18 = vadd.f32 1.0, %v3911_v27 }
0x1242   :  { %v708_v50 = vmul.f32 %v699_v18, %v672_v19 }
0x1244   :  { %3306 = vmatmul.mubr.f32.gmra.mrb[28].mxu1 %v708_v50 }
0x1245   :  { %3308 = vmatprep.mubr.msk.f32.mxu1 %vm4011_vm2, %v4012_v35 }
0x12b2   :  { %v2059_v31 = vpop.f32.mrb[26].mxu0 }
0x12b3   :  { %v3783_v29 = vadd.f32 %v4613_v34, %v2059_v31  ;;  %v3474_v30 = vpop.f32.mrb[27].mxu0 }
0x12b5   :  { %v3057_v32 = vmul.f32 -1.442695, %v3783_v29 }
0x12b7   :  { %3912 = vpow2.f32 %v3057_v32 }
0x12c1   :  { %v3913_v23 = vpop.eup %3912 }
0x12c2   :  { %v2067_v36 = vadd.f32 1.0, %v3913_v23 }
0x12c4   :  { %3914 = vrcp.f32 %v2067_v36 }
0x12ce   :  { %v4702_v39 = vpop.eup %3914 }
0x12cf   :  { %v2070_v2 = vmul.f32 2.0, %v4702_v39  ;;  %v2072_v3 = vmul.f32 %v4702_v39, %v4676_v41 }
0x12d1   :  { %v3058_v44 = vadd.f32 -1.0, %v2070_v2 }
0x12d3   :  { %2074 = vrot.lane.b32.xlu0 %v3058_v44, %s4014_s0 }
0x1317   :  { %v824_v45 = vpop.f32.mrb[28].mxu1 }
0x1318   :  { %v825_v53 = vadd.f32 %v4450_v16, %v824_v45  ;;  %v3307_v55 = vpop.f32.mrb[29].mxu1 }
0x131a   :  { %855 = vadd.xlane.f32.xlu0 %v825_v53 }
0x131e   :  { %601 = vadd.xlane.f32.xlu0 %v585_v54 }
0x1345   :  { %v2075_v56 = vpop.permute.xlu0 %2074 }
0x1346   :  { %v2077_v57 = vmul.f32 %v4702_v39, %v2075_v56 }
0x1348   :  { %2079 = vrot.lane.b32.xlu1 %v2077_v57, %s4013_s29 }
0x136c   :  { %599 = vadd.xlane.f32.xlu1 %v584_v63 }
0x1370   :  { %603 = vadd.xlane.f32.xlu1 %v586_v1 }
0x13a7   :  { %v856_v14 = vpop.xlane.xlu0 %855 }
0x13a8   :  { %v868_v8 = vmul.f32 0.0078125, %v856_v14 }
0x13aa   :  { %v877_v51 = vsub.f32 %v825_v53, %v868_v8 }
0x13ab   :  { %v602_v15 = vpop.xlane.xlu0 %601 }
0x13ac   :  { %v886_v12 = vmul.f32 %v877_v51, %v877_v51  ;;  %v612_v9 = vmul.f32 0.0078125, %v602_v15 }
0x13ae   :  { %v621_v21 = vadd.f32 1e-05, %v612_v9 }
0x13ba   :  { %v2080_v4 = vpop.permute.xlu1 %2079 }
0x13bb   :  { %v4711_v11 = vadd.f32 %v2080_v4, %v2072_v3 }
0x13bd   :  { %3916 = vtanh.f32 %v4711_v11 }
0x13be   :  { %3918 = vrsqrt.f32 %v621_v21 }
0x13c7   :  { %v3917_v5 = vpop.eup %3916 }
0x13c8   :  { %2085 = vrot.lane.b32.xlu0 %v3917_v5, %s4014_s0  ;;  %v3919_v26 = vpop.eup %3918 }
0x13c9   :  { %v639_v18 = vmul.f32 %v3919_v26, %v576_v52 }
0x13cb   :  { %v652_v50 = vmul.f32 %v4407_v10, %v639_v18 }
0x13cd   :  { %v665_v29 = vadd.f32 %v4413_v46, %v652_v50 }
0x13cf   :  { %v683_v36 = vmul.f32 0.70710677, %v665_v29  ;;  %v674_v38 = vmul.f32 0.5, %v665_v29 }
0x13e7   :  { %900 = vadd.xlane.f32.xlu0 %v886_v12 }
0x13f9   :  { %v600_v37 = vpop.xlane.xlu1 %599 }
0x13fa   :  { %v611_v42 = vmul.f32 0.0078125, %v600_v37 }
0x13fc   :  { %v620_v41 = vadd.f32 1e-05, %v611_v42 }
0x13fd   :  { %v604_v17 = vpop.xlane.xlu1 %603 }
0x13fe   :  { %3920 = vrsqrt.f32 %v620_v41  ;;  %v613_v27 = vmul.f32 0.0078125, %v604_v17 }
0x1400   :  { %v622_v19 = vadd.f32 1e-05, %v613_v27 }
0x1402   :  { %3922 = vrsqrt.f32 %v622_v19 }
0x1403   :  { %3924 = verf.f32 %v683_v36 }
0x1408   :  { %v3921_v31 = vpop.eup %3920 }
0x1409   :  { %v638_v30 = vmul.f32 %v3921_v31, %v575_v61 }
0x140b   :  { %v651_v32 = vmul.f32 %v4407_v10, %v638_v30 }
0x140c   :  { %v3923_v23 = vpop.eup %3922 }
0x140d   :  { %v664_v2 = vadd.f32 %v4413_v46, %v651_v32  ;;  %v640_v44 = vmul.f32 %v3923_v23, %v577_v43  ;;  %v3925_v52 = vpop.eup %3924 }
0x140e   :  { %v701_v57 = vadd.f32 1.0, %v3925_v52 }
0x140f   :  { %v682_v6 = vmul.f32 0.70710677, %v664_v2  ;;  %v653_v49 = vmul.f32 %v4407_v10, %v640_v44  ;;  %v673_v55 = vmul.f32 0.5, %v664_v2 }
0x1410   :  { %v710_v61 = vmul.f32 %v701_v57, %v674_v38 }
0x1411   :  { %3926 = verf.f32 %v682_v6  ;;  %v666_v33 = vadd.f32 %v4413_v46, %v653_v49 }
0x1413   :  { %v684_v45 = vmul.f32 0.70710677, %v666_v33  ;;  %v675_v62 = vmul.f32 0.5, %v666_v33 }
0x1415   :  { %3928 = verf.f32 %v684_v45 }
0x141b   :  { %v3927_v53 = vpop.eup %3926 }
0x141c   :  { %v700_v54 = vadd.f32 1.0, %v3927_v53 }
0x141e   :  { %v709_v56 = vmul.f32 %v700_v54, %v673_v55 }
0x141f   :  { %v3929_v58 = vpop.eup %3928 }
0x1420   :  { %3309 = vmatmul.mubr.f32.gmra.mrb[30].mxu1 %v709_v56  ;;  %v702_v10 = vadd.f32 1.0, %v3929_v58 }
0x1421   :  { %3311 = vmatprep.mubr.msk.f32.mxu1 %vm4011_vm2, %v4012_v35 }
0x1422   :  { %v711_v46 = vmul.f32 %v702_v10, %v675_v62 }
0x1424   :  { %3312 = vmatmul.mubr.f32.gmra.mrb[32].mxu1 %v710_v61 }
0x1425   :  { %3314 = vmatprep.mubr.msk.f32.mxu1 %vm4011_vm2, %v4012_v35 }
0x1428   :  { %3315 = vmatmul.mubr.f32.gmra.mrb[34].mxu1 %v711_v46 }
0x1429   :  { %3364 = vmatprep.mubr.msk.f32.mxu1 %vm4011_vm2, %v4012_v35 }
0x143a   :  { %v2086_v43 = vpop.permute.xlu0 %2085 }
0x143b   :  { %v4728_v63 = vmul.f32 %v4702_v39, %v2086_v43 }
0x143d   :  { %2090 = vrot.lane.b32.xlu1 %v4728_v63, %s4013_s29 }
0x1474   :  { %v901_v1 = vpop.xlane.xlu0 %900 }
0x1475   :  { %v913_v3 = vmul.f32 0.0078125, %v901_v1 }
0x1477   :  { %v922_v4 = vadd.f32 1e-05, %v913_v3 }
0x1479   :  { %3930 = vrsqrt.f32 %v922_v4 }
0x1483   :  { %v3931_v5 = vpop.eup %3930 }
0x1484   :  { %v940_v14 = vmul.f32 %v3931_v5, %v877_v51 }
0x1486   :  { %v953_v8 = vmul.f32 %v4548_v24, %v940_v14 }
0x1488   :  { %v966_v12 = vadd.f32 %v4554_v28, %v953_v8 }
0x148a   :  { %v984_v15 = vmul.f32 0.70710677, %v966_v12  ;;  %v975_v21 = vmul.f32 0.5, %v966_v12 }
0x148c   :  { %3932 = verf.f32 %v984_v15 }
0x1496   :  { %v3933_v9 = vpop.eup %3932 }
0x1497   :  { %v1002_v37 = vadd.f32 1.0, %v3933_v9 }
0x1499   :  { %v1011_v39 = vmul.f32 %v1002_v37, %v975_v21 }
0x149b   :  { %3365 = vmatmul.mubr.f32.vlgmr.msra.gmra.mrb[36].mxu1 %v1011_v39 }
0x149c   :  { %3367 = vmatprep.mubr.msk.f32.mxu1 %vm4011_vm2, %v4012_v35 }
0x14af   :  { %v4736_v42 = vpop.permute.xlu1 %2090 }
0x14b0   :  { %3495 = vmatmul.mubr.msk.f32.vlgmr.msra.gmra.mrb[28].mxu0 %vm51_vm0, %v4736_v42 }
0x14b1   :  { %3729 = vmatpush3.bf16.msra.mxu0 %v4575_v7  ;;  %3516 = vmatprep.mubr.msk.f32.mxu0 %vm4011_vm2, %v4012_v35 }
0x14b2   :  { %3730 = vmatprep.subr.bf16.mxu0 %v4010_v0 }
0x14b5   :  { %3732 = vmatpush3.bf16.msra.mxu0 %v4587_v13 }
0x14b6   :  { %3739 = vmatprep.subr.bf16.mxu0 %v4010_v0 }
0x14f3   :  { %v829_v51 = vpop.f32.mrb[30].mxu1 }
0x14f4   :  { %v3310_v41 = vpop.f32.mrb[31].mxu1  ;;  %v830_v33 = vadd.f32 %v4450_v16, %v829_v51 }
0x14f7   :  { %v4746_v26 = vpop.f32.mrb[32].mxu1 }
0x14f8   :  { %v3313_v17 = vpop.f32.mrb[33].mxu1 }
0x14fb   :  { %v4748_v27 = vpop.f32.mrb[34].mxu1 }
0x14fc   :  { %v3316_v19 = vpop.f32.mrb[35].mxu1 }
0x156e   :  { %v1127_v18 = vpop.f32.mrb[36].mxu1 }
0x156f   :  { %v3366_v50 = vpop.f32.mrb[37].mxu1  ;;  %v1128_v31 = vadd.f32 %v4613_v34, %v1127_v18 }
0x1583   :  { %v2261_v29 = vpop.f32.mrb[28].mxu0 }
0x1584   :  { %v2265_v30 = vadd.f32 %v2261_v29, %v1128_v31  ;;  %v3496_v32 = vpop.f32.mrb[29].mxu0 }
0x1585   :  { %v4007_v32 = vld [vmem:[%s5060_s1 + $0x1f3] ss:$0 sm:$0xff] }
0x1586   :  { %v3061_v23 = vmul.f32 -1.442695, %v2265_v30 }
0x1588   :  { %3934 = vpow2.f32 %v3061_v23  ;;  %v835_v23 = vadd.f32 %v4007_v32, %v4746_v26 }
0x1592   :  { %v3935_v36 = vpop.eup %3934 }
0x1593   :  { %v2269_v2 = vadd.f32 1.0, %v3935_v36 }
0x1595   :  { %3936 = vrcp.f32 %v2269_v2 }
0x159f   :  { %v3937_v44 = vpop.eup %3936 }
0x15a0   :  { %v2272_v6 = vmul.f32 2.0, %v3937_v44  ;;  %v2274_v53 = vmul.f32 %v3937_v44, %v4711_v11 }
0x15a2   :  { %v3062_v49 = vadd.f32 -1.0, %v2272_v6 }
0x15a4   :  { %2276 = vrot.lane.b32.xlu1 %v3062_v49, %s4014_s0 }
0x15c8   :  { %857 = vadd.xlane.f32.xlu1 %v830_v33 }
0x1616   :  { %v2277_v45 = vpop.permute.xlu1 %2276 }
0x1617   :  { %v2279_v52 = vmul.f32 %v3937_v44, %v2277_v45 }
0x1619   :  { %2281 = vrot.lane.b32.xlu0 %v2279_v52, %s4013_s29 }
0x1655   :  { %v858_v57 = vpop.xlane.xlu1 %857 }
0x1656   :  { %v869_v58 = vmul.f32 0.0078125, %v858_v57 }
0x1658   :  { %v878_v38 = vsub.f32 %v830_v33, %v869_v58 }
0x165a   :  { %v887_v61 = vmul.f32 %v878_v38, %v878_v38 }
0x168b   :  { %v2282_v55 = vpop.permute.xlu0 %2281 }
0x168c   :  { %v2284_v54 = vadd.f32 %v2282_v55, %v2274_v53 }
0x168e   :  { %3938 = vtanh.f32 %v2284_v54 }
0x1698   :  { %v3939_v56 = vpop.eup %3938 }
0x1699   :  { %2287 = vrot.lane.b32.xlu0 %v3939_v56, %s4014_s0 }
0x16b8   :  { %902 = vadd.xlane.f32.xlu0 %v887_v61 }
0x170b   :  { %v2288_v10 = vpop.permute.xlu0 %2287 }
0x170c   :  { %v4756_v16 = vmul.f32 %v3937_v44, %v2288_v10 }
0x170e   :  { %2292 = vrot.lane.b32.xlu1 %v4756_v16, %s4013_s29 }
0x1745   :  { %v903_v62 = vpop.xlane.xlu0 %902 }
0x1746   :  { %v914_v46 = vmul.f32 0.0078125, %v903_v62 }
0x1748   :  { %v923_v11 = vadd.f32 1e-05, %v914_v46 }
0x174a   :  { %3940 = vrsqrt.f32 %v923_v11 }
0x1754   :  { %v3941_v43 = vpop.eup %3940 }
0x1755   :  { %v941_v1 = vmul.f32 %v3941_v43, %v878_v38 }
0x1757   :  { %v954_v3 = vmul.f32 %v4548_v24, %v941_v1 }
0x1759   :  { %v967_v4 = vadd.f32 %v4554_v28, %v954_v3 }
0x175b   :  { %v985_v5 = vmul.f32 0.70710677, %v967_v4  ;;  %v976_v8 = vmul.f32 0.5, %v967_v4 }
0x175d   :  { %3942 = verf.f32 %v985_v5 }
0x1767   :  { %v3943_v14 = vpop.eup %3942 }
0x1768   :  { %v1003_v12 = vadd.f32 1.0, %v3943_v14 }
0x176a   :  { %v1012_v15 = vmul.f32 %v1003_v12, %v976_v8 }
0x176c   :  { %3368 = vmatmul.mubr.f32.gmra.mrb[38].mxu1 %v1012_v15 }
0x176d   :  { %3370 = vmatprep.mubr.msk.f32.mxu1 %vm4011_vm2, %v4012_v35 }
0x1780   :  { %v4764_v9 = vpop.permute.xlu1 %2292 }
0x1781   :  { %3517 = vmatmul.mubr.msk.f32.vlgmr.msra.gmra.mrb[30].mxu0 %vm51_vm0, %v4764_v9 }
0x1782   :  { %3741 = vmatpush3.bf16.msra.mxu0 %v4575_v7  ;;  %3538 = vmatprep.mubr.msk.f32.mxu0 %vm4011_vm2, %v4012_v35 }
0x1783   :  { %3742 = vmatprep.subr.bf16.mxu0 %v4010_v0 }
0x1786   :  { %3744 = vmatpush3.bf16.msra.mxu0 %v4587_v13 }
0x1787   :  { %3751 = vmatprep.subr.bf16.mxu0 %v4010_v0 }
0x183f   :  { %v1132_v21 = vpop.f32.mrb[38].mxu1 }
0x1840   :  { %v3369_v37 = vpop.f32.mrb[39].mxu1  ;;  %v1133_v39 = vadd.f32 %v4613_v34, %v1132_v21 }
0x1854   :  { %v2463_v51 = vpop.f32.mrb[30].mxu0 }
0x1855   :  { %v2467_v41 = vadd.f32 %v2463_v51, %v1133_v39  ;;  %v3518_v17 = vpop.f32.mrb[31].mxu0 }
0x1857   :  { %v3065_v19 = vmul.f32 -1.442695, %v2467_v41  ;;  %v840_v41 = vadd.f32 %v4007_v32, %v4748_v27  ;;  %v1264_v27 = vsel %vm51_vm0, %v4623_v60, 0.0  ;;  %v1487_v32 = vsel %vm51_vm0, %v4641_v25, 0.0 }
0x1859   :  { %3944 = vpow2.f32 %v3065_v19 }
0x1863   :  { %v3945_v18 = vpop.eup %3944 }
0x1864   :  { %v2471_v50 = vadd.f32 1.0, %v3945_v18 }
0x1866   :  { %3946 = vrcp.f32 %v2471_v50 }
0x1870   :  { %v3947_v31 = vpop.eup %3946 }
0x1871   :  { %v2474_v29 = vmul.f32 2.0, %v3947_v31  ;;  %v2476_v44 = vmul.f32 %v3947_v31, %v2284_v54 }
0x1873   :  { %v3066_v30 = vadd.f32 -1.0, %v2474_v29 }
0x1875   :  { %2478 = vrot.lane.b32.xlu1 %v3066_v30, %s4014_s0 }
0x1899   :  { %859 = vadd.xlane.f32.xlu1 %v835_v23 }
0x18e7   :  { %v2479_v36 = vpop.permute.xlu1 %2478 }
0x18e8   :  { %v2481_v2 = vmul.f32 %v3947_v31, %v2479_v36 }
0x18ea   :  { %2483 = vrot.lane.b32.xlu0 %v2481_v2, %s4013_s29  ;;  %v1891_v2 = vsel %vm51_vm0, %v4687_v20, 0.0 }
0x1926   :  { %v860_v45 = vpop.xlane.xlu1 %859 }
0x1927   :  { %v870_v52 = vmul.f32 0.0078125, %v860_v45 }
0x1929   :  { %v879_v53 = vsub.f32 %v835_v23, %v870_v52 }
0x192b   :  { %v888_v55 = vmul.f32 %v879_v53, %v879_v53 }
0x195c   :  { %v2484_v6 = vpop.permute.xlu0 %2483 }
0x195d   :  { %v2486_v49 = vadd.f32 %v2484_v6, %v2476_v44  ;;  %v2093_v44 = vsel %vm51_vm0, %v4736_v42, 0.0  ;;  %v2295_v6 = vsel %vm51_vm0, %v4764_v9, 0.0  ;;  %v4008_v9 = vld [vmem:[%s5060_s1 + $0x1f4] ss:$0 sm:$0xff] }
0x195f   :  { %3948 = vtanh.f32 %v2486_v49 }
0x1969   :  { %v3949_v33 = vpop.eup %3948 }
0x196a   :  { %2489 = vrot.lane.b32.xlu0 %v3949_v33, %s4014_s0 }
0x1989   :  { %904 = vadd.xlane.f32.xlu0 %v888_v55  ;;  %v4009_v55 = vld [vmem:[%s5060_s1 + $0x1f5] ss:$0 sm:$0xff] }
0x19dc   :  { %v2490_v56 = vpop.permute.xlu0 %2489 }
0x19dd   :  { %v4782_v57 = vmul.f32 %v3947_v31, %v2490_v56 }
0x19df   :  { %2494 = vrot.lane.b32.xlu1 %v4782_v57, %s4013_s29 }
0x1a16   :  { %v905_v26 = vpop.xlane.xlu0 %904 }
0x1a17   :  { %v915_v58 = vmul.f32 0.0078125, %v905_v26 }
0x1a19   :  { %v924_v54 = vadd.f32 1e-05, %v915_v58 }
0x1a1b   :  { %3950 = vrsqrt.f32 %v924_v54 }
0x1a25   :  { %v3951_v38 = vpop.eup %3950 }
0x1a26   :  { %v942_v61 = vmul.f32 %v3951_v38, %v879_v53 }
0x1a28   :  { %v955_v10 = vmul.f32 %v4548_v24, %v942_v61 }
0x1a2a   :  { %v968_v62 = vadd.f32 %v4554_v28, %v955_v10 }
0x1a2c   :  { %v986_v46 = vmul.f32 0.70710677, %v968_v62  ;;  %v977_v43 = vmul.f32 0.5, %v968_v62 }
0x1a2e   :  { %3952 = verf.f32 %v986_v46 }
0x1a38   :  { %v3953_v11 = vpop.eup %3952 }
0x1a39   :  { %v1004_v1 = vadd.f32 1.0, %v3953_v11 }
0x1a3b   :  { %v1013_v3 = vmul.f32 %v1004_v1, %v977_v43 }
0x1a3d   :  { %3371 = vmatmul.mubr.f32.gmra.mrb[40].mxu1 %v1013_v3 }
0x1a3e   :  { %3373 = vmatprep.mubr.msk.f32.mxu1 %vm4011_vm2, %v4012_v35 }
0x1a51   :  { %v2495_v4 = vpop.permute.xlu1 %2494 }
0x1a52   :  { %3539 = vmatmul.mubr.msk.f32.vlgmr.msra.gmra.mrb[32].mxu0 %vm51_vm0, %v2495_v4 }
0x1a53   :  { %3753 = vmatpush3.bf16.msra.mxu0 %v4575_v7  ;;  %3560 = vmatprep.mubr.msk.f32.mxu0 %vm4011_vm2, %v4012_v35 }
0x1a54   :  { %3754 = vmatprep.subr.bf16.mxu0 %v4010_v0 }
0x1a57   :  { %3756 = vmatpush3.bf16.msra.mxu0 %v4587_v13 }
0x1b10   :  { %v1137_v24 = vpop.f32.mrb[40].mxu1 }
0x1b11   :  { %v3372_v28 = vpop.f32.mrb[41].mxu1  ;;  %v1138_v5 = vadd.f32 %v4613_v34, %v1137_v24 }
0x1b25   :  { %v2665_v14 = vpop.f32.mrb[32].mxu0 }
0x1b26   :  { %v2669_v8 = vadd.f32 %v2665_v14, %v1138_v5  ;;  %v3540_v12 = vpop.f32.mrb[33].mxu0 }
0x1b28   :  { %v3069_v15 = vmul.f32 -1.442695, %v2669_v8 }
0x1b2a   :  { %3954 = vpow2.f32 %v3069_v15 }
0x1b34   :  { %v3955_v21 = vpop.eup %3954 }
0x1b35   :  { %v2673_v37 = vadd.f32 1.0, %v3955_v21 }
0x1b37   :  { %3956 = vrcp.f32 %v2673_v37 }
0x1b41   :  { %v3957_v7 = vpop.eup %3956 }
0x1b42   :  { %v2676_v39 = vmul.f32 2.0, %v3957_v7  ;;  %v2678_v19 = vmul.f32 %v3957_v7, %v2486_v49  ;;  %v2497_v49 = vsel %vm51_vm0, %v2495_v4, 0.0 }
0x1b44   :  { %v3070_v51 = vadd.f32 -1.0, %v2676_v39 }
0x1b46   :  { %2680 = vrot.lane.b32.xlu1 %v3070_v51, %s4014_s0 }
0x1b6a   :  { %861 = vadd.xlane.f32.xlu1 %v840_v41 }
0x1bb8   :  { %v2681_v13 = vpop.permute.xlu1 %2680 }
0x1bb9   :  { %v2683_v17 = vmul.f32 %v3957_v7, %v2681_v13 }
0x1bbb   :  { %2685 = vrot.lane.b32.xlu0 %v2683_v17, %s4013_s29 }
0x1bf7   :  { %v862_v29 = vpop.xlane.xlu1 %861 }
0x1bf8   :  { %v871_v30 = vmul.f32 0.0078125, %v862_v29  ;;  %v1689_v29 = vsel %vm51_vm0, %v4659_v48, 0.0 }
0x1bfa   :  { %v880_v23 = vsub.f32 %v840_v41, %v871_v30 }
0x1bfc   :  { %v889_v36 = vmul.f32 %v880_v23, %v880_v23 }
0x1c2d   :  { %v2686_v18 = vpop.permute.xlu0 %2685 }
0x1c2e   :  { %v4800_v50 = vadd.f32 %v2686_v18, %v2678_v19 }
0x1c30   :  { %3958 = vtanh.f32 %v4800_v50 }
0x1c3a   :  { %v3959_v31 = vpop.eup %3958 }
0x1c3b   :  { %2691 = vrot.lane.b32.xlu0 %v3959_v31, %s4014_s0 }
0x1c5a   :  { %906 = vadd.xlane.f32.xlu0 %v889_v36 }
0x1c5e   :  { %1265 = vadd.xlane.f32.xlu0 %v1264_v27 }
0x1c62   :  { %1488 = vadd.xlane.f32.xlu0 %v1487_v32 }
0x1c66   :  { %1892 = vadd.xlane.f32.xlu0 %v1891_v2 }
0x1c6a   :  { %2094 = vadd.xlane.f32.xlu0 %v2093_v44 }
0x1c6e   :  { %2296 = vadd.xlane.f32.xlu0 %v2295_v6 }
0x1c72   :  { %2498 = vadd.xlane.f32.xlu0 %v2497_v49 }
0x1cad   :  { %v2692_v60 = vpop.permute.xlu0 %2691 }
0x1cae   :  { %v4815_v33 = vmul.f32 %v3957_v7, %v2692_v60 }
0x1cb0   :  { %2696 = vrot.lane.b32.xlu1 %v4815_v33, %s4013_s29 }
0x1ce7   :  { %v907_v25 = vpop.xlane.xlu0 %906 }
0x1ce8   :  { %v916_v20 = vmul.f32 0.0078125, %v907_v25 }
0x1cea   :  { %v925_v45 = vadd.f32 1e-05, %v916_v20 }
0x1ceb   :  { %v1266_v46 = vpop.xlane.xlu0 %1265 }
0x1cec   :  { %3960 = vrsqrt.f32 %v925_v45  ;;  %v1268_v11 = vmul.f32 0.03125, %v1266_v46 }
0x1cee   :  { %v4830_v43 = vsub.f32 %v4619_v59, %v1268_v11 }
0x1cef   :  { %v1489_v18 = vpop.xlane.xlu0 %1488 }
0x1cf0   :  { %v1270_v1 = vmul.f32 %v4830_v43, %v4830_v43 }
0x1cf3   :  { %v1893_v31 = vpop.xlane.xlu0 %1892 }
0x1cf4   :  { %v1894_v27 = vmul.f32 0.03125, %v1893_v31 }
0x1cf6   :  { %v3961_v52 = vpop.eup %3960  ;;  %v4852_v44 = vsub.f32 %v4680_v47, %v1894_v27 }
0x1cf7   :  { %v943_v42 = vmul.f32 %v3961_v52, %v880_v23  ;;  %v2095_v30 = vpop.xlane.xlu0 %2094  ;;  %v1490_v23 = vmul.f32 0.03125, %v1489_v18 }
0x1cf8   :  { %v1896_v48 = vmul.f32 %v4852_v44, %v4852_v44 }
0x1cf9   :  { %v956_v53 = vmul.f32 %v4008_v9, %v943_v42  ;;  %v4847_v36 = vsub.f32 %v4637_v22, %v1490_v23  ;;  %v2096_v9 = vmul.f32 0.03125, %v2095_v30 }
0x1cfb   :  { %v969_v56 = vadd.f32 %v4009_v55, %v956_v53  ;;  %v1492_v2 = vmul.f32 %v4847_v36, %v4847_v36 }
0x1cfd   :  { %v987_v26 = vmul.f32 0.70710677, %v969_v56  ;;  %v978_v54 = vmul.f32 0.5, %v969_v56  ;;  %v4878_v56 = vsub.f32 %v4728_v63, %v2096_v9  ;;  %v1153_v9 = vld [vmem:[%s5060_s1 + $0x1e8] sm:$0xff] }
0x1cff   :  { %3962 = verf.f32 %v987_v26 }
0x1d09   :  { %v3963_v58 = vpop.eup %3962 }
0x1d0a   :  { %v1005_v38 = vadd.f32 1.0, %v3963_v58 }
0x1d0c   :  { %v1014_v61 = vmul.f32 %v1005_v38, %v978_v54  ;;  %v2098_v54 = vmul.f32 %v4878_v56, %v4878_v56 }
0x1d0e   :  { %3374 = vmatmul.mubr.f32.gmra.mrb[42].mxu1 %v1014_v61 }
0x1d0f   :  { %3395 = vmatprep.mubr.msk.f32.mxu1 %vm4011_vm2, %v4012_v35 }
0x1d22   :  { %v2697_v10 = vpop.permute.xlu1 %2696 }
0x1d23   :  { %3561 = vmatmul.mubr.msk.f32.vlgmr.msra.gmra.mrb[34].mxu0 %vm51_vm0, %v2697_v10  ;;  %v2699_v62 = vsel %vm51_vm0, %v2697_v10, 0.0 }
0x1d24   :  { %2700 = vadd.xlane.f32.xlu0 %v2699_v62 }
0x1d3a   :  { %1272 = vrot.lane.b32.xlu0 %v1270_v1, %s4013_s29 }
0x1de1   :  { %v1142_v3 = vpop.f32.mrb[42].mxu1 }
0x1de2   :  { %v3375_v4 = vpop.f32.mrb[43].mxu1  ;;  %v1143_v24 = vadd.f32 %v4613_v34, %v1142_v3 }
0x1df6   :  { %v2867_v28 = vpop.f32.mrb[34].mxu0 }
0x1df7   :  { %v2871_v5 = vadd.f32 %v2867_v28, %v1143_v24  ;;  %v3562_v14 = vpop.f32.mrb[35].mxu0 }
0x1df9   :  { %v3073_v8 = vmul.f32 -1.442695, %v2871_v5 }
0x1dfb   :  { %3964 = vpow2.f32 %v3073_v8 }
0x1e05   :  { %v3965_v12 = vpop.eup %3964 }
0x1e06   :  { %v2875_v15 = vadd.f32 1.0, %v3965_v12 }
0x1e08   :  { %3966 = vrcp.f32 %v2875_v15 }
0x1e12   :  { %v3967_v21 = vpop.eup %3966 }
0x1e13   :  { %v2878_v59 = vmul.f32 2.0, %v3967_v21  ;;  %v2880_v51 = vmul.f32 %v3967_v21, %v4800_v50  ;;  %v2297_v50 = vpop.xlane.xlu0 %2296 }
0x1e14   :  { %v2298_v6 = vmul.f32 0.03125, %v2297_v50 }
0x1e15   :  { %v3074_v37 = vadd.f32 -1.0, %v2878_v59 }
0x1e16   :  { %v4858_v60 = vsub.f32 %v4756_v16, %v2298_v6 }
0x1e17   :  { %2882 = vrot.lane.b32.xlu1 %v3074_v37, %s4014_s0  ;;  %v2499_v32 = vpop.xlane.xlu0 %2498  ;;  %v3041_v37 = vld [vmem:[%s5060_s1 + $0x1fc] ss:$0 sm:$0xff] }
0x1e18   :  { %v2300_v25 = vmul.f32 %v4858_v60, %v4858_v60  ;;  %v2500_v38 = vmul.f32 0.03125, %v2499_v32 }
0x1e1a   :  { %v4889_v63 = vsub.f32 %v4782_v57, %v2500_v38  ;;  %v3040_v57 = vld [vmem:[%s5060_s1 + $0x1fb] ss:$0 sm:$0xff] }
0x1e1b   :  { %v2701_v49 = vpop.xlane.xlu0 %2700 }
0x1e1c   :  { %v2702_v22 = vmul.f32 0.03125, %v2701_v49  ;;  %v2502_v61 = vmul.f32 %v4889_v63, %v4889_v63 }
0x1e1e   :  { %v4864_v20 = vsub.f32 %v4815_v33, %v2702_v22 }
0x1e1f   :  { %v1273_v10 = vpop.permute.xlu0 %1272 }
0x1e20   :  { %v2704_v47 = vmul.f32 %v4864_v20, %v4864_v20  ;;  %v1275_v62 = vsel %vm51_vm0, %v1273_v10, 0.0 }
0x1e89   :  { %v2883_v7 = vpop.permute.xlu1 %2882 }
0x1e8a   :  { %v2885_v39 = vmul.f32 %v3967_v21, %v2883_v7 }
0x1e8c   :  { %2887 = vrot.lane.b32.xlu1 %v2885_v39, %s4013_s29 }
0x1efe   :  { %v2888_v34 = vpop.permute.xlu1 %2887 }
0x1eff   :  { %v2890_v41 = vadd.f32 %v2888_v34, %v2880_v51 }
0x1f01   :  { %3968 = vtanh.f32 %v2890_v41 }
0x1f0b   :  { %v3969_v13 = vpop.eup %3968 }
0x1f0c   :  { %2893 = vrot.lane.b32.xlu1 %v3969_v13, %s4014_s0 }
0x1f7e   :  { %v2894_v17 = vpop.permute.xlu1 %2893 }
0x1f7f   :  { %v4840_v19 = vmul.f32 %v3967_v21, %v2894_v17 }
0x1f81   :  { %2898 = vrot.lane.b32.xlu1 %v4840_v19, %s4013_s29 }
0x1fa5   :  { %1690 = vadd.xlane.f32.xlu1 %v1689_v29 }
0x1fb6   :  { %1494 = vrot.lane.b32.xlu1 %v1492_v2, %s4013_s29 }
0x1fba   :  { %1898 = vrot.lane.b32.xlu1 %v1896_v48, %s4013_s29 }
0x1fbe   :  { %2302 = vrot.lane.b32.xlu1 %v2300_v25, %s4013_s29 }
0x1fc2   :  { %2706 = vrot.lane.b32.xlu1 %v2704_v47, %s4013_s29 }
0x1ff3   :  { %v2899_v45 = vpop.permute.xlu1 %2898 }
0x1ff4   :  { %v3001_v16 = vsel %vm51_vm0, %v2899_v45, %v2890_v41 }
0x1ff5   :  { %v3003_v52 = vsel %vm3002_vm3, %v3001_v16, 0.0  ;;  %v1151_v16 = vld [vmem:[%s5060_s1 + $0x1d8] sm:$0xff] }
0x1ff6   :  { %3004 = vst [vmem:[%s5062_s2 + $0x48] sm:$0xff] %v3003_v52  ;;  %v1152_v52 = vld [vmem:[%s5060_s1 + $0x1e0] sm:$0xff] }
0x2032   :  { %v1691_v42 = vpop.xlane.xlu1 %1690 }
0x2033   :  { %v1692_v33 = vmul.f32 0.03125, %v1691_v42 }
0x2035   :  { %v4875_v53 = vsub.f32 %v4655_v40, %v1692_v33  ;;  %v2901_v40 = vsel %vm51_vm0, %v2899_v45, 0.0  ;;  %v1150_v45 = vld [vmem:[%s5060_s1 + $0x1d0] sm:$0xff]  ;;  %v4931_v33 = vpack.c.bf16 %v1153_v9, %v1152_v52 }
0x2036   :  { %v1495_v55 = vpop.permute.xlu1 %1494  ;;  %v4925_v42 = vpack.c.bf16 %v1151_v16, %v1150_v45 }
0x2037   :  { %v1694_v26 = vmul.f32 %v4875_v53, %v4875_v53  ;;  %v1497_v58 = vsel %vm51_vm0, %v1495_v55, 0.0 }
0x2038   :  { %1498 = vadd.xlane.f32.xlu1 %v1497_v58  ;;  %3663 = vmatpush3.bf16.msra.mxu1 %v4925_v42 }
0x2039   :  { %1696 = vrot.lane.b32.xlu0 %v1694_v26, %s4013_s29  ;;  %3664 = vmatprep.subr.bf16.mxu1 %v4010_v0 }
0x203a   :  { %v1899_v1 = vpop.permute.xlu1 %1898 }
0x203b   :  { %v1901_v3 = vsel %vm51_vm0, %v1899_v1, 0.0 }
0x203c   :  { %3666 = vmatpush3.bf16.msra.mxu1 %v4931_v33 }
0x203d   :  { %2100 = vrot.lane.b32.xlu0 %v2098_v54, %s4013_s29  ;;  %3673 = vmatprep.subr.bf16.mxu1 %v4010_v0 }
0x203e   :  { %v2303_v4 = vpop.permute.xlu1 %2302 }
0x203f   :  { %v2305_v24 = vsel %vm51_vm0, %v2303_v4, 0.0 }
0x2042   :  { %v2707_v5 = vpop.permute.xlu1 %2706 }
0x2043   :  { %v2709_v14 = vsel %vm51_vm0, %v2707_v5, 0.0 }
0x205c   :  { %2902 = vadd.xlane.f32.xlu0 %v2901_v40 }
0x2072   :  { %2504 = vrot.lane.b32.xlu0 %v2502_v61, %s4013_s29 }
0x2091   :  { %1276 = vadd.xlane.f32.xlu0 %v1275_v62 }
0x20ab   :  { %v1697_v46 = vpop.permute.xlu0 %1696 }
0x20ac   :  { %v1699_v11 = vsel %vm51_vm0, %v1697_v46, 0.0 }
0x20ad   :  { %1700 = vadd.xlane.f32.xlu0 %v1699_v11 }
0x20af   :  { %v2101_v28 = vpop.permute.xlu0 %2100 }
0x20b0   :  { %v2103_v59 = vsel %vm51_vm0, %v2101_v28, 0.0 }
0x20b1   :  { %1902 = vadd.xlane.f32.xlu0 %v1901_v3 }
0x20c5   :  { %v1499_v51 = vpop.xlane.xlu1 %1498 }
0x20c6   :  { %v1500_v31 = vmul.f32 0.03125, %v1499_v51 }
0x20c7   :  { %1287 = vrot.lane.b32.xlu0 %v3040_v57, %s4015_s3 }
0x20c8   :  { %v1501_v27 = vadd.f32 1e-05, %v1500_v31 }
0x20ca   :  { %3970 = vrsqrt.f32 %v1501_v27 }
0x20d4   :  { %v3971_v55 = vpop.eup %3970 }
0x20d5   :  { %v1503_v62 = vmul.f32 %v3971_v55, %v4847_v36 }
0x20e6   :  { %2306 = vadd.xlane.f32.xlu0 %v2305_v24 }
0x20e9   :  { %v2903_v8 = vpop.xlane.xlu0 %2902 }
0x20ea   :  { %v2904_v12 = vmul.f32 0.03125, %v2903_v8  ;;  %2710 = vadd.xlane.f32.xlu0 %v2709_v14 }
0x20ec   :  { %v4903_v15 = vsub.f32 %v4840_v19, %v2904_v12 }
0x20ed   :  { %v2505_v7 = vpop.permute.xlu0 %2504 }
0x20ee   :  { %v2906_v21 = vmul.f32 %v4903_v15, %v4903_v15  ;;  %v2507_v39 = vsel %vm51_vm0, %v2505_v7, 0.0 }
0x20f0   :  { %2908 = vrot.lane.b32.xlu1 %v2906_v21, %s4013_s29 }
0x2114   :  { %2104 = vadd.xlane.f32.xlu1 %v2103_v59 }
0x211e   :  { %v1277_v13 = vpop.xlane.xlu0 %1276 }
0x211f   :  { %v1278_v23 = vmul.f32 0.03125, %v1277_v13 }
0x2121   :  { %v1279_v49 = vadd.f32 1e-05, %v1278_v23 }
0x2125   :  { %1296 = vrot.lane.b32.xlu1 %v3041_v37, %s4015_s3 }
0x213a   :  { %v1701_v17 = vpop.xlane.xlu0 %1700 }
0x213b   :  { %v1702_v29 = vmul.f32 0.03125, %v1701_v17 }
0x213d   :  { %v1703_v32 = vadd.f32 1e-05, %v1702_v29 }
0x213e   :  { %v1903_v19 = vpop.xlane.xlu0 %1902 }
0x213f   :  { %v1904_v50 = vmul.f32 0.03125, %v1903_v19  ;;  %3972 = vrsqrt.f32 %v1703_v32 }
0x2141   :  { %v1905_v2 = vadd.f32 1e-05, %v1904_v50 }
0x2142   :  { %v4914_v18 = vpop.permute.xlu0 %1287 }
0x2143   :  { %3974 = vrsqrt.f32 %v1905_v2  ;;  %v1504_v57 = vmul.f32 %v1503_v62, %v4914_v18 }
0x2144   :  { %3976 = vrsqrt.f32 %v1279_v49 }
0x2149   :  { %2508 = vadd.xlane.f32.xlu1 %v2507_v39  ;;  %v3973_v26 = vpop.eup %3972 }
0x214a   :  { %v1705_v40 = vmul.f32 %v3973_v26, %v4875_v53 }
0x214c   :  { %v1706_v4 = vmul.f32 %v1705_v40, %v4914_v18 }
0x214d   :  { %v3975_v58 = vpop.eup %3974 }
0x214e   :  { %v3977_v54 = vpop.eup %3976  ;;  %v1907_v38 = vmul.f32 %v3975_v58, %v4852_v44 }
0x214f   :  { %v1281_v46 = vmul.f32 %v3977_v54, %v4830_v43 }
0x2150   :  { %v1908_v44 = vmul.f32 %v1907_v38, %v4914_v18 }
0x2151   :  { %v1290_v3 = vmul.f32 %v4914_v18, %v1281_v46 }
0x2162   :  { %v2909_v34 = vpop.permute.xlu1 %2908 }
0x2163   :  { %v2911_v41 = vsel %vm51_vm0, %v2909_v34, 0.0 }
0x2164   :  { %2912 = vadd.xlane.f32.xlu0 %v2911_v41 }
0x2173   :  { %v2307_v30 = vpop.xlane.xlu0 %2306 }
0x2174   :  { %v2308_v6 = vmul.f32 0.03125, %v2307_v30 }
0x2176   :  { %v2309_v22 = vadd.f32 1e-05, %v2308_v6 }
0x2177   :  { %v2711_v48 = vpop.xlane.xlu0 %2710 }
0x2178   :  { %v2712_v25 = vmul.f32 0.03125, %v2711_v48  ;;  %3978 = vrsqrt.f32 %v2309_v22 }
0x217a   :  { %v2713_v47 = vadd.f32 1e-05, %v2712_v25 }
0x217c   :  { %3980 = vrsqrt.f32 %v2713_v47 }
0x2182   :  { %v3979_v10 = vpop.eup %3978 }
0x2183   :  { %v2311_v53 = vmul.f32 %v3979_v10, %v4858_v60 }
0x2185   :  { %v2312_v60 = vmul.f32 %v2311_v53, %v4914_v18 }
0x2186   :  { %v3981_v28 = vpop.eup %3980 }
0x2187   :  { %v2715_v21 = vmul.f32 %v3981_v28, %v4864_v20 }
0x2189   :  { %v2716_v39 = vmul.f32 %v2715_v21, %v4914_v18 }
0x21a1   :  { %v2105_v61 = vpop.xlane.xlu1 %2104 }
0x21a2   :  { %v2106_v11 = vmul.f32 0.03125, %v2105_v61 }
0x21a4   :  { %v2107_v1 = vadd.f32 1e-05, %v2106_v11 }
0x21a5   :  { %v4944_v24 = vpop.permute.xlu1 %1296 }
0x21a6   :  { %3982 = vrsqrt.f32 %v2107_v1  ;;  %v1299_v36 = vadd.f32 %v4944_v24, %v1290_v3  ;;  %v1505_v43 = vadd.f32 %v1504_v57, %v4944_v24  ;;  %v1707_v5 = vadd.f32 %v1706_v4, %v4944_v24 }
0x21a7   :  { %v1909_v14 = vadd.f32 %v1908_v44, %v4944_v24  ;;  %v2313_v7 = vadd.f32 %v2312_v60, %v4944_v24  ;;  %v2717_v34 = vadd.f32 %v2716_v39, %v4944_v24 }
0x21a8   :  { %v1301_v8 = vmul.f32 0.70710677, %v1299_v36  ;;  %v1507_v12 = vmul.f32 0.70710677, %v1505_v43  ;;  %v1709_v59 = vmul.f32 0.70710677, %v1707_v5 }
0x21a9   :  { %v1911_v37 = vmul.f32 0.70710677, %v1909_v14  ;;  %v2315_v51 = vmul.f32 0.70710677, %v2313_v7  ;;  %v2719_v17 = vmul.f32 0.70710677, %v2717_v34 }
0x21aa   :  { %3984 = verf.f32 %v1301_v8  ;;  %v1300_v29 = vmul.f32 0.5, %v1299_v36  ;;  %v1506_v27 = vmul.f32 0.5, %v1505_v43  ;;  %v1910_v16 = vmul.f32 0.5, %v1909_v14 }
0x21ab   :  { %3986 = verf.f32 %v1507_v12  ;;  %v2314_v26 = vmul.f32 0.5, %v2313_v7  ;;  %v2718_v62 = vmul.f32 0.5, %v2717_v34 }
0x21ac   :  { %3988 = verf.f32 %v1709_v59 }
0x21ad   :  { %3990 = verf.f32 %v1911_v37 }
0x21ae   :  { %3992 = verf.f32 %v2315_v51 }
0x21af   :  { %3994 = verf.f32 %v2719_v17 }
0x21b0   :  { %v3983_v41 = vpop.eup %3982 }
0x21b1   :  { %v2109_v13 = vmul.f32 %v3983_v41, %v4878_v56  ;;  %v1708_v56 = vmul.f32 0.5, %v1707_v5 }
0x21b3   :  { %v2110_v20 = vmul.f32 %v2109_v13, %v4914_v18 }
0x21b4   :  { %v3985_v19 = vpop.eup %3984 }
0x21b5   :  { %v3987_v31 = vpop.eup %3986  ;;  %v1303_v30 = vadd.f32 1.0, %v3985_v19  ;;  %v2111_v50 = vadd.f32 %v2110_v20, %v4944_v24 }
0x21b6   :  { %v3989_v23 = vpop.eup %3988  ;;  %v1509_v32 = vadd.f32 1.0, %v3987_v31 }
0x21b7   :  { %v1304_v2 = vmul.f32 %v1303_v30, %v1300_v29  ;;  %v2113_v6 = vmul.f32 0.70710677, %v2111_v50  ;;  %v1711_v48 = vadd.f32 1.0, %v3989_v23  ;;  %v3991_v22 = vpop.eup %3990  ;;  %v2112_v40 = vmul.f32 0.5, %v2111_v50  ;;  %v3042_v30 = vld [vmem:[%s5060_s1 + $0x1f7] ss:$0 sm:$0xff] }
0x21b8   :  { %v1510_v49 = vmul.f32 %v1509_v32, %v1506_v27  ;;  %v1913_v47 = vadd.f32 1.0, %v3991_v22  ;;  %v3993_v45 = vpop.eup %3992 }
0x21b9   :  { %1310 = vrot.lane.b32.xlu0 %v1304_v2, %s4013_s29  ;;  %3996 = verf.f32 %v2113_v6  ;;  %v1712_v25 = vmul.f32 %v1711_v48, %v1708_v56  ;;  %v2317_v9 = vadd.f32 1.0, %v3993_v45  ;;  %v3995_v55 = vpop.eup %3994 }
0x21ba   :  { %1512 = vrot.lane.b32.xlu1 %v1510_v49, %s4013_s29  ;;  %v1914_v52 = vmul.f32 %v1913_v47, %v1910_v16  ;;  %v2721_v61 = vadd.f32 1.0, %v3995_v55 }
0x21bb   :  { %v2318_v54 = vmul.f32 %v2317_v9, %v2314_v26 }
0x21bc   :  { %v2722_v46 = vmul.f32 %v2721_v61, %v2718_v62 }
0x21be   :  { %1714 = vrot.lane.b32.xlu1 %v1712_v25, %s4013_s29 }
0x21c2   :  { %1916 = vrot.lane.b32.xlu1 %v1914_v52, %s4013_s29 }
0x21c3   :  { %v3997_v58 = vpop.eup %3996 }
0x21c4   :  { %v2115_v38 = vadd.f32 1.0, %v3997_v58 }
0x21c6   :  { %2320 = vrot.lane.b32.xlu1 %v2318_v54, %s4013_s29  ;;  %v2116_v10 = vmul.f32 %v2115_v38, %v2112_v40 }
0x21c8   :  { %2118 = vrot.lane.b32.xlu0 %v2116_v10, %s4013_s29 }
0x21ca   :  { %2724 = vrot.lane.b32.xlu1 %v2722_v46, %s4013_s29 }
0x21d6   :  { %v2509_v11 = vpop.xlane.xlu1 %2508 }
0x21d7   :  { %v2510_v1 = vmul.f32 0.03125, %v2509_v11 }
0x21d9   :  { %v2511_v3 = vadd.f32 1e-05, %v2510_v1 }
0x21db   :  { %3998 = vrsqrt.f32 %v2511_v3 }
0x21e5   :  { %v3999_v57 = vpop.eup %3998 }
0x21e6   :  { %v2513_v4 = vmul.f32 %v3999_v57, %v4889_v63 }
0x21e8   :  { %v2514_v53 = vmul.f32 %v2513_v4, %v4914_v18 }
0x21ea   :  { %v2515_v44 = vadd.f32 %v2514_v53, %v4944_v24 }
0x21ec   :  { %v2517_v28 = vmul.f32 0.70710677, %v2515_v44  ;;  %v2516_v8 = vmul.f32 0.5, %v2515_v44 }
0x21ee   :  { %4000 = verf.f32 %v2517_v28 }
0x21f1   :  { %v2913_v36 = vpop.xlane.xlu0 %2912 }
0x21f2   :  { %v2914_v43 = vmul.f32 0.03125, %v2913_v36 }
0x21f4   :  { %v2915_v5 = vadd.f32 1e-05, %v2914_v43 }
0x21f6   :  { %4002 = vrsqrt.f32 %v2915_v5 }
0x21f8   :  { %v4001_v14 = vpop.eup %4000 }
0x21f9   :  { %v2519_v12 = vadd.f32 1.0, %v4001_v14 }
0x21fb   :  { %v2520_v21 = vmul.f32 %v2519_v12, %v2516_v8 }
0x21fd   :  { %2522 = vrot.lane.b32.xlu0 %v2520_v21, %s4013_s29 }
0x2200   :  { %v4003_v59 = vpop.eup %4002 }
0x2201   :  { %v2917_v60 = vmul.f32 %v4003_v59, %v4903_v15 }
0x2203   :  { %v2918_v63 = vmul.f32 %v2917_v60, %v4914_v18 }
0x2205   :  { %v2919_v37 = vadd.f32 %v2918_v63, %v4944_v24 }
0x2207   :  { %v2921_v7 = vmul.f32 0.70710677, %v2919_v37  ;;  %v2920_v51 = vmul.f32 0.5, %v2919_v37 }
0x2209   :  { %4004 = verf.f32 %v2921_v7 }
0x2213   :  { %v4005_v39 = vpop.eup %4004 }
0x2214   :  { %v2923_v34 = vadd.f32 1.0, %v4005_v39 }
0x2216   :  { %v2924_v41 = vmul.f32 %v2923_v34, %v2920_v51 }
0x2218   :  { %2926 = vrot.lane.b32.xlu0 %v2924_v41, %s4013_s29 }
0x222b   :  { %v1311_v13 = vpop.permute.xlu0 %1310 }
0x222c   :  { %3396 = vmatmul.mubr.msk.f32.vlgmr.msra.gmra.mrb[44].mxu1 %vm51_vm0, %v1311_v13  ;;  %v1513_v15 = vpop.permute.xlu1 %1512 }
0x222d   :  { %3675 = vmatpush3.bf16.msra.mxu1 %v4925_v42  ;;  %3417 = vmatprep.mubr.msk.f32.mxu1 %vm4011_vm2, %v4012_v35 }
0x222e   :  { %3676 = vmatprep.subr.bf16.mxu1 %v4010_v0 }
0x2230   :  { %v1715_v18 = vpop.permute.xlu1 %1714 }
0x2231   :  { %3678 = vmatpush3.bf16.msra.mxu1 %v4931_v33 }
0x2232   :  { %3685 = vmatprep.subr.bf16.mxu1 %v4010_v0 }
0x2234   :  { %3418 = vmatmul.mubr.msk.f32.vlgmr.msra.gmra.mrb[46].mxu1 %vm51_vm0, %v1513_v15  ;;  %v1917_v24 = vpop.permute.xlu1 %1916 }
0x2235   :  { %3687 = vmatpush3.bf16.msra.mxu1 %v4925_v42  ;;  %3439 = vmatprep.mubr.msk.f32.mxu1 %vm4011_vm2, %v4012_v35 }
0x2236   :  { %3688 = vmatprep.subr.bf16.mxu1 %v4010_v0 }
0x2238   :  { %v2321_v17 = vpop.permute.xlu1 %2320 }
0x2239   :  { %3690 = vmatpush3.bf16.msra.mxu1 %v4931_v33 }
0x223a   :  { %3697 = vmatprep.subr.bf16.mxu1 %v4010_v0  ;;  %v2119_v20 = vpop.permute.xlu0 %2118 }
0x223c   :  { %3440 = vmatmul.mubr.msk.f32.vlgmr.msra.gmra.mrb[48].mxu1 %vm51_vm0, %v1715_v18  ;;  %v2725_v31 = vpop.permute.xlu1 %2724 }
0x223d   :  { %3699 = vmatpush3.bf16.msra.mxu1 %v4925_v42  ;;  %3461 = vmatprep.mubr.msk.f32.mxu1 %vm4011_vm2, %v4012_v35 }
0x223e   :  { %3700 = vmatprep.subr.bf16.mxu1 %v4010_v0 }
0x2241   :  { %3702 = vmatpush3.bf16.msra.mxu1 %v4931_v33 }
0x2242   :  { %3709 = vmatprep.subr.bf16.mxu1 %v4010_v0 }
0x2244   :  { %3462 = vmatmul.mubr.msk.f32.vlgmr.msra.gmra.mrb[50].mxu1 %vm51_vm0, %v1917_v24 }
0x2245   :  { %3711 = vmatpush3.bf16.msra.mxu1 %v4925_v42  ;;  %3483 = vmatprep.mubr.msk.f32.mxu1 %vm4011_vm2, %v4012_v35 }
0x2246   :  { %3712 = vmatprep.subr.bf16.mxu1 %v4010_v0 }
0x2249   :  { %3714 = vmatpush3.bf16.msra.mxu1 %v4931_v33 }
0x224a   :  { %3721 = vmatprep.subr.bf16.mxu1 %v4010_v0 }
0x224c   :  { %3484 = vmatmul.mubr.msk.f32.vlgmr.msra.gmra.mrb[52].mxu1 %vm51_vm0, %v2119_v20 }
0x224d   :  { %3723 = vmatpush3.bf16.msra.mxu1 %v4925_v42  ;;  %3505 = vmatprep.mubr.msk.f32.mxu1 %vm4011_vm2, %v4012_v35 }
0x224e   :  { %3724 = vmatprep.subr.bf16.mxu1 %v4010_v0 }
0x2251   :  { %3726 = vmatpush3.bf16.msra.mxu1 %v4931_v33 }
0x2252   :  { %3733 = vmatprep.subr.bf16.mxu1 %v4010_v0 }
0x2254   :  { %3506 = vmatmul.mubr.msk.f32.vlgmr.msra.gmra.mrb[54].mxu1 %vm51_vm0, %v2321_v17 }
0x2255   :  { %3735 = vmatpush3.bf16.msra.mxu1 %v4925_v42  ;;  %3527 = vmatprep.mubr.msk.f32.mxu1 %vm4011_vm2, %v4012_v35 }
0x2256   :  { %3736 = vmatprep.subr.bf16.mxu1 %v4010_v0 }
0x2259   :  { %3738 = vmatpush3.bf16.msra.mxu1 %v4931_v33 }
0x225a   :  { %3745 = vmatprep.subr.bf16.mxu1 %v4010_v0 }
0x226f   :  { %v2523_v19 = vpop.permute.xlu0 %2522 }
0x2270   :  { %3528 = vmatmul.mubr.msk.f32.vlgmr.msra.gmra.mrb[56].mxu1 %vm51_vm0, %v2523_v19 }
0x2271   :  { %3747 = vmatpush3.bf16.msra.mxu1 %v4925_v42  ;;  %3549 = vmatprep.mubr.msk.f32.mxu1 %vm4011_vm2, %v4012_v35 }
0x2272   :  { %3748 = vmatprep.subr.bf16.mxu1 %v4010_v0 }
0x2275   :  { %3750 = vmatpush3.bf16.msra.mxu1 %v4931_v33 }
0x2276   :  { %3757 = vmatprep.subr.bf16.mxu1 %v4010_v0 }
0x2278   :  { %3550 = vmatmul.mubr.msk.f32.vlgmr.msra.gmra.mrb[58].mxu1 %vm51_vm0, %v2725_v31 }
0x2279   :  { %3759 = vmatpush3.bf16.msra.mxu1 %v4925_v42  ;;  %3571 = vmatprep.mubr.msk.f32.mxu1 %vm4011_vm2, %v4012_v35 }
0x227a   :  { %3760 = vmatprep.subr.bf16.mxu1 %v4010_v0 }
0x227d   :  { %3762 = vmatpush3.bf16.msra.mxu1 %v4931_v33 }
0x228a   :  { %v2927_v29 = vpop.permute.xlu0 %2926 }
0x228b   :  { %3572 = vmatmul.mubr.msk.f32.vlgmr.msra.gmra.mrb[60].mxu1 %vm51_vm0, %v2927_v29 }
0x22ff   :  { %v1380_v50 = vpop.f32.mrb[44].mxu1 }
0x2300   :  { %v1381_v23 = vadd.f32 %v3042_v30, %v1380_v50  ;;  %v3397_v27 = vpop.f32.mrb[45].mxu1 }
0x2302   :  { %1384 = vst [vmem:[%s5062_s2] sm:$0xff] %v1381_v23 }
0x2307   :  { %v1582_v42 = vpop.f32.mrb[46].mxu1 }
0x2308   :  { %v1583_v35 = vadd.f32 %v3042_v30, %v1582_v42  ;;  %v3419_v32 = vpop.f32.mrb[47].mxu1 }
0x230a   :  { %1586 = vst [vmem:[%s5062_s2 + $0x8] sm:$0xff] %v1583_v35 }
0x230f   :  { %v1784_v0 = vpop.f32.mrb[48].mxu1 }
0x2310   :  { %v1785_v33 = vadd.f32 %v3042_v30, %v1784_v0  ;;  %v3441_v2 = vpop.f32.mrb[49].mxu1 }
0x2312   :  { %1788 = vst [vmem:[%s5062_s2 + $0x10] sm:$0xff] %v1785_v33 }
0x2317   :  { %v1986_v6 = vpop.f32.mrb[50].mxu1 }
0x2318   :  { %v1987_v49 = vadd.f32 %v3042_v30, %v1986_v6  ;;  %v3463_v48 = vpop.f32.mrb[51].mxu1 }
0x231a   :  { %1990 = vst [vmem:[%s5062_s2 + $0x18] sm:$0xff] %v1987_v49 }
0x231f   :  { %v2188_v22 = vpop.f32.mrb[52].mxu1 }
0x2320   :  { %v2189_v56 = vadd.f32 %v3042_v30, %v2188_v22  ;;  %v3485_v25 = vpop.f32.mrb[53].mxu1 }
0x2322   :  { %2192 = vst [vmem:[%s5062_s2 + $0x20] sm:$0xff] %v2189_v56 }
0x2327   :  { %v2390_v47 = vpop.f32.mrb[54].mxu1 }
0x2328   :  { %v2391_v45 = vadd.f32 %v3042_v30, %v2390_v47  ;;  %v3507_v16 = vpop.f32.mrb[55].mxu1 }
0x232a   :  { %2394 = vst [vmem:[%s5062_s2 + $0x28] sm:$0xff] %v2391_v45 }
0x2343   :  { %v2592_v52 = vpop.f32.mrb[56].mxu1 }
0x2344   :  { %v2593_v9 = vadd.f32 %v3042_v30, %v2592_v52  ;;  %v3529_v55 = vpop.f32.mrb[57].mxu1 }
0x2346   :  { %2596 = vst [vmem:[%s5062_s2 + $0x30] sm:$0xff] %v2593_v9 }
0x234b   :  { %v2794_v26 = vpop.f32.mrb[58].mxu1 }
0x234c   :  { %v2795_v58 = vadd.f32 %v3042_v30, %v2794_v26  ;;  %v3551_v54 = vpop.f32.mrb[59].mxu1 }
0x234e   :  { %2798 = vst [vmem:[%s5062_s2 + $0x38] sm:$0xff] %v2795_v58 }
0x235e   :  { %v2996_v40 = vpop.f32.mrb[60].mxu1 }
0x235f   :  { %v2997_v38 = vadd.f32 %v3042_v30, %v2996_v40  ;;  %v3573_v61 = vpop.f32.mrb[61].mxu1 }
0x2361   :  { %3000 = vst [vmem:[%s5062_s2 + $0x40] sm:$0xff] %v2997_v38 }

</bundles_post_ra>
